<compile_context>
chip_gen: v7x
topology: tpu7x:2x2x1
jax: 0.10.0
libtpu: 0.0.40
codegen_flags: <defaults>
</compile_context>

<pallas_src>
import functools

import jax
import jax.numpy as jnp
from jax import lax
from jax.experimental import pallas as pl
from jax.experimental.pallas import tpu as pltpu

EXPANSION = 4


# --------------------------------- kernel ---------------------------------- #

def _bottleneck_kernel(x_ref, w1_ref, b1_ref, w2_ref, b2_ref, w3_ref, b3_ref,
                       o_ref, y1pad_ref, *conv2_scratch, use_im2col):
    """Fused bottleneck forward for one (image, row-tile) grid step.

    x_ref     : (H, W, Cin) bf16, full image (resident across row tiles)
    w1_ref    : (Cin, width)            bf16, BN1 scale folded into columns
    w2_ref    : (9*width, width) im2col | (9, width, width) accum form, BN2 folded
    w3_ref    : (width, Cout)           bf16, BN3 scale folded
    b*_ref    : (1, C) f32 biases
    o_ref     : (th, W, Cout) bf16 output tile
    y1pad_ref : VMEM (th+2, W+2, width) bf16 zero-padded conv1 output
    conv2_scratch (im2col only): VMEM (th*W, 9*width) bf16 patch matrix
    """
    H, W, Cin = x_ref.shape
    th, _, Cout = o_ref.shape
    width = w1_ref.shape[1]
    cdt = jnp.bfloat16

    t = pl.program_id(1)
    num_t = pl.num_programs(1)
    row0 = pl.multiple_of(t * th, th)

    def conv1(rows):  # (R, Cin) bf16 -> (R, width) bf16 : conv1 + bn1 + relu
        acc = jnp.dot(rows, w1_ref[...], preferred_element_type=jnp.float32)
        return jnp.maximum(acc + b1_ref[...], 0.0).astype(cdt)

    # --- stage 1: conv1 + bn1 + relu into the zero-padded buffer. Only the
    # 1-px border ring is zeroed (interior is fully overwritten below); the
    # top/bottom border rows are zeroed only at the image boundary, otherwise
    # they carry recomputed halo rows from the resident image block.
    zcol = jnp.zeros((th + 2, 1, width), cdt)
    y1pad_ref[:, 0:1, :] = zcol
    y1pad_ref[:, W + 1:W + 2, :] = zcol

    x_main = x_ref[pl.ds(row0, th)]                              # (th, W, Cin)
    y1pad_ref[1:th + 1, 1:W + 1, :] = conv1(
        x_main.reshape(th * W, Cin)).reshape(th, W, width)

    @pl.when(t == 0)
    def _():
        y1pad_ref[0:1, :, :] = jnp.zeros((1, W + 2, width), cdt)

    @pl.when(t > 0)
    def _():
        top = x_ref[pl.ds(row0 - 1, 1)].reshape(W, Cin)
        y1pad_ref[0:1, 1:W + 1, :] = conv1(top).reshape(1, W, width)

    @pl.when(t == num_t - 1)
    def _():
        y1pad_ref[th + 1:th + 2, :, :] = jnp.zeros((1, W + 2, width), cdt)

    @pl.when(t < num_t - 1)
    def _():
        bot = x_ref[pl.ds(row0 + th, 1)].reshape(W, Cin)
        y1pad_ref[th + 1:th + 2, 1:W + 1, :] = conv1(bot).reshape(1, W, width)

    # --- stage 2: 3x3 conv + bn2 + relu.
    if use_im2col:
        # Deep-K matmul (K = 9*width); patch column writes are 128-lane aligned
        # because this path is only chosen when width % 128 == 0.
        patch_ref, = conv2_scratch
        for dy in range(3):
            for dx in range(3):
                tap = dy * 3 + dx
                patch_ref[:, tap * width:(tap + 1) * width] = (
                    y1pad_ref[dy:dy + th, dx:dx + W, :].reshape(th * W, width))
        acc2 = jnp.dot(patch_ref[...], w2_ref[...],
                       preferred_element_type=jnp.float32)
    else:
        # Nine accumulated K=width matmuls; no patch buffer, no misaligned
        # column stores (width < 128 stages, and the preferred v5e form).
        acc2 = jnp.zeros((th * W, width), jnp.float32)
        for dy in range(3):
            for dx in range(3):
                tap = dy * 3 + dx
                acc2 = acc2 + jnp.dot(
                    y1pad_ref[dy:dy + th, dx:dx + W, :].reshape(th * W, width),
                    w2_ref[tap], preferred_element_type=jnp.float32)

    y2 = jnp.maximum(acc2 + b2_ref[...], 0.0).astype(cdt)        # (th*W, width)

    # --- stage 3: conv3 + bn3 + residual add + relu. Elementwise math in f32
    # (v5e VPU has no bf16), lane-dense bf16 store.
    acc3 = jnp.dot(y2, w3_ref[...], preferred_element_type=jnp.float32)
    res = x_main.reshape(th * W, Cout).astype(jnp.float32)
    y3 = jnp.maximum(acc3 + b3_ref[...] + res, 0.0)
    o_ref[...] = y3.reshape(th, W, Cout).astype(o_ref.dtype)


# --------------------------------- wrapper --------------------------------- #

def _fold_bn(gamma, beta, mean, var, eps):
    scale = gamma / jnp.sqrt(var + eps)
    bias = beta - mean * scale
    return scale.reshape(1, -1), bias.reshape(1, -1)


def bottleneck_forward(x_nhwc, params, *, row_tile=None,
                       out_dtype=jnp.bfloat16,
                       vmem_limit_bytes=48 * 1024 * 1024):
    """Fused Bottleneck forward. Input/output are NHWC (no wrapper transposes)."""
    eps = params["eps"]
    N, H, W, Cin = x_nhwc.shape

    # PyTorch Conv2d weights: (Cout, Cin, kh, kw) -> channel-last matmul form.
    w1 = params["w1"][:, :, 0, 0].T                              # (Cin, width)
    width = w1.shape[1]
    w3 = params["w3"][:, :, 0, 0].T                              # (width, Cout)
    Cout = w3.shape[1]

    # TODO(synk): downsample branch / stride>1 / groups>1 are not implemented.
    assert Cin == Cout, "identity add needs in_channel == out_channel*expansion"

    s1, b1 = _fold_bn(*params["bn1"], eps)
    s2, b2 = _fold_bn(*params["bn2"], eps)
    s3, b3 = _fold_bn(*params["bn3"], eps)

    # Fold BN scales into weight columns; cast matmul operands to bf16.
    cdt = jnp.bfloat16
    w1f = (w1 * s1).astype(cdt)
    w3f = (w3 * s3).astype(cdt)

    # Static choice of conv2 strategy (see kernel docstring).
    use_im2col = (width % 128 == 0)
    w2_hwio = jnp.transpose(params["w2"], (2, 3, 1, 0))          # (3,3,Cin,Cout)
    if use_im2col:
        w2f = (w2_hwio.reshape(9 * width, width) * s2).astype(cdt)
        w2_spec = pl.BlockSpec((9 * width, width), lambda n, t: (0, 0))
        conv2_scratch = [pltpu.VMEM((0, 0), cdt)]                # placeholder
    else:
        w2f = (w2_hwio.reshape(9, width, width) * s2).astype(cdt)
        w2_spec = pl.BlockSpec((9, width, width), lambda n, t: (0, 0, 0))
        conv2_scratch = []

    x_bf = x_nhwc.astype(cdt)

    # Row tiling: default is the full image (one grid step per image) so there
    # is no halo recompute and matmul M = H*W. Fall back to a divisor tile for
    # very tall images.
    if row_tile is None:
        row_tile = H if H <= 64 else 32
    th = max(1, min(row_tile, H))
    while H % th:
        th -= 1
    num_t = H // th

    scratch_shapes = [pltpu.VMEM((th + 2, W + 2, width), cdt)]   # padded conv1
    if use_im2col:
        scratch_shapes.append(pltpu.VMEM((th * W, 9 * width), cdt))

    grid_spec = pltpu.PrefetchScalarGridSpec(
        num_scalar_prefetch=0,
        grid=(N, num_t),
        in_specs=[
            # Per-image block; block index constant over the row axis so it
            # stays resident in VMEM while that image's tiles are processed.
            pl.BlockSpec((None, H, W, Cin), lambda n, t: (n, 0, 0, 0)),
            # Small weights / biases: constant index maps -> fetched once.
            pl.BlockSpec((Cin, width), lambda n, t: (0, 0)),
            pl.BlockSpec((1, width), lambda n, t: (0, 0)),
            w2_spec,
            pl.BlockSpec((1, width), lambda n, t: (0, 0)),
            pl.BlockSpec((width, Cout), lambda n, t: (0, 0)),
            pl.BlockSpec((1, Cout), lambda n, t: (0, 0)),
        ],
        out_specs=pl.BlockSpec((None, th, W, Cout), lambda n, t: (n, t, 0, 0)),
        scratch_shapes=scratch_shapes,
    )

    # Batch axis parallel (shards across v7x's 2 TCs); row-tile axis sequential
    # per core so the resident image block is never re-DMA'd by the other core.
    if N == 1:
        dim_sem = ("parallel", "parallel")
    else:
        dim_sem = ("parallel", "arbitrary")

    out = pl.pallas_call(
        functools.partial(_bottleneck_kernel, use_im2col=use_im2col),
        out_shape=jax.ShapeDtypeStruct((N, H, W, Cout), out_dtype),
        grid_spec=grid_spec,
        compiler_params=pltpu.CompilerParams(
            dimension_semantics=dim_sem,
            # Stays under v7x's 64 MiB VMEM; v5e/v6e (128 MiB) can raise this
            # if pushing to much larger resident tiles.
            vmem_limit_bytes=vmem_limit_bytes,
        ),
    )(x_bf, w1f, b1, w2f, b2, w3f, b3)

    return out                                                   # NHWC


# Fix the placeholder above: when use_im2col is True we actually need the real
# patch scratch; the placeholder variable is unused (scratch_shapes is built
# directly in bottleneck_forward).  Kept minimal on purpose.


# ---------------------------- module param init ---------------------------- #

def init_bottleneck_params(key, in_channel, out_channel,
                           groups=1, width_per_group=64, eps=1e-5):
    width = int(out_channel * (width_per_group / 64.0)) * groups
    keys = jax.random.split(key, 15)
    w1 = 0.1 * jax.random.normal(keys[0], (width, in_channel, 1, 1), jnp.float32)
    w2 = 0.1 * jax.random.normal(keys[1], (width, width, 3, 3), jnp.float32)
    w3 = 0.1 * jax.random.normal(keys[2], (out_channel * EXPANSION, width, 1, 1),
                                 jnp.float32)

    def bn(kg, kb, km, kv, c):
        gamma = 1.0 + 0.1 * jax.random.normal(kg, (c,), jnp.float32)
        beta = 0.1 * jax.random.normal(kb, (c,), jnp.float32)
        mean = 0.1 * jax.random.normal(km, (c,), jnp.float32)
        var = jax.random.uniform(kv, (c,), jnp.float32, 0.5, 1.5)
        return gamma, beta, mean, var

    bn1 = bn(keys[3], keys[4], keys[5], keys[6], width)
    bn2 = bn(keys[7], keys[8], keys[9], keys[10], width)
    bn3 = bn(keys[11], keys[12], keys[13], keys[14], out_channel * EXPANSION)
    return dict(w1=w1, w2=w2, w3=w3, bn1=bn1, bn2=bn2, bn3=bn3, eps=eps)


# ---------------------------- plain-JAX reference --------------------------- #

def reference_forward_nhwc(x, params):
    eps = params["eps"]

    def conv(inp, w_oihw, pad=0):
        w = jnp.transpose(w_oihw, (2, 3, 1, 0))                  # OIHW -> HWIO
        return lax.conv_general_dilated(
            inp, w, window_strides=(1, 1),
            padding=[(pad, pad), (pad, pad)],
            dimension_numbers=("NHWC", "HWIO", "NHWC"))

    def bn(inp, p):
        gamma, beta, mean, var = p
        scale = gamma / jnp.sqrt(var + eps)
        bias = beta - mean * scale
        return inp * scale.reshape(1, 1, 1, -1) + bias.reshape(1, 1, 1, -1)

    out = jax.nn.relu(bn(conv(x, params["w1"]), params["bn1"]))
    out = jax.nn.relu(bn(conv(out, params["w2"], pad=1), params["bn2"]))
    out = bn(conv(out, params["w3"]), params["bn3"])
    return jax.nn.relu(out + x)


# ------------------------------------ main ---------------------------------- #

if __name__ == "__main__":
    key = jax.random.PRNGKey(0)
    kx, kp = jax.random.split(key)

    # in_channel == out_channel * expansion so the identity branch applies
    # (downsample=None, stride=1 — the module defaults). Cout = 128 keeps the
    # output store lane-dense. Layout is NHWC end-to-end (no transposes).
    in_channel, out_channel = 128, 32
    N, H, W = 2, 16, 16

    x = jax.random.normal(kx, (N, H, W, in_channel), jnp.float32)   # NHWC
    params = init_bottleneck_params(kp, in_channel, out_channel)

    out = bottleneck_forward(x, params)          # th = H -> one step per image
    out = jax.block_until_ready(out)

    ref = reference_forward_nhwc(x, params)
    assert out.shape == ref.shape == (N, H, W, out_channel * EXPANSION)
    # bf16 matmul operands + bf16 intermediates/output (f32 accumulation)
    # -> loosened tolerance vs the f32 reference.
    if not jnp.allclose(out.astype(jnp.float32), ref, atol=6e-2, rtol=6e-2):
        raise AssertionError("Pallas Bottleneck output does not match reference")

    print("KERNEL_OK")
</pallas_src>

<mosaic_0001>
module attributes {stable_mosaic.version = 11 : i64} {
  func.func @_bottleneck_kernel(%arg0: i32, %arg1: i32, %arg2: memref<1x16x16x128xbf16, #tpu.memory_space<vmem>>, %arg3: memref<128x32xbf16, #tpu.memory_space<vmem>>, %arg4: memref<1x32xf32, #tpu.memory_space<vmem>>, %arg5: memref<9x32x32xbf16, #tpu.memory_space<vmem>>, %arg6: memref<1x32xf32, #tpu.memory_space<vmem>>, %arg7: memref<32x128xbf16, #tpu.memory_space<vmem>>, %arg8: memref<1x128xf32, #tpu.memory_space<vmem>>, %arg9: memref<1x16x16x128xbf16, #tpu.memory_space<vmem>>, %arg10: memref<18x18x32xbf16, #tpu.memory_space<vmem>>) attributes {dimension_semantics = [#tpu.dimension_semantics<parallel>, #tpu.dimension_semantics<arbitrary>], iteration_bounds = array<i64: 2, 1>, scalar_prefetch = 0 : i64, scratch_operands = 1 : i64, tpu.core_type = #tpu.core_type<tc>, window_params = [{transform_indices = @transform_0, window_bounds = array<i64: 1, 16, 16, 128>}, {pipeline_mode = #tpu.pipeline_mode<synchronous>, transform_indices = @transform_1, window_bounds = array<i64: 128, 32>}, {pipeline_mode = #tpu.pipeline_mode<synchronous>, transform_indices = @transform_2, window_bounds = array<i64: 1, 32>}, {pipeline_mode = #tpu.pipeline_mode<synchronous>, transform_indices = @transform_3, window_bounds = array<i64: 9, 32, 32>}, {pipeline_mode = #tpu.pipeline_mode<synchronous>, transform_indices = @transform_4, window_bounds = array<i64: 1, 32>}, {pipeline_mode = #tpu.pipeline_mode<synchronous>, transform_indices = @transform_5, window_bounds = array<i64: 32, 128>}, {pipeline_mode = #tpu.pipeline_mode<synchronous>, transform_indices = @transform_6, window_bounds = array<i64: 1, 128>}, {transform_indices = @transform_7, window_bounds = array<i64: 1, 16, 16, 128>}]} {
    %c16_i32 = arith.constant 16 : i32
    %0 = arith.muli %arg1, %c16_i32 : i32
    %1 = tpu.assume_multiple %0, 16 : i32
    %cst = arith.constant 0.000000e+00 : bf16
    %2 = vector.broadcast %cst : bf16 to vector<18x1x32xbf16>
    %c0 = arith.constant 0 : index
    %c0_0 = arith.constant 0 : index
    %c0_1 = arith.constant 0 : index
    %3 = vector.load %arg10[%c0, %c0_0, %c0_1] : memref<18x18x32xbf16, #tpu.memory_space<vmem>>, vector<18x1x32xbf16>
    tpu.vector_store %arg10[%c0, %c0_0, %c0_1], %2 {strides = array<i32>} : memref<18x18x32xbf16, #tpu.memory_space<vmem>>, vector<18x1x32xbf16>,
    %c0_2 = arith.constant 0 : index
    %c17 = arith.constant 17 : index
    %c0_3 = arith.constant 0 : index
    %4 = vector.load %arg10[%c0_2, %c17, %c0_3] : memref<18x18x32xbf16, #tpu.memory_space<vmem>>, vector<18x1x32xbf16>
    tpu.vector_store %arg10[%c0_2, %c17, %c0_3], %2 {strides = array<i32>} : memref<18x18x32xbf16, #tpu.memory_space<vmem>>, vector<18x1x32xbf16>,
    %c0_4 = arith.constant 0 : index
    %5 = arith.index_cast %1 : i32 to index
    %c0_5 = arith.constant 0 : index
    %c0_6 = arith.constant 0 : index
    %6 = vector.load %arg2[%c0_4, %5, %c0_5, %c0_6] : memref<1x16x16x128xbf16, #tpu.memory_space<vmem>>, vector<1x16x16x128xbf16>
    %7 = vector.shape_cast %6 : vector<1x16x16x128xbf16> to vector<16x16x128xbf16>
    %8 = vector.shape_cast %7 : vector<16x16x128xbf16> to vector<256x128xbf16>
    %c0_7 = arith.constant 0 : index
    %c0_8 = arith.constant 0 : index
    %9 = vector.load %arg3[%c0_7, %c0_8] : memref<128x32xbf16, #tpu.memory_space<vmem>>, vector<128x32xbf16>
    %cst_9 = arith.constant dense<0.000000e+00> : vector<256x32xf32>
    %10 = tpu.matmul %8, %9, %cst_9 {dimension_numbers = #tpu.dot_dimension_numbers<[1], [0], [0], [1], [0, 0, 1, 1], [], []>} : vector<256x128xbf16>, vector<128x32xbf16>, vector<256x32xf32> -> vector<256x32xf32>
    %c0_10 = arith.constant 0 : index
    %c0_11 = arith.constant 0 : index
    %11 = vector.load %arg4[%c0_10, %c0_11] : memref<1x32xf32, #tpu.memory_space<vmem>>, vector<1x32xf32>
    %12 = vector.broadcast %11 : vector<1x32xf32> to vector<256x32xf32>
    %13 = arith.addf %10, %12 : vector<256x32xf32>
    %cst_12 = arith.constant 0.000000e+00 : f32
    %14 = vector.broadcast %cst_12 : f32 to vector<256x32xf32>
    %15 = arith.maximumf %13, %14 : vector<256x32xf32>
    %16 = arith.truncf %15 : vector<256x32xf32> to vector<256x32xbf16>
    %17 = vector.shape_cast %16 : vector<256x32xbf16> to vector<16x16x32xbf16>
    %c1 = arith.constant 1 : index
    %c1_13 = arith.constant 1 : index
    %c0_14 = arith.constant 0 : index
    %18 = vector.load %arg10[%c1, %c1_13, %c0_14] : memref<18x18x32xbf16, #tpu.memory_space<vmem>>, vector<16x16x32xbf16>
    tpu.vector_store %arg10[%c1, %c1_13, %c0_14], %17 {strides = array<i32>} : memref<18x18x32xbf16, #tpu.memory_space<vmem>>, vector<16x16x32xbf16>,
    %c0_i32 = arith.constant 0 : i32
    %19 = arith.cmpi eq, %arg1, %c0_i32 : i32
    %20 = arith.extui %19 : i1 to i32
    %c0_i32_15 = arith.constant 0 : i32
    %21 = arith.cmpi ne, %20, %c0_i32_15 : i32
    scf.if %21 {
      %cst_92 = arith.constant 0.000000e+00 : bf16
      %107 = vector.broadcast %cst_92 : bf16 to vector<1x18x32xbf16>
      %c0_93 = arith.constant 0 : index
      %c0_94 = arith.constant 0 : index
      %c0_95 = arith.constant 0 : index
      %108 = vector.load %arg10[%c0_93, %c0_94, %c0_95] : memref<18x18x32xbf16, #tpu.memory_space<vmem>>, vector<1x18x32xbf16>
      tpu.vector_store %arg10[%c0_93, %c0_94, %c0_95], %107 {strides = array<i32>} : memref<18x18x32xbf16, #tpu.memory_space<vmem>>, vector<1x18x32xbf16>,
    } else {
    }
    %c0_i32_16 = arith.constant 0 : i32
    %22 = arith.cmpi sgt, %arg1, %c0_i32_16 : i32
    %23 = arith.extui %22 : i1 to i32
    %c0_i32_17 = arith.constant 0 : i32
    %24 = arith.cmpi ne, %23, %c0_i32_17 : i32
    scf.if %24 {
      %c1_i32 = arith.constant 1 : i32
      %107 = arith.subi %1, %c1_i32 : i32
      %c0_92 = arith.constant 0 : index
      %108 = arith.index_cast %107 : i32 to index
      %c0_93 = arith.constant 0 : index
      %c0_94 = arith.constant 0 : index
      %109 = vector.load %arg2[%c0_92, %108, %c0_93, %c0_94] : memref<1x16x16x128xbf16, #tpu.memory_space<vmem>>, vector<1x1x16x128xbf16>
      %110 = vector.shape_cast %109 : vector<1x1x16x128xbf16> to vector<1x16x128xbf16>
      %111 = vector.shape_cast %110 : vector<1x16x128xbf16> to vector<16x128xbf16>
      %c0_95 = arith.constant 0 : index
      %c0_96 = arith.constant 0 : index
      %112 = vector.load %arg3[%c0_95, %c0_96] : memref<128x32xbf16, #tpu.memory_space<vmem>>, vector<128x32xbf16>
      %cst_97 = arith.constant dense<0.000000e+00> : vector<16x32xf32>
      %113 = tpu.matmul %111, %112, %cst_97 {dimension_numbers = #tpu.dot_dimension_numbers<[1], [0], [0], [1], [0, 0, 1, 1], [], []>} : vector<16x128xbf16>, vector<128x32xbf16>, vector<16x32xf32> -> vector<16x32xf32>
      %c0_98 = arith.constant 0 : index
      %c0_99 = arith.constant 0 : index
      %114 = vector.load %arg4[%c0_98, %c0_99] : memref<1x32xf32, #tpu.memory_space<vmem>>, vector<1x32xf32>
      %115 = vector.broadcast %114 : vector<1x32xf32> to vector<16x32xf32>
      %116 = arith.addf %113, %115 : vector<16x32xf32>
      %cst_100 = arith.constant 0.000000e+00 : f32
      %117 = vector.broadcast %cst_100 : f32 to vector<16x32xf32>
      %118 = arith.maximumf %116, %117 : vector<16x32xf32>
      %119 = arith.truncf %118 : vector<16x32xf32> to vector<16x32xbf16>
      %120 = vector.shape_cast %119 : vector<16x32xbf16> to vector<1x16x32xbf16>
      %c0_101 = arith.constant 0 : index
      %c1_102 = arith.constant 1 : index
      %c0_103 = arith.constant 0 : index
      %121 = vector.load %arg10[%c0_101, %c1_102, %c0_103] : memref<18x18x32xbf16, #tpu.memory_space<vmem>>, vector<1x16x32xbf16>
      tpu.vector_store %arg10[%c0_101, %c1_102, %c0_103], %120 {strides = array<i32>} : memref<18x18x32xbf16, #tpu.memory_space<vmem>>, vector<1x16x32xbf16>,
    } else {
    }
    %c0_i32_18 = arith.constant 0 : i32
    %25 = arith.cmpi eq, %arg1, %c0_i32_18 : i32
    %26 = arith.extui %25 : i1 to i32
    %c0_i32_19 = arith.constant 0 : i32
    %27 = arith.cmpi ne, %26, %c0_i32_19 : i32
    scf.if %27 {
      %cst_92 = arith.constant 0.000000e+00 : bf16
      %107 = vector.broadcast %cst_92 : bf16 to vector<1x18x32xbf16>
      %c17_93 = arith.constant 17 : index
      %c0_94 = arith.constant 0 : index
      %c0_95 = arith.constant 0 : index
      %108 = vector.load %arg10[%c17_93, %c0_94, %c0_95] : memref<18x18x32xbf16, #tpu.memory_space<vmem>>, vector<1x18x32xbf16>
      tpu.vector_store %arg10[%c17_93, %c0_94, %c0_95], %107 {strides = array<i32>} : memref<18x18x32xbf16, #tpu.memory_space<vmem>>, vector<1x18x32xbf16>,
    } else {
    }
    %c0_i32_20 = arith.constant 0 : i32
    %28 = arith.cmpi slt, %arg1, %c0_i32_20 : i32
    %29 = arith.extui %28 : i1 to i32
    %c0_i32_21 = arith.constant 0 : i32
    %30 = arith.cmpi ne, %29, %c0_i32_21 : i32
    scf.if %30 {
      %c16_i32_92 = arith.constant 16 : i32
      %107 = arith.addi %1, %c16_i32_92 : i32
      %c0_93 = arith.constant 0 : index
      %108 = arith.index_cast %107 : i32 to index
      %c0_94 = arith.constant 0 : index
      %c0_95 = arith.constant 0 : index
      %109 = vector.load %arg2[%c0_93, %108, %c0_94, %c0_95] : memref<1x16x16x128xbf16, #tpu.memory_space<vmem>>, vector<1x1x16x128xbf16>
      %110 = vector.shape_cast %109 : vector<1x1x16x128xbf16> to vector<1x16x128xbf16>
      %111 = vector.shape_cast %110 : vector<1x16x128xbf16> to vector<16x128xbf16>
      %c0_96 = arith.constant 0 : index
      %c0_97 = arith.constant 0 : index
      %112 = vector.load %arg3[%c0_96, %c0_97] : memref<128x32xbf16, #tpu.memory_space<vmem>>, vector<128x32xbf16>
      %cst_98 = arith.constant dense<0.000000e+00> : vector<16x32xf32>
      %113 = tpu.matmul %111, %112, %cst_98 {dimension_numbers = #tpu.dot_dimension_numbers<[1], [0], [0], [1], [0, 0, 1, 1], [], []>} : vector<16x128xbf16>, vector<128x32xbf16>, vector<16x32xf32> -> vector<16x32xf32>
      %c0_99 = arith.constant 0 : index
      %c0_100 = arith.constant 0 : index
      %114 = vector.load %arg4[%c0_99, %c0_100] : memref<1x32xf32, #tpu.memory_space<vmem>>, vector<1x32xf32>
      %115 = vector.broadcast %114 : vector<1x32xf32> to vector<16x32xf32>
      %116 = arith.addf %113, %115 : vector<16x32xf32>
      %cst_101 = arith.constant 0.000000e+00 : f32
      %117 = vector.broadcast %cst_101 : f32 to vector<16x32xf32>
      %118 = arith.maximumf %116, %117 : vector<16x32xf32>
      %119 = arith.truncf %118 : vector<16x32xf32> to vector<16x32xbf16>
      %120 = vector.shape_cast %119 : vector<16x32xbf16> to vector<1x16x32xbf16>
      %c17_102 = arith.constant 17 : index
      %c1_103 = arith.constant 1 : index
      %c0_104 = arith.constant 0 : index
      %121 = vector.load %arg10[%c17_102, %c1_103, %c0_104] : memref<18x18x32xbf16, #tpu.memory_space<vmem>>, vector<1x16x32xbf16>
      tpu.vector_store %arg10[%c17_102, %c1_103, %c0_104], %120 {strides = array<i32>} : memref<18x18x32xbf16, #tpu.memory_space<vmem>>, vector<1x16x32xbf16>,
    } else {
    }
    %cst_22 = arith.constant 0.000000e+00 : f32
    %31 = vector.broadcast %cst_22 : f32 to vector<256x32xf32>
    %c0_23 = arith.constant 0 : index
    %c0_24 = arith.constant 0 : index
    %c0_25 = arith.constant 0 : index
    %32 = vector.load %arg10[%c0_23, %c0_24, %c0_25] : memref<18x18x32xbf16, #tpu.memory_space<vmem>>, vector<16x16x32xbf16>
    %33 = vector.shape_cast %32 : vector<16x16x32xbf16> to vector<256x32xbf16>
    %c0_26 = arith.constant 0 : index
    %c0_27 = arith.constant 0 : index
    %c0_28 = arith.constant 0 : index
    %34 = vector.load %arg5[%c0_26, %c0_27, %c0_28] : memref<9x32x32xbf16, #tpu.memory_space<vmem>>, vector<1x32x32xbf16>
    %35 = vector.shape_cast %34 : vector<1x32x32xbf16> to vector<32x32xbf16>
    %cst_29 = arith.constant dense<0.000000e+00> : vector<256x32xf32>
    %36 = tpu.matmul %33, %35, %cst_29 {dimension_numbers = #tpu.dot_dimension_numbers<[1], [0], [0], [1], [0, 0, 1, 1], [], []>} : vector<256x32xbf16>, vector<32x32xbf16>, vector<256x32xf32> -> vector<256x32xf32>
    %37 = arith.addf %31, %36 : vector<256x32xf32>
    %c0_30 = arith.constant 0 : index
    %c1_31 = arith.constant 1 : index
    %c0_32 = arith.constant 0 : index
    %38 = vector.load %arg10[%c0_30, %c1_31, %c0_32] : memref<18x18x32xbf16, #tpu.memory_space<vmem>>, vector<16x16x32xbf16>
    %39 = vector.shape_cast %38 : vector<16x16x32xbf16> to vector<256x32xbf16>
    %c1_33 = arith.constant 1 : index
    %c0_34 = arith.constant 0 : index
    %c0_35 = arith.constant 0 : index
    %40 = vector.load %arg5[%c1_33, %c0_34, %c0_35] : memref<9x32x32xbf16, #tpu.memory_space<vmem>>, vector<1x32x32xbf16>
    %41 = vector.shape_cast %40 : vector<1x32x32xbf16> to vector<32x32xbf16>
    %cst_36 = arith.constant dense<0.000000e+00> : vector<256x32xf32>
    %42 = tpu.matmul %39, %41, %cst_36 {dimension_numbers = #tpu.dot_dimension_numbers<[1], [0], [0], [1], [0, 0, 1, 1], [], []>} : vector<256x32xbf16>, vector<32x32xbf16>, vector<256x32xf32> -> vector<256x32xf32>
    %43 = arith.addf %37, %42 : vector<256x32xf32>
    %c0_37 = arith.constant 0 : index
    %c2 = arith.constant 2 : index
    %c0_38 = arith.constant 0 : index
    %44 = vector.load %arg10[%c0_37, %c2, %c0_38] : memref<18x18x32xbf16, #tpu.memory_space<vmem>>, vector<16x16x32xbf16>
    %45 = vector.shape_cast %44 : vector<16x16x32xbf16> to vector<256x32xbf16>
    %c2_39 = arith.constant 2 : index
    %c0_40 = arith.constant 0 : index
    %c0_41 = arith.constant 0 : index
    %46 = vector.load %arg5[%c2_39, %c0_40, %c0_41] : memref<9x32x32xbf16, #tpu.memory_space<vmem>>, vector<1x32x32xbf16>
    %47 = vector.shape_cast %46 : vector<1x32x32xbf16> to vector<32x32xbf16>
    %cst_42 = arith.constant dense<0.000000e+00> : vector<256x32xf32>
    %48 = tpu.matmul %45, %47, %cst_42 {dimension_numbers = #tpu.dot_dimension_numbers<[1], [0], [0], [1], [0, 0, 1, 1], [], []>} : vector<256x32xbf16>, vector<32x32xbf16>, vector<256x32xf32> -> vector<256x32xf32>
    %49 = arith.addf %43, %48 : vector<256x32xf32>
    %c1_43 = arith.constant 1 : index
    %c0_44 = arith.constant 0 : index
    %c0_45 = arith.constant 0 : index
    %50 = vector.load %arg10[%c1_43, %c0_44, %c0_45] : memref<18x18x32xbf16, #tpu.memory_space<vmem>>, vector<16x16x32xbf16>
    %51 = vector.shape_cast %50 : vector<16x16x32xbf16> to vector<256x32xbf16>
    %c3 = arith.constant 3 : index
    %c0_46 = arith.constant 0 : index
    %c0_47 = arith.constant 0 : index
    %52 = vector.load %arg5[%c3, %c0_46, %c0_47] : memref<9x32x32xbf16, #tpu.memory_space<vmem>>, vector<1x32x32xbf16>
    %53 = vector.shape_cast %52 : vector<1x32x32xbf16> to vector<32x32xbf16>
    %cst_48 = arith.constant dense<0.000000e+00> : vector<256x32xf32>
    %54 = tpu.matmul %51, %53, %cst_48 {dimension_numbers = #tpu.dot_dimension_numbers<[1], [0], [0], [1], [0, 0, 1, 1], [], []>} : vector<256x32xbf16>, vector<32x32xbf16>, vector<256x32xf32> -> vector<256x32xf32>
    %55 = arith.addf %49, %54 : vector<256x32xf32>
    %c1_49 = arith.constant 1 : index
    %c1_50 = arith.constant 1 : index
    %c0_51 = arith.constant 0 : index
    %56 = vector.load %arg10[%c1_49, %c1_50, %c0_51] : memref<18x18x32xbf16, #tpu.memory_space<vmem>>, vector<16x16x32xbf16>
    %57 = vector.shape_cast %56 : vector<16x16x32xbf16> to vector<256x32xbf16>
    %c4 = arith.constant 4 : index
    %c0_52 = arith.constant 0 : index
    %c0_53 = arith.constant 0 : index
    %58 = vector.load %arg5[%c4, %c0_52, %c0_53] : memref<9x32x32xbf16, #tpu.memory_space<vmem>>, vector<1x32x32xbf16>
    %59 = vector.shape_cast %58 : vector<1x32x32xbf16> to vector<32x32xbf16>
    %cst_54 = arith.constant dense<0.000000e+00> : vector<256x32xf32>
    %60 = tpu.matmul %57, %59, %cst_54 {dimension_numbers = #tpu.dot_dimension_numbers<[1], [0], [0], [1], [0, 0, 1, 1], [], []>} : vector<256x32xbf16>, vector<32x32xbf16>, vector<256x32xf32> -> vector<256x32xf32>
    %61 = arith.addf %55, %60 : vector<256x32xf32>
    %c1_55 = arith.constant 1 : index
    %c2_56 = arith.constant 2 : index
    %c0_57 = arith.constant 0 : index
    %62 = vector.load %arg10[%c1_55, %c2_56, %c0_57] : memref<18x18x32xbf16, #tpu.memory_space<vmem>>, vector<16x16x32xbf16>
    %63 = vector.shape_cast %62 : vector<16x16x32xbf16> to vector<256x32xbf16>
    %c5 = arith.constant 5 : index
    %c0_58 = arith.constant 0 : index
    %c0_59 = arith.constant 0 : index
    %64 = vector.load %arg5[%c5, %c0_58, %c0_59] : memref<9x32x32xbf16, #tpu.memory_space<vmem>>, vector<1x32x32xbf16>
    %65 = vector.shape_cast %64 : vector<1x32x32xbf16> to vector<32x32xbf16>
    %cst_60 = arith.constant dense<0.000000e+00> : vector<256x32xf32>
    %66 = tpu.matmul %63, %65, %cst_60 {dimension_numbers = #tpu.dot_dimension_numbers<[1], [0], [0], [1], [0, 0, 1, 1], [], []>} : vector<256x32xbf16>, vector<32x32xbf16>, vector<256x32xf32> -> vector<256x32xf32>
    %67 = arith.addf %61, %66 : vector<256x32xf32>
    %c2_61 = arith.constant 2 : index
    %c0_62 = arith.constant 0 : index
    %c0_63 = arith.constant 0 : index
    %68 = vector.load %arg10[%c2_61, %c0_62, %c0_63] : memref<18x18x32xbf16, #tpu.memory_space<vmem>>, vector<16x16x32xbf16>
    %69 = vector.shape_cast %68 : vector<16x16x32xbf16> to vector<256x32xbf16>
    %c6 = arith.constant 6 : index
    %c0_64 = arith.constant 0 : index
    %c0_65 = arith.constant 0 : index
    %70 = vector.load %arg5[%c6, %c0_64, %c0_65] : memref<9x32x32xbf16, #tpu.memory_space<vmem>>, vector<1x32x32xbf16>
    %71 = vector.shape_cast %70 : vector<1x32x32xbf16> to vector<32x32xbf16>
    %cst_66 = arith.constant dense<0.000000e+00> : vector<256x32xf32>
    %72 = tpu.matmul %69, %71, %cst_66 {dimension_numbers = #tpu.dot_dimension_numbers<[1], [0], [0], [1], [0, 0, 1, 1], [], []>} : vector<256x32xbf16>, vector<32x32xbf16>, vector<256x32xf32> -> vector<256x32xf32>
    %73 = arith.addf %67, %72 : vector<256x32xf32>
    %c2_67 = arith.constant 2 : index
    %c1_68 = arith.constant 1 : index
    %c0_69 = arith.constant 0 : index
    %74 = vector.load %arg10[%c2_67, %c1_68, %c0_69] : memref<18x18x32xbf16, #tpu.memory_space<vmem>>, vector<16x16x32xbf16>
    %75 = vector.shape_cast %74 : vector<16x16x32xbf16> to vector<256x32xbf16>
    %c7 = arith.constant 7 : index
    %c0_70 = arith.constant 0 : index
    %c0_71 = arith.constant 0 : index
    %76 = vector.load %arg5[%c7, %c0_70, %c0_71] : memref<9x32x32xbf16, #tpu.memory_space<vmem>>, vector<1x32x32xbf16>
    %77 = vector.shape_cast %76 : vector<1x32x32xbf16> to vector<32x32xbf16>
    %cst_72 = arith.constant dense<0.000000e+00> : vector<256x32xf32>
    %78 = tpu.matmul %75, %77, %cst_72 {dimension_numbers = #tpu.dot_dimension_numbers<[1], [0], [0], [1], [0, 0, 1, 1], [], []>} : vector<256x32xbf16>, vector<32x32xbf16>, vector<256x32xf32> -> vector<256x32xf32>
    %79 = arith.addf %73, %78 : vector<256x32xf32>
    %c2_73 = arith.constant 2 : index
    %c2_74 = arith.constant 2 : index
    %c0_75 = arith.constant 0 : index
    %80 = vector.load %arg10[%c2_73, %c2_74, %c0_75] : memref<18x18x32xbf16, #tpu.memory_space<vmem>>, vector<16x16x32xbf16>
    %81 = vector.shape_cast %80 : vector<16x16x32xbf16> to vector<256x32xbf16>
    %c8 = arith.constant 8 : index
    %c0_76 = arith.constant 0 : index
    %c0_77 = arith.constant 0 : index
    %82 = vector.load %arg5[%c8, %c0_76, %c0_77] : memref<9x32x32xbf16, #tpu.memory_space<vmem>>, vector<1x32x32xbf16>
    %83 = vector.shape_cast %82 : vector<1x32x32xbf16> to vector<32x32xbf16>
    %cst_78 = arith.constant dense<0.000000e+00> : vector<256x32xf32>
    %84 = tpu.matmul %81, %83, %cst_78 {dimension_numbers = #tpu.dot_dimension_numbers<[1], [0], [0], [1], [0, 0, 1, 1], [], []>} : vector<256x32xbf16>, vector<32x32xbf16>, vector<256x32xf32> -> vector<256x32xf32>
    %85 = arith.addf %79, %84 : vector<256x32xf32>
    %c0_79 = arith.constant 0 : index
    %c0_80 = arith.constant 0 : index
    %86 = vector.load %arg6[%c0_79, %c0_80] : memref<1x32xf32, #tpu.memory_space<vmem>>, vector<1x32xf32>
    %87 = vector.broadcast %86 : vector<1x32xf32> to vector<256x32xf32>
    %88 = arith.addf %85, %87 : vector<256x32xf32>
    %cst_81 = arith.constant 0.000000e+00 : f32
    %89 = vector.broadcast %cst_81 : f32 to vector<256x32xf32>
    %90 = arith.maximumf %88, %89 : vector<256x32xf32>
    %91 = arith.truncf %90 : vector<256x32xf32> to vector<256x32xbf16>
    %c0_82 = arith.constant 0 : index
    %c0_83 = arith.constant 0 : index
    %92 = vector.load %arg7[%c0_82, %c0_83] : memref<32x128xbf16, #tpu.memory_space<vmem>>, vector<32x128xbf16>
    %cst_84 = arith.constant dense<0.000000e+00> : vector<256x128xf32>
    %93 = tpu.matmul %91, %92, %cst_84 {dimension_numbers = #tpu.dot_dimension_numbers<[1], [0], [0], [1], [0, 0, 1, 1], [], []>} : vector<256x32xbf16>, vector<32x128xbf16>, vector<256x128xf32> -> vector<256x128xf32>
    %94 = vector.shape_cast %7 : vector<16x16x128xbf16> to vector<256x128xbf16>
    %95 = arith.extf %94 : vector<256x128xbf16> to vector<256x128xf32>
    %c0_85 = arith.constant 0 : index
    %c0_86 = arith.constant 0 : index
    %96 = vector.load %arg8[%c0_85, %c0_86] : memref<1x128xf32, #tpu.memory_space<vmem>>, vector<1x128xf32>
    %97 = vector.broadcast %96 : vector<1x128xf32> to vector<256x128xf32>
    %98 = arith.addf %93, %97 : vector<256x128xf32>
    %99 = arith.addf %98, %95 : vector<256x128xf32>
    %cst_87 = arith.constant 0.000000e+00 : f32
    %100 = vector.broadcast %cst_87 : f32 to vector<256x128xf32>
    %101 = arith.maximumf %99, %100 : vector<256x128xf32>
    %102 = vector.shape_cast %101 : vector<256x128xf32> to vector<16x16x128xf32>
    %103 = arith.truncf %102 : vector<16x16x128xf32> to vector<16x16x128xbf16>
    %c0_88 = arith.constant 0 : index
    %c0_89 = arith.constant 0 : index
    %c0_90 = arith.constant 0 : index
    %c0_91 = arith.constant 0 : index
    %104 = vector.load %arg9[%c0_88, %c0_89, %c0_90, %c0_91] : memref<1x16x16x128xbf16, #tpu.memory_space<vmem>>, vector<1x16x16x128xbf16>
    %105 = vector.shape_cast %104 : vector<1x16x16x128xbf16> to vector<16x16x128xbf16>
    %106 = vector.shape_cast %103 : vector<16x16x128xbf16> to vector<1x16x16x128xbf16>
    tpu.vector_store %arg9[%c0_88, %c0_89, %c0_90, %c0_91], %106 {strides = array<i32>} : memref<1x16x16x128xbf16, #tpu.memory_space<vmem>>, vector<1x16x16x128xbf16>,
    return
  }
  func.func @transform_0(%arg0: i32, %arg1: i32) -> (i32, i32, i32, i32) {
    %c0_i32 = arith.constant 0 : i32
    %c0_i32_0 = arith.constant 0 : i32
    %c0_i32_1 = arith.constant 0 : i32
    %c0_i32_2 = arith.constant 0 : i32
    return %arg0, %c0_i32, %c0_i32_0, %c0_i32_1 : i32, i32, i32, i32
  }
  func.func @transform_1(%arg0: i32, %arg1: i32) -> (i32, i32) {
    %c0_i32 = arith.constant 0 : i32
    %c0_i32_0 = arith.constant 0 : i32
    %c0_i32_1 = arith.constant 0 : i32
    return %c0_i32, %c0_i32_0 : i32, i32
  }
  func.func @transform_2(%arg0: i32, %arg1: i32) -> (i32, i32) {
    %c0_i32 = arith.constant 0 : i32
    %c0_i32_0 = arith.constant 0 : i32
    %c0_i32_1 = arith.constant 0 : i32
    return %c0_i32, %c0_i32_0 : i32, i32
  }
  func.func @transform_3(%arg0: i32, %arg1: i32) -> (i32, i32, i32) {
    %c0_i32 = arith.constant 0 : i32
    %c0_i32_0 = arith.constant 0 : i32
    %c0_i32_1 = arith.constant 0 : i32
    %c0_i32_2 = arith.constant 0 : i32
    return %c0_i32, %c0_i32_0, %c0_i32_1 : i32, i32, i32
  }
  func.func @transform_4(%arg0: i32, %arg1: i32) -> (i32, i32) {
    %c0_i32 = arith.constant 0 : i32
    %c0_i32_0 = arith.constant 0 : i32
    %c0_i32_1 = arith.constant 0 : i32
    return %c0_i32, %c0_i32_0 : i32, i32
  }
  func.func @transform_5(%arg0: i32, %arg1: i32) -> (i32, i32) {
    %c0_i32 = arith.constant 0 : i32
    %c0_i32_0 = arith.constant 0 : i32
    %c0_i32_1 = arith.constant 0 : i32
    return %c0_i32, %c0_i32_0 : i32, i32
  }
  func.func @transform_6(%arg0: i32, %arg1: i32) -> (i32, i32) {
    %c0_i32 = arith.constant 0 : i32
    %c0_i32_0 = arith.constant 0 : i32
    %c0_i32_1 = arith.constant 0 : i32
    return %c0_i32, %c0_i32_0 : i32, i32
  }
  func.func @transform_7(%arg0: i32, %arg1: i32) -> (i32, i32, i32, i32) {
    %c0_i32 = arith.constant 0 : i32
    %c0_i32_0 = arith.constant 0 : i32
    %c0_i32_1 = arith.constant 0 : i32
    return %arg0, %arg1, %c0_i32, %c0_i32_0 : i32, i32, i32, i32
  }
}

</mosaic_0001>

<bundles_post_ra>
// kernel: tpu_custom_call.1
= control target key start
LH: loop header
LB: loop body
LE: loop exit
PB: predicated region body
PF: predicated region fallthrough
CT: control target
= control target key end

     0   :  { %s11088_s0 = inlined_call_operand.hbm [shape: bf16[2,16,16,128], index: 0, kind: input, shape index: {}]   ;;  %s11089_s1 = inlined_call_operand.vmem [shape: bf16[128,32], index: 1, kind: input, shape index: {}]   ;;  %s11090_s2 = inlined_call_operand.vmem [shape: f32[1,32], index: 2, kind: input, shape index: {}]   ;;  %s11091_s3 = inlined_call_operand.hbm [shape: bf16[9,32,32], index: 3, kind: input, shape index: {}]   ;;  %s11092_s4 = inlined_call_operand.vmem [shape: f32[1,32], index: 4, kind: input, shape index: {}]   ;;  %s11093_s5 = inlined_call_operand.vmem [shape: bf16[32,128], index: 5, kind: input, shape index: {}]   ;;  %s11094_s6 = inlined_call_operand.vmem [shape: f32[1,128], index: 6, kind: input, shape index: {}]   ;;  %s11095_s7 = inlined_call_operand.hbm [shape: bf16[2,16,16,128], index: 7, kind: output, shape index: {}]  }
   0x1   :  { %11126 = sst [smem:[#allocation27_spill]] %s11091_s3 }
   0x2   :  { %12 = vsyncpa [#allocation4], 0 }
   0x3   :  { %14 = vsyncpa [#allocation4 + $0x1], 0 }
   0x4   :  { %15 = vsyncpa [#allocation7], 0 }
   0x5   :  { %16 = vsyncpa [#allocation5], 0 }
   0x6   :  { %18 = vsyncpa [#allocation5 + $0x1], 0  ;;  %s9049_s24 = smov 0   ;;  %s9051_s25 = smov 0  }
   0x7   :  { %s9053_s26 = smov 0   ;;  %s9055_s27 = smov 0  }
   0x8   :  { %s9057_s28 = smov 0   ;;  %s9059_s29 = smov 0  }
   0x9 LB: > { %s7073_s30 = sadd.s32 4294967295, %s8999_s29   ;;  %s7074_s8 = sadd.s32 4294967294, %s8999_s29   ;;  %s8999_s29 = sphi %s9059_s29, %s24_s29   ;;  %s8995_s28 = sphi %s9057_s28, %s11231_s28   ;;  %s8991_s27 = sphi %s9055_s27, %s11230_s27   ;;  %s8987_s26 = sphi %s9053_s26, %s11229_s26   ;;  %s8983_s25 = sphi %s9051_s25, %s11228_s25   ;;  %s8979_s24 = sphi %s9049_s24, %s11227_s24  }
   0xa   : > { %p56_p0 = scmp.ne.s32.totalorder %s8983_s25, %s8979_s24  ;;  %p9083_p1 = scmp.eq.s32.totalorder %s7073_s30, 0 }
   0xb   : > { %p9087_p2 = scmp.eq.s32.totalorder %s7073_s30, 1  ;;  %p214_p3 = scmp.eq.s32.totalorder %s7074_s8, 1 }
   0xc   : > { %s11127_s9 = scalar_select %p9083_p1, 1, 0 }
   0xd   : > { %s11128_s10 = scalar_select %p9087_p2, 1, 0 }
   0xe   : > { %p9093_p4 = por %p9083_p1, %p56_p0  ;;  %p7075_p5 = scmp.ge.s32.totalorder %s8999_s29, 1 }
   0xf   : > { %p9098_p6 = por %p214_p3, %p56_p0  ;;  %p221_p7 = scmp.lt.s32.totalorder %s8999_s29, 3 }
  0x10   : > { %s11129_s11 = scalar_select %p9093_p4, 1, 0 }
  0x11   : > { %s11130_s12 = scalar_select %p9098_p6, 1, 0 }
  0x12   : > { %p9103_p8 = pnand %p7075_p5, %p221_p7  ;;  %s9001_s14 = smov [#allocation6]  }
  0x13   : > { %s239_s15 = sshll.u32 %s9001_s14, 4  ;;  %s36_s17 = sadd.s32 1, %s8995_s28  ;;  %s240_s15 = int_to_ptr.vmem [resolvable:$true] %s239_s15 }
  0x14   : > { %s11131_s13 = scalar_select %p9103_p8, 1, 0 }
  0x15   : > { %p8626_p9 = pneg %p9103_p8  ;;  %s11133_s3 = sld [smem:[#allocation27_spill]] }
  0x17   : > { %p9112_p11 = pnand %p8626_p9, %p9083_p1 }
  0x19   : > { %p8857_p13 = pneg %p9112_p11 }
  0x1b   : > { %s8855_s20 = scalar_lea.hbm %s11133_s3, 2304 }
  0x1c   : > { %p8856_p12 = scmp.ne.s32.totalorder %s11133_s3, %s8855_s20  ;;  %p8862_p5 = scmp.lt.u32.totalorder %s8855_s20, %s11133_s3 }
  0x1e   : > { %p8858_p0 = pnand %p8857_p13, %p8856_p12 }
  0x20   : > { %p8859_p3 = pneg %p8858_p0 }
  0x22   : > { %p8864_p7 = pnand %p8862_p5, %p8859_p3 }
  0x24   : > { %8867 = shalt.err (!%p8864_p7)
}
  0x25   : > { %s8868_s8 = scalar_lea.vmem %s240_s15, 2304  ;;  %p8876_p1 = scmp.lt.s32.totalorder %s240_s15, %s240_s15 }
  0x26   : > { %p8869_p9 = scmp.ne.s32.totalorder %s240_s15, %s8868_s8  ;;  %p8877_p4 = scmp.lt.s32.totalorder %s8868_s8, %s8868_s8 }
  0x28   : > { %p8871_p10 = pnand %p8869_p9, %p8857_p13  ;;  %p8878_p8 = por %p8877_p4, %p8876_p1 }
  0x2a   : > { %p8872_p6 = pneg %p8871_p10 }
  0x2c   : > { %p8879_p2 = pnand %p8878_p8, %p8872_p6 }
  0x2e   : > { %8882 = shalt.err (!%p8879_p2)
}
  0x2f   : > { %s11100_s14 = smov 64   ;;  %s11101_s18 = smov 4  }
  0x30   : > { %8629 = dma.hbm_to_vmem [thread:$0]  (!%p9112_p11), %s11133_s3, 2304, %s240_s15, [#allocation7], %s11100_s14, %s11100_s14, %s11101_s18  }
  0x31   : > { %p38_p1 = scmp.ge.s32.totalorder %s36_s17, 2  ;;  %s43_s21 = sadd.s32 1, %s8987_s26 }
  0x32   : > { %p50_p2 = scmp.ne.s32.totalorder %s8987_s26, %s8983_s25  ;;  %p51_p4 = scmp.eq.s32.totalorder %s8999_s29, 0 }
  0x33   : > { %s11233_s17 = smov (%p38_p1, %s36_s17), 0  ;;  %p11135_p8 = scmp.ne.s32.totalorder %s11128_s10, 0 }
  0x34   : > { %p9142_p6 = por %p51_p4, %p50_p2  ;;  %s40_s23 = ssub.s32 %s8995_s28, %s11233_s17 }
  0x35   : > { %p9148_p10 = por %p11135_p8, %p50_p2  ;;  %p8639_p12 = scmp.lt.s32.totalorder %s8999_s29, 2 }
  0x36   : > { %p41_p11 = scmp.eq.s32.totalorder %s40_s23, 0  ;;  %s262_s15 = sand.u32 1, %s8987_s26  }
  0x37   : > { %s7078_s30 = sshll.u32 %s262_s15, 7  ;;  %s7581_s19 = sshll.u32 %s8995_s28, 11 }
  0x38   : > { %s9157_s8 = scalar_select %p41_p11, %s8987_s26, %s43_s21  }
  0x39   : > { %s9163_s18 = scalar_lea.hbm %s11088_s0, %s7581_s19  ;;  %s266_s10 = scalar_lea.vmem [#allocation3], %s7078_s30 }
  0x3a   : > { %s273_s3 = sshll.u32 %s266_s10, 4  ;;  %p9169_p13 = pnand %p8639_p12, %p9142_p6  ;;  %s9165_s3 = int_to_ptr.vmem [resolvable:$true] %s273_s3 }
  0x3b   : > { %s9173_s21 = scalar_lea.sflag [#allocation4], %s262_s15  ;;  %s8883_s14 = scalar_lea.hbm %s9163_s18, 2048 }
  0x3c   : > { %p8884_p0 = scmp.ne.s32.totalorder %s9163_s18, %s8883_s14  ;;  %p8885_p3 = pneg %p9169_p13 }
  0x3d   : > { %s8888_s22 = scalar_lea.hbm %s11088_s0, 4096  ;;  %p8889_p9 = scmp.lt.u32.totalorder %s9163_s18, %s11088_s0 }
  0x3e   : > { %p8886_p5 = pnand %p8885_p3, %p8884_p0  ;;  %p8890_p1 = scmp.lt.u32.totalorder %s8888_s22, %s8883_s14 }
  0x3f   : > { %p8892_p4 = scmp.lt.u32.totalorder %s8883_s14, %s9163_s18 }
  0x40   : > { %p8887_p7 = pneg %p8886_p5  ;;  %p8891_p2 = por %p8890_p1, %p8889_p9 }
  0x42   : > { %p8893_p6 = por %p8892_p4, %p8891_p2 }
  0x44   : > { %p8894_p8 = pnand %p8893_p6, %p8887_p7 }
  0x46   : > { %8897 = shalt.err (!%p8894_p8)
}
  0x47   : > { %s8898_s15 = scalar_lea.vmem %s9165_s3, 2048  ;;  %s9004_s30 = smov [#allocation3]  }
  0x48   : > { %p8899_p12 = scmp.ne.s32.totalorder %s9165_s3, %s8898_s15  ;;  %s8903_s19 = sshll.u32 %s9004_s30, 4  ;;  %s8904_s19 = int_to_ptr.vmem [resolvable:$false] %s8903_s19 }
  0x49   : > { %s8905_s20 = scalar_lea.vmem %s8904_s19, 4096  ;;  %p8906_p5 = scmp.lt.s32.totalorder %s9165_s3, %s8904_s19 }
  0x4a   : > { %p8901_p11 = pnand %p8899_p12, %p8885_p3  ;;  %p8907_p9 = scmp.lt.s32.totalorder %s8905_s20, %s8898_s15 }
  0x4c   : > { %p8902_p0 = pneg %p8901_p11  ;;  %p8908_p1 = por %p8907_p9, %p8906_p5 }
  0x4e   : > { %p8909_p2 = pnand %p8908_p1, %p8902_p0 }
  0x50   : > { %8912 = shalt.err (!%p8909_p2)
}
  0x51   : > { %s11138_s14 = smov 4   ;;  %s11139_s22 = smov 64  }
  0x52   : > { %8633 = dma.hbm_to_vmem [thread:$0]  (!%p9169_p13), %s9163_s18, 2048, %s9165_s3, %s9173_s21, %s11139_s22, %s11139_s22, %s11138_s14  }
  0x53   : > { %p11140_p3 = scmp.ne.s32.totalorder %s11131_s13, 0 }
  0x55   : > { %285 = sbr.rel (%p11140_p3) target bundleno = 1285 (0x505), region = 48 }
  0x5c   : > { %s9207_s10 = sand.u32 1, %s8983_s25   ;;  %p11141_p7 = scmp.ne.s32.totalorder %s11129_s11, 0 }
  0x5d   : > { %s7082_s15 = sshll.u32 %s9207_s10, 7  ;;  %s288_s30 = scalar_lea.sflag [#allocation4], %s9207_s10 }
  0x5e   : > { %s9213_s23 = scalar_lea.vmem [#allocation3], %s7082_s15 }
  0x5f   : > { %8966 = dma.done.wait (%p11141_p7), %s288_s30, 2048  }
  0x60   : > { %8968 = vsyncadd (%p11141_p7), %s288_s30, 4294965248  ;;  %p11142_p13 = scmp.ne.s32.totalorder %s11127_s9, 0 }
  0x62   : > { %8970 = dma.done.wait (%p11142_p13), [#allocation7], 2304  }
  0x63   : > { %8972 = vsyncadd (%p11142_p13), [#allocation7], 4294964992  ;;  %v8696_v0 = vld [vmem:[%s11089_s1] sm:$0xff]   ;;  %v8697_v1 = vld [vmem:[%s11089_s1 + $0x8] sm:$0xff]   ;;  %vm329_vm0 = vcmask 253952   ;;  %v11143_v5 = vmov 0 }
  0x64   : > { %7950 = vmatprep.subr.bf16.mxu0 %v8696_v0  ;;  %v8698_v2 = vld [vmem:[%s11089_s1 + $0x10] sm:$0xff]   ;;  %v8699_v3 = vld [vmem:[%s11089_s1 + $0x18] sm:$0xff]   ;;  %vm330_vm1 = vsmask.f32 256  ;;  %v8700_v6 = vld [vmem:[%s11089_s1 + $0x20] sm:$0xff]   ;;  %v11146_v29 = vmov 0 }
  0x65   : > { %7951 = vmatpush3.bf16.msra.mxu0 %v8696_v0  ;;  %v445_v4 = vld [vmem:[%s9213_s23] sm:$0xff]   ;;  %vm9238_vm2 = vmand %vm329_vm0, %vm330_vm1  ;;  %v8701_v8 = vld [vmem:[%s11089_s1 + $0x28] sm:$0xff]   ;;  %vm386_vm3 = vsmask.f32 7938  ;;  %vm1256_vm5 = vcmask 257024   ;;  %v11102_v49 = vmov 0  }
  0x66   : > { %7952 = vmatprep.subr.bf16.mxu0 %v8697_v1  ;;  %7966 = vmatprep.mubr.bf16.mxu0 %v445_v4  ;;  %v11144_v5 = vsel %vm9238_vm2, 4294967295, %v11143_v5  ;;  %v338_v7 = vld [vmem:[#allocation2 + $0x18] sm:$0x1]  ;;  %v8702_v10 = vld [vmem:[%s11089_s1 + $0x30] sm:$0xff]   ;;  %v447_v12 = vld [vmem:[%s9213_s23 + $0x8] sm:$0xff]   ;;  %vm2218_vm9 = vcmask 261120  }
  0x67   : > { %11145 = vst [vmem:[#allocation12_spill] sm:$0xff] %v11144_v5  ;;  %v339_v9 = vsel %vm9238_vm2, 0, %v338_v7  ;;  %v8703_v11 = vld [vmem:[%s11089_s1 + $0x38] sm:$0xff]   ;;  %v449_v13 = vld [vmem:[%s9213_s23 + $0x10] sm:$0xff]   ;;  %v451_v14 = vld [vmem:[%s9213_s23 + $0x18] sm:$0xff]   ;;  %vm2777_vm13 = vcmask 1042432  }
  0x68   : > { %340 = vst [vmem:[#allocation2 + $0x18] sm:$0x1] %v339_v9  ;;  %v453_v15 = vld [vmem:[%s9213_s23 + $0x20] sm:$0xff]   ;;  %v455_v16 = vld [vmem:[%s9213_s23 + $0x28] sm:$0xff]   ;;  %v457_v17 = vld [vmem:[%s9213_s23 + $0x30] sm:$0xff]   ;;  %vm2778_vm14 = vcmask 1046532  }
  0x69   : > { %7953 = vmatpush3.bf16.msra.mxu0 %v8697_v1  ;;  %v459_v18 = vld [vmem:[%s9213_s23 + $0x38] sm:$0xff]   ;;  %v461_v19 = vld [vmem:[%s9213_s23 + $0x40] sm:$0xff]   ;;  %v463_v20 = vld [vmem:[%s9213_s23 + $0x48] sm:$0xff]   ;;  %1376 = vst.msk [vmem:[#allocation2 + $0x4] sm:$0xf] %vm1256_vm5, %v11102_v49  ;;  %s10976_s9 = scalar_lea.vmem [#allocation8], %s7082_s15 }
  0x6a   : > { %7954 = vmatprep.subr.bf16.mxu0 %v8698_v2  ;;  %v465_v21 = vld [vmem:[%s9213_s23 + $0x50] sm:$0xff]   ;;  %v467_v22 = vld [vmem:[%s9213_s23 + $0x58] sm:$0xff]   ;;  %v469_v23 = vld [vmem:[%s9213_s23 + $0x60] sm:$0xff]   ;;  %1547 = vst.msk [vmem:[#allocation2 + $0xd0] sm:$0xf] %vm1256_vm5, %v11102_v49  ;;  %s7650_s15 = sshll.u32 %s8991_s27, 11 }
  0x6b   : > { %v471_v24 = vld [vmem:[%s9213_s23 + $0x68] sm:$0xff]   ;;  %v473_v25 = vld [vmem:[%s9213_s23 + $0x70] sm:$0xff]   ;;  %v475_v26 = vld [vmem:[%s9213_s23 + $0x78] sm:$0xff]   ;;  %vm1766_vm6 = vsmask.f32 3328  ;;  %s11035_s22 = scalar_lea.hbm %s11095_s7, %s7650_s15  ;;  %s6955_s27 = scalar_lea.sflag [#allocation5], %s9207_s10 }
  0x6c   : > { %v335_v27 = vld [vmem:[#allocation2 + $0xc] sm:$0x1]  ;;  %vm9275_vm4 = vmand %vm329_vm0, %vm386_vm3  ;;  %v394_v30 = vld [vmem:[#allocation2 + $0x20] sm:$0x1]  ;;  %vm1767_vm7 = vsmask.f32 7440 }
  0x6d   : > { %7955 = vmatpush3.bf16.msra.mxu0 %v8698_v2  ;;  %v336_v28 = vsel %vm9238_vm2, 0, %v335_v27  ;;  %v11147_v29 = vsel %vm9275_vm4, 4294967295, %v11146_v29  ;;  %v395_v31 = vsel %vm9275_vm4, 0, %v394_v30  ;;  %v391_v32 = vld [vmem:[#allocation2 + $0x14] sm:$0x1]  ;;  %v8720_v55 = vld [vmem:[#allocation6 + $0x10] sm:$0xff]   ;;  %vm9326_vm8 = vmor %vm1766_vm6, %vm1767_vm7 }
  0x6e   : > { %7956 = vmatprep.subr.bf16.mxu0 %v8699_v3  ;;  %11148 = vst [vmem:[#allocation13_spill] sm:$0xff] %v11147_v29  ;;  %337 = vst [vmem:[#allocation2 + $0xc] sm:$0x1] %v336_v28  ;;  %v392_v33 = vsel %vm9275_vm4, 0, %v391_v32  ;;  %v344_v34 = vld [vmem:[#allocation2 + $0x30] sm:$0x1] }
  0x6f   : > { %396 = vst [vmem:[#allocation2 + $0x20] sm:$0x1] %v395_v31  ;;  %393 = vst [vmem:[#allocation2 + $0x14] sm:$0x1] %v392_v33  ;;  %v345_v35 = vsel %vm9238_vm2, 0, %v344_v34  ;;  %v8723_v33 = vld [vmem:[#allocation6 + $0x38] sm:$0xff]  }
  0x70   : > { %v341_v36 = vld [vmem:[#allocation2 + $0x24] sm:$0x1]  ;;  %346 = vst [vmem:[#allocation2 + $0x30] sm:$0x1] %v345_v35  ;;  %v400_v38 = vld [vmem:[#allocation2 + $0x38] sm:$0x1]  ;;  %vm9376_vm11 = vmand %vm1256_vm5, %vm386_vm3 }
  0x71   : > { %7957 = vmatpush3.bf16.msra.mxu0 %v8699_v3  ;;  %v342_v37 = vsel %vm9238_vm2, 0, %v341_v36  ;;  %v401_v39 = vsel %vm9275_vm4, 0, %v400_v38  ;;  %v397_v40 = vld [vmem:[#allocation2 + $0x2c] sm:$0x1]  ;;  %v332_v42 = vld [vmem:[#allocation2] sm:$0x1]  ;;  %vm10001_vm15 = vmor %vm2777_vm13, %vm2778_vm14 }
  0x72   : > { %7958 = vmatprep.subr.bf16.mxu0 %v8700_v6  ;;  %343 = vst [vmem:[#allocation2 + $0x24] sm:$0x1] %v342_v37  ;;  %402 = vst [vmem:[#allocation2 + $0x38] sm:$0x1] %v401_v39  ;;  %v398_v41 = vsel %vm9275_vm4, 0, %v397_v40  ;;  %v333_v44 = vsel %vm9238_vm2, 0, %v332_v42 }
  0x73   : > { %399 = vst [vmem:[#allocation2 + $0x2c] sm:$0x1] %v398_v41  ;;  %v350_v43 = vld [vmem:[#allocation2 + $0x48] sm:$0x1]  ;;  %v347_v46 = vld [vmem:[#allocation2 + $0x3c] sm:$0x1] }
  0x74   : > { %v351_v45 = vsel %vm9238_vm2, 0, %v350_v43  ;;  %334 = vst [vmem:[#allocation2] sm:$0x1] %v333_v44  ;;  %v348_v47 = vsel %vm9238_vm2, 0, %v347_v46  ;;  %v406_v48 = vld [vmem:[#allocation2 + $0x50] sm:$0x1] }
  0x75   : > { %7959 = vmatpush3.bf16.msra.mxu0 %v8700_v6  ;;  %352 = vst [vmem:[#allocation2 + $0x48] sm:$0x1] %v351_v45  ;;  %1375 = vst.msk [vmem:[#allocation2] sm:$0xf] %vm1256_vm5, %v11102_v49  ;;  %v407_v50 = vsel %vm9275_vm4, 0, %v406_v48  ;;  %v8721_v3 = vld [vmem:[#allocation6 + $0x18] sm:$0xff]  }
  0x76   : > { %7960 = vmatprep.subr.bf16.mxu0 %v8701_v8  ;;  %349 = vst [vmem:[#allocation2 + $0x3c] sm:$0x1] %v348_v47  ;;  %v388_v51 = vld [vmem:[#allocation2 + $0x8] sm:$0x1]  ;;  %408 = vst [vmem:[#allocation2 + $0x50] sm:$0x1] %v407_v50 }
  0x77   : > { %v403_v52 = vld [vmem:[#allocation2 + $0x44] sm:$0x1]  ;;  %v389_v53 = vsel %vm9275_vm4, 0, %v388_v51  ;;  %v356_v56 = vld [vmem:[#allocation2 + $0x60] sm:$0x1]  ;;  %v9343_v41 = vld [vmem:[#allocation6 + $0x40] sm:$0xff]  }
  0x78   : > { %v404_v54 = vsel %vm9275_vm4, 0, %v403_v52  ;;  %390 = vst [vmem:[#allocation2 + $0x8] sm:$0x1] %v389_v53  ;;  %v357_v58 = vsel %vm9238_vm2, 0, %v356_v56  ;;  %v353_v59 = vld [vmem:[#allocation2 + $0x54] sm:$0x1] }
  0x79   : > { %7961 = vmatpush3.bf16.msra.mxu0 %v8701_v8  ;;  %405 = vst [vmem:[#allocation2 + $0x44] sm:$0x1] %v404_v54  ;;  %1378 = vst.msk [vmem:[#allocation2 + $0x8] sm:$0x1] %vm329_vm0, %v11102_v49  ;;  %v354_v61 = vsel %vm9238_vm2, 0, %v353_v59  ;;  %s9006_s3 = smov [#allocation8]  }
  0x7a   : > { %7962 = vmatprep.subr.bf16.mxu0 %v8702_v10  ;;  %358 = vst [vmem:[#allocation2 + $0x60] sm:$0x1] %v357_v58  ;;  %v412_v62 = vld [vmem:[#allocation2 + $0x68] sm:$0x1]  ;;  %v1715_v63 = vld [vmem:[#allocation2 + $0x4] sm:$0xf] }
  0x7b   : > { %355 = vst [vmem:[#allocation2 + $0x54] sm:$0x1] %v354_v61  ;;  %v413_v1 = vsel %vm9275_vm4, 0, %v412_v62  ;;  %v409_v2 = vld [vmem:[#allocation2 + $0x5c] sm:$0x1]  ;;  %v1779_v9 = vshll.u32 %v1715_v63, 16 }
  0x7c   : > { %v1714_v57 = vld [vmem:[#allocation2] sm:$0xf]  ;;  %414 = vst [vmem:[#allocation2 + $0x68] sm:$0x1] %v413_v1  ;;  %v410_v4 = vsel %vm9275_vm4, 0, %v409_v2  ;;  %s8917_s13 = sshll.u32 %s9006_s3, 4  ;;  %s8918_s13 = int_to_ptr.vmem [resolvable:$false] %s8917_s13 }
  0x7d   : > { %7963 = vmatpush3.bf16.msra.mxu0 %v8702_v10  ;;  %v1770_v60 = vshrl.u32 %v1714_v57, 16  ;;  %v1773_v0 = vshll.u32 %v1714_v57, 16  ;;  %411 = vst [vmem:[#allocation2 + $0x5c] sm:$0x1] %v410_v4  ;;  %v1783_v10 = vshrl.u32 %v1715_v63, 16  ;;  %s8919_s18 = scalar_lea.vmem %s8918_s13, 4096 }
  0x7e   : > { %7964 = vmatprep.subr.bf16.mxu0 %v8703_v11  ;;  %v415_v30 = vld [vmem:[#allocation2 + $0x74] sm:$0x1]  ;;  %v368_v34 = vld [vmem:[#allocation2 + $0x90] sm:$0x1]  ;;  %v365_v36 = vld [vmem:[#allocation2 + $0x84] sm:$0x1] }
  0x7f   : > { %v1772_v7 = vrot.slane %v1770_v60, 4  ;;  %v1775_v8 = vrot.slane %v1773_v0, 5  ;;  %v416_v32 = vsel %vm9275_vm4, 0, %v415_v30  ;;  %v369_v35 = vsel %vm9238_vm2, 0, %v368_v34  ;;  %v424_v37 = vld [vmem:[#allocation2 + $0x98] sm:$0x1] }
  0x80   : > { %v1750_v6 = vld [vmem:[#allocation2 + $0x8] sm:$0x1]  ;;  %417 = vst [vmem:[#allocation2 + $0x74] sm:$0x1] %v416_v32  ;;  %370 = vst [vmem:[#allocation2 + $0x90] sm:$0x1] %v369_v35 }
  0x81   : > { %7965 = vmatpush3.bf16.msra.mxu0 %v8703_v11  ;;  %v1789_v11 = vshll.u32 %v1750_v6, 16  ;;  %v366_v38 = vsel %vm9238_vm2, 0, %v365_v36  ;;  %v425_v39 = vsel %vm9275_vm4, 0, %v424_v37  ;;  %v421_v40 = vld [vmem:[#allocation2 + $0x8c] sm:$0x1] }
  0x82   : > { %7998 = vmatprep.subr.bf16.mxu0 %v8720_v55  ;;  %367 = vst [vmem:[#allocation2 + $0x84] sm:$0x1] %v366_v38  ;;  %426 = vst [vmem:[#allocation2 + $0x98] sm:$0x1] %v425_v39  ;;  %v422_v42 = vsel %vm9275_vm4, 0, %v421_v40 }
  0x83   : > { %423 = vst [vmem:[#allocation2 + $0x8c] sm:$0x1] %v422_v42  ;;  %v374_v43 = vld [vmem:[#allocation2 + $0xa8] sm:$0x1]  ;;  %v371_v45 = vld [vmem:[#allocation2 + $0x9c] sm:$0x1] }
  0x84   : > { %7967 = vmatmul.mubr.bf16.vlgmr.msra.gmra.mrb[0].mxu0 %v447_v12  ;;  %v1776_v12 = vor.u32 %v1775_v8, %v1772_v7  ;;  %v375_v44 = vsel %vm9238_vm2, 0, %v374_v43  ;;  %v430_v46 = vld [vmem:[#allocation2 + $0xb0] sm:$0x1]  ;;  %v372_v47 = vsel %vm9238_vm2, 0, %v371_v45  ;;  %v427_v50 = vld [vmem:[#allocation2 + $0xa4] sm:$0x1] }
  0x85   : > { %7970 = vmatprep.mubr.bf16.mxu0 %v449_v13  ;;  %7999 = vmatpush3.bf16.msra.mxu0 %v8720_v55  ;;  %v1781_v13 = vrot.slane %v1779_v9, 5  ;;  %376 = vst [vmem:[#allocation2 + $0xa8] sm:$0x1] %v375_v44  ;;  %v431_v48 = vsel %vm9275_vm4, 0, %v430_v46  ;;  %373 = vst [vmem:[#allocation2 + $0x9c] sm:$0x1] %v372_v47 }
  0x86   : > { %8000 = vmatprep.subr.bf16.mxu0 %v8721_v3  ;;  %432 = vst [vmem:[#allocation2 + $0xb0] sm:$0x1] %v431_v48  ;;  %v428_v51 = vsel %vm9275_vm4, 0, %v427_v50  ;;  %v380_v52 = vld [vmem:[#allocation2 + $0xc0] sm:$0x1] }
  0x87   : > { %429 = vst [vmem:[#allocation2 + $0xa4] sm:$0x1] %v428_v51  ;;  %v381_v53 = vsel %vm9238_vm2, 0, %v380_v52  ;;  %v377_v54 = vld [vmem:[#allocation2 + $0xb4] sm:$0x1] }
  0x88   : > { %382 = vst [vmem:[#allocation2 + $0xc0] sm:$0x1] %v381_v53  ;;  %v378_v55 = vsel %vm9238_vm2, 0, %v377_v54  ;;  %v436_v56 = vld [vmem:[#allocation2 + $0xc8] sm:$0x1] }
  0x89   : > { %8001 = vmatpush3.bf16.msra.mxu0 %v8721_v3  ;;  %379 = vst [vmem:[#allocation2 + $0xb4] sm:$0x1] %v378_v55  ;;  %v437_v57 = vsel %vm9275_vm4, 0, %v436_v56  ;;  %v433_v58 = vld [vmem:[#allocation2 + $0xbc] sm:$0x1] }
  0x8a   : > { %438 = vst [vmem:[#allocation2 + $0xc8] sm:$0x1] %v437_v57  ;;  %v434_v59 = vsel %vm9275_vm4, 0, %v433_v58  ;;  %v9367_v60 = vld [vmem:[%s11090_s2] ss:$0 sm:$0xff] }
  0x8b   : > { %435 = vst [vmem:[#allocation2 + $0xbc] sm:$0x1] %v434_v59  ;;  %vm933_vm10 = vsmask.f32 4368  ;;  %v1258_v35 = vld [vmem:[#allocation2 + $0xc] sm:$0xf] }
  0x8c   : > { %7971 = vmatmul.mubr.bf16.gmra.mrb[4].mxu0 %v451_v14  ;;  %v362_v14 = vld [vmem:[#allocation2 + $0x78] sm:$0x1]  ;;  %vm9383_vm12 = vmor %vm330_vm1, %vm933_vm10  ;;  %v1270_v43 = vld [vmem:[#allocation2 + $0x20] sm:$0x1] }
  0x8d   : > { %7974 = vmatprep.mubr.bf16.mxu0 %v453_v15  ;;  %v1785_v15 = vrot.slane %v1783_v10, 4  ;;  %v1263_v50 = vld [vmem:[#allocation2 + $0x14] sm:$0x1] }
  0x94   : > { %7975 = vmatmul.mubr.bf16.gmra.mrb[8].mxu0 %v455_v16  ;;  %v363_v16 = vsel %vm9238_vm2, 0, %v362_v14 }
  0x95   : > { %7978 = vmatprep.mubr.bf16.mxu0 %v457_v17  ;;  %v359_v17 = vld [vmem:[#allocation2 + $0x6c] sm:$0x1]  ;;  %364 = vst [vmem:[#allocation2 + $0x78] sm:$0x1] %v363_v16 }
  0x9c   : > { %7979 = vmatmul.mubr.bf16.gmra.mrb[12].mxu0 %v459_v18  ;;  %v1777_v18 = vrot.slane %v1776_v12, 4 }
  0x9d   : > { %7982 = vmatprep.mubr.bf16.mxu0 %v461_v19  ;;  %v360_v19 = vsel %vm9238_vm2, 0, %v359_v17 }
  0x9e   : > { %361 = vst [vmem:[#allocation2 + $0x6c] sm:$0x1] %v360_v19 }
  0xa4   : > { %7983 = vmatmul.mubr.bf16.gmra.mrb[16].mxu0 %v463_v20  ;;  %v418_v20 = vld [vmem:[#allocation2 + $0x80] sm:$0x1] }
  0xa5   : > { %7986 = vmatprep.mubr.bf16.mxu0 %v465_v21  ;;  %v1786_v21 = vor.u32 %v1785_v15, %v1781_v13 }
  0xa7   : > { %v1787_v27 = vrot.slane %v1786_v21, 4 }
  0xac   : > { %7987 = vmatmul.mubr.bf16.gmra.mrb[20].mxu0 %v467_v22  ;;  %v1791_v22 = vrot.slane %v1789_v11, 5 }
  0xad   : > { %7990 = vmatprep.mubr.bf16.mxu0 %v469_v23  ;;  %v8722_v23 = vld [vmem:[#allocation6 + $0x30] sm:$0xff]  }
  0xae   : > { %8358 = vmatprep.subr.bf16.mxu1 %v8722_v23  ;;  %v1792_v28 = vsel %vm9326_vm8, %v1787_v27, %v1791_v22 }
  0xaf   : > { %8360 = vmatpush3.bf16.msra.mxu1 %v8722_v23 }
  0xb0   : > { %8359 = vmatprep.subr.bf16.mxu1 %v8723_v33 }
  0xb3   : > { %8361 = vmatpush3.bf16.msra.mxu1 %v8723_v33 }
  0xb4   : > { %7991 = vmatmul.mubr.bf16.gmra.mrb[24].mxu0 %v471_v24  ;;  %v419_v24 = vsel %vm9275_vm4, 0, %v418_v20  ;;  %8142 = vmatprep.subr.bf16.mxu1 %v9343_v41 }
  0xb5   : > { %7994 = vmatprep.mubr.bf16.mxu0 %v473_v25  ;;  %420 = vst [vmem:[#allocation2 + $0x80] sm:$0x1] %v419_v24 }
  0xbc   : > { %7995 = vmatmul.mubr.bf16.gmra.mrb[28].mxu0 %v475_v26  ;;  %v1782_v26 = vsel %vm9326_vm8, %v1777_v18, %v1781_v13 }
  0xbd   : > { %v7170_v31 = vcombine.low %v1782_v26, %v1792_v28  ;;  %v1266_v26 = vld [vmem:[#allocation2 + $0x18] sm:$0xf] }
  0xbf   : > { %8002 = vmatprep.mubr.msk.bf16.mxu0 %vm2218_vm9, %v7170_v31 }
 0x157   : > { %v7968_v61 = vpop.f32.mrb[0].mxu0 }
 0x158   : > { %v687_v62 = vadd.f32 %v7968_v61, %v9367_v60  ;;  %v678_v63 = vpop.f32.mrb[1].mxu0 }
 0x159   : > { %v679_v0 = vadd.f32 %v9367_v60, %v678_v63  ;;  %v7969_v1 = vpop.f32.mrb[2].mxu0 }
 0x15a   : > { %v807_v2 = vmax.f32 %v687_v62, 0.0  ;;  %v690_v3 = vadd.f32 %v7969_v1, %v9367_v60  ;;  %v681_v4 = vpop.f32.mrb[3].mxu0 }
 0x15b   : > { %v805_v6 = vmax.f32 %v679_v0, 0.0  ;;  %v682_v7 = vadd.f32 %v9367_v60, %v681_v4 }
 0x15c   : > { %v7584_v8 = vpack.c.bf16 %v807_v2, %v807_v2  ;;  %v808_v9 = vmax.f32 %v690_v3, 0.0 }
 0x15d   : > { %v7582_v10 = vpack.c.bf16 %v805_v6, %v805_v6  ;;  %v806_v11 = vmax.f32 %v682_v7, 0.0  ;;  %v1280_v7 = vld [vmem:[#allocation2 + $0x30] sm:$0xf] }
 0x15e   : > { %v953_v12 = vshrl.u32 %v7584_v8, 16  ;;  %v7585_v13 = vpack.c.bf16 %v808_v9, %v808_v9  ;;  %v956_v14 = vshll.u32 %v7584_v8, 16 }
 0x15f   : > { %v936_v15 = vshrl.u32 %v7582_v10, 16  ;;  %v939_v16 = vshll.u32 %v7582_v10, 16  ;;  %v7583_v17 = vpack.c.bf16 %v806_v11, %v806_v11  ;;  %v7972_v18 = vpop.f32.mrb[4].mxu0 }
 0x160   : > { %v955_v19 = vrot.slane %v953_v12, 7  ;;  %v961_v20 = vshrl.u32 %v7585_v13, 16  ;;  %v964_v21 = vshll.u32 %v7585_v13, 16  ;;  %v703_v22 = vadd.f32 %v7972_v18, %v9367_v60  ;;  %v694_v23 = vpop.f32.mrb[5].mxu0 }
 0x161   : > { %v938_v27 = vrot.slane %v936_v15, 7  ;;  %v944_v28 = vshrl.u32 %v7583_v17, 16  ;;  %v947_v30 = vshll.u32 %v7583_v17, 16  ;;  %v695_v31 = vadd.f32 %v9367_v60, %v694_v23  ;;  %v7973_v32 = vpop.f32.mrb[6].mxu0 }
 0x162   : > { %v958_v33 = vor.u32 %v956_v14, %v955_v19  ;;  %v959_v34 = vrot.slane %v955_v19, 4  ;;  %v963_v36 = vrot.slane %v961_v20, 7  ;;  %v811_v37 = vmax.f32 %v703_v22, 0.0  ;;  %v697_v38 = vpop.f32.mrb[7].mxu0  ;;  %v1273_v14 = vld [vmem:[#allocation2 + $0x24] sm:$0xf] }
 0x163   : > { %v941_v39 = vor.u32 %v939_v16, %v938_v27  ;;  %v942_v40 = vrot.slane %v938_v27, 4  ;;  %v946_v44 = vrot.slane %v944_v28, 7  ;;  %v809_v45 = vmax.f32 %v695_v31, 0.0 }
 0x164   : > { %v1267_v46 = vsel %vm9376_vm11, %v958_v33, %v1266_v26  ;;  %v966_v47 = vor.u32 %v964_v21, %v963_v36  ;;  %v968_v48 = vrot.slane %v963_v36, 4  ;;  %v7588_v51 = vpack.c.bf16 %v811_v37, %v811_v37  ;;  %v1284_v37 = vld [vmem:[#allocation2 + $0x38] sm:$0x1] }
 0x165   : > { %1268 = vst [vmem:[#allocation2 + $0x18] sm:$0xf] %v1267_v46  ;;  %v1259_v52 = vsel %vm9376_vm11, %v941_v39, %v1258_v35  ;;  %v949_v53 = vor.u32 %v947_v30, %v946_v44  ;;  %v951_v54 = vrot.slane %v946_v44, 4  ;;  %v7586_v55 = vpack.c.bf16 %v809_v45, %v809_v45 }
 0x166   : > { %1260 = vst [vmem:[#allocation2 + $0xc] sm:$0xf] %v1259_v52  ;;  %v967_v56 = vsel %vm9383_vm12, %v959_v34, %v966_v47  ;;  %v1271_v57 = vsel %vm9238_vm2, %v968_v48, %v1270_v43  ;;  %v987_v58 = vshrl.u32 %v7588_v51, 16  ;;  %v990_v62 = vshll.u32 %v7588_v51, 16 }
 0x167   : > { %1269 = vst.msk [vmem:[#allocation2 + $0x1c] sm:$0xf] %vm1256_vm5, %v967_v56  ;;  %1272 = vst [vmem:[#allocation2 + $0x20] sm:$0x1] %v1271_v57  ;;  %v950_v59 = vsel %vm9383_vm12, %v942_v40, %v949_v53  ;;  %v1264_v61 = vsel %vm9238_vm2, %v951_v54, %v1263_v50  ;;  %v970_v63 = vshrl.u32 %v7586_v55, 16  ;;  %v7976_v0 = vpop.f32.mrb[8].mxu0  ;;  %v706_v2 = vadd.f32 %v7973_v32, %v9367_v60 }
 0x168   : > { %1262 = vst.msk [vmem:[#allocation2 + $0x10] sm:$0xf] %vm1256_vm5, %v950_v59  ;;  %1265 = vst [vmem:[#allocation2 + $0x14] sm:$0x1] %v1264_v61  ;;  %v9401_v1 = vrot.slane %v987_v58, 7  ;;  %v698_v3 = vadd.f32 %v9367_v60, %v697_v38  ;;  %v719_v4 = vadd.f32 %v7976_v0, %v9367_v60  ;;  %v710_v6 = vpop.f32.mrb[9].mxu0 }
 0x169   : > { %v972_v8 = vrot.slane %v970_v63, 7  ;;  %v973_v9 = vshll.u32 %v7586_v55, 16  ;;  %v711_v10 = vadd.f32 %v9367_v60, %v710_v6  ;;  %v7977_v11 = vpop.f32.mrb[10].mxu0  ;;  %v812_v15 = vmax.f32 %v706_v2, 0.0  ;;  %v1277_v38 = vld [vmem:[#allocation2 + $0x2c] sm:$0x1] }
 0x16a   : > { %v992_v12 = vor.u32 %v990_v62, %v9401_v1  ;;  %v993_v13 = vrot.slane %v9401_v1, 4  ;;  %v810_v16 = vmax.f32 %v698_v3, 0.0  ;;  %v713_v17 = vpop.f32.mrb[11].mxu0  ;;  %v815_v20 = vmax.f32 %v719_v4, 0.0  ;;  %v1294_v53 = vld [vmem:[#allocation2 + $0x48] sm:$0xf] }
 0x16b   : > { %v975_v18 = vor.u32 %v973_v9, %v972_v8  ;;  %v976_v19 = vrot.slane %v972_v8, 4  ;;  %v813_v21 = vmax.f32 %v711_v10, 0.0  ;;  %v7589_v23 = vpack.c.bf16 %v812_v15, %v812_v15  ;;  %v1287_v63 = vld [vmem:[#allocation2 + $0x3c] sm:$0xf] }
 0x16c   : > { %v1281_v22 = vsel %vm9376_vm11, %v992_v12, %v1280_v7  ;;  %v7587_v26 = vpack.c.bf16 %v810_v16, %v810_v16  ;;  %v722_v27 = vadd.f32 %v7977_v11, %v9367_v60  ;;  %v7592_v30 = vpack.c.bf16 %v815_v20, %v815_v20  ;;  %v9433_v10 = vld [vmem:[#allocation6] sm:$0xff]  }
 0x16d   : > { %1282 = vst [vmem:[#allocation2 + $0x30] sm:$0xf] %v1281_v22  ;;  %v1274_v28 = vsel %vm9376_vm11, %v975_v18, %v1273_v14  ;;  %v7590_v31 = vpack.c.bf16 %v813_v21, %v813_v21  ;;  %v714_v32 = vadd.f32 %v9367_v60, %v713_v17  ;;  %v995_v33 = vshrl.u32 %v7589_v23, 16  ;;  %8034 = vmatprep.subr.bf16.mxu0 %v9433_v10 }
 0x16e   : > { %1275 = vst [vmem:[#allocation2 + $0x24] sm:$0xf] %v1274_v28  ;;  %v998_v34 = vshll.u32 %v7589_v23, 16  ;;  %v978_v35 = vshrl.u32 %v7587_v26, 16  ;;  %v981_v36 = vshll.u32 %v7587_v26, 16  ;;  %v1021_v39 = vshrl.u32 %v7592_v30, 16 }
 0x16f   : > { %v1024_v40 = vshll.u32 %v7592_v30, 16  ;;  %v1004_v43 = vshrl.u32 %v7590_v31, 16  ;;  %v1007_v44 = vshll.u32 %v7590_v31, 16  ;;  %v7980_v45 = vpop.f32.mrb[12].mxu0  ;;  %v997_v46 = vrot.slane %v995_v33, 7 }
 0x170   : > { %v980_v47 = vrot.slane %v978_v35, 7  ;;  %v816_v48 = vmax.f32 %v722_v27, 0.0  ;;  %v814_v50 = vmax.f32 %v714_v32, 0.0  ;;  %v726_v51 = vpop.f32.mrb[13].mxu0  ;;  %v9415_v52 = vrot.slane %v1021_v39, 7 }
 0x171   : > { %v9417_v54 = vrot.slane %v1004_v43, 7  ;;  %v735_v55 = vadd.f32 %v7980_v45, %v9367_v60  ;;  %v727_v56 = vadd.f32 %v9367_v60, %v726_v51  ;;  %v7981_v57 = vpop.f32.mrb[14].mxu0  ;;  %v1000_v58 = vor.u32 %v998_v34, %v997_v46  ;;  %v1298_v26 = vld [vmem:[#allocation2 + $0x50] sm:$0x1]  ;;  %v1291_v27 = vld [vmem:[#allocation2 + $0x44] sm:$0x1] }
 0x172   : > { %v1002_v59 = vrot.slane %v997_v46, 4  ;;  %v983_v61 = vor.u32 %v981_v36, %v980_v47  ;;  %v985_v62 = vrot.slane %v980_v47, 4  ;;  %v729_v0 = vpop.f32.mrb[15].mxu0  ;;  %v1026_v1 = vor.u32 %v1024_v40, %v9415_v52 }
 0x173   : > { %v1027_v2 = vrot.slane %v9415_v52, 4  ;;  %v1009_v3 = vor.u32 %v1007_v44, %v9417_v54  ;;  %v1010_v4 = vrot.slane %v9417_v54, 4  ;;  %v1001_v6 = vsel %vm9383_vm12, %v993_v13, %v1000_v58  ;;  %v1308_v52 = vld [vmem:[#allocation2 + $0x60] sm:$0xf] }
 0x174   : > { %v1285_v7 = vsel %vm9238_vm2, %v1002_v59, %v1284_v37  ;;  %v984_v8 = vsel %vm9383_vm12, %v976_v19, %v983_v61  ;;  %v1278_v9 = vsel %vm9238_vm2, %v985_v62, %v1277_v38  ;;  %1283 = vst.msk [vmem:[#allocation2 + $0x34] sm:$0xf] %vm1256_vm5, %v1001_v6  ;;  %v1295_v11 = vsel %vm9376_vm11, %v1026_v1, %v1294_v53  ;;  %v1301_v61 = vld [vmem:[#allocation2 + $0x54] sm:$0xf] }
 0x175   : > { %1286 = vst [vmem:[#allocation2 + $0x38] sm:$0x1] %v1285_v7  ;;  %1276 = vst.msk [vmem:[#allocation2 + $0x28] sm:$0xf] %vm1256_vm5, %v984_v8  ;;  %v1288_v12 = vsel %vm9376_vm11, %v1009_v3, %v1287_v63  ;;  %v7593_v13 = vpack.c.bf16 %v816_v48, %v816_v48  ;;  %v7591_v14 = vpack.c.bf16 %v814_v50, %v814_v50  ;;  %v819_v15 = vmax.f32 %v735_v55, 0.0 }
 0x176   : > { %1279 = vst [vmem:[#allocation2 + $0x2c] sm:$0x1] %v1278_v9  ;;  %1296 = vst [vmem:[#allocation2 + $0x48] sm:$0xf] %v1295_v11  ;;  %v817_v16 = vmax.f32 %v727_v56, 0.0  ;;  %v738_v17 = vadd.f32 %v7981_v57, %v9367_v60  ;;  %v730_v18 = vadd.f32 %v9367_v60, %v729_v0 }
 0x177   : > { %1289 = vst [vmem:[#allocation2 + $0x3c] sm:$0xf] %v1288_v12  ;;  %v1029_v19 = vshrl.u32 %v7593_v13, 16  ;;  %v1032_v20 = vshll.u32 %v7593_v13, 16  ;;  %v1012_v21 = vshrl.u32 %v7591_v14, 16  ;;  %v1015_v22 = vshll.u32 %v7591_v14, 16 }
 0x178   : > { %v7984_v23 = vpop.f32.mrb[16].mxu0  ;;  %v7596_v28 = vpack.c.bf16 %v819_v15, %v819_v15  ;;  %v7594_v30 = vpack.c.bf16 %v817_v16, %v817_v16  ;;  %v820_v31 = vmax.f32 %v738_v17, 0.0  ;;  %v818_v32 = vmax.f32 %v730_v18, 0.0  ;;  %v1312_v16 = vld [vmem:[#allocation2 + $0x68] sm:$0x1] }
 0x179   : > { %v742_v33 = vpop.f32.mrb[17].mxu0  ;;  %v1031_v34 = vrot.slane %v1029_v19, 7  ;;  %v1014_v35 = vrot.slane %v1012_v21, 7  ;;  %v751_v36 = vadd.f32 %v7984_v23, %v9367_v60  ;;  %v1305_v21 = vld [vmem:[#allocation2 + $0x5c] sm:$0x1] }
 0x17a   : > { %v743_v37 = vadd.f32 %v9367_v60, %v742_v33  ;;  %v7985_v38 = vpop.f32.mrb[18].mxu0  ;;  %v1055_v39 = vshrl.u32 %v7596_v28, 16  ;;  %v1058_v40 = vshll.u32 %v7596_v28, 16  ;;  %v1038_v43 = vshrl.u32 %v7594_v30, 16 }
 0x17b   : > { %v1041_v44 = vshll.u32 %v7594_v30, 16  ;;  %v745_v45 = vpop.f32.mrb[19].mxu0  ;;  %v1034_v46 = vor.u32 %v1032_v20, %v1031_v34  ;;  %v1036_v47 = vrot.slane %v1031_v34, 4  ;;  %v1017_v48 = vor.u32 %v1015_v22, %v1014_v35 }
 0x17c   : > { %v1019_v50 = vrot.slane %v1014_v35, 4  ;;  %v1057_v51 = vrot.slane %v1055_v39, 7  ;;  %v1040_v53 = vrot.slane %v1038_v43, 7  ;;  %v7597_v54 = vpack.c.bf16 %v820_v31, %v820_v31 }
 0x17d   : > { %v7595_v55 = vpack.c.bf16 %v818_v32, %v818_v32  ;;  %v1035_v56 = vsel %vm9383_vm12, %v1027_v2, %v1034_v46  ;;  %v1299_v57 = vsel %vm9238_vm2, %v1036_v47, %v1298_v26  ;;  %v1018_v58 = vsel %vm9383_vm12, %v1010_v4, %v1017_v48  ;;  %v1716_v2 = vld [vmem:[#allocation2 + $0xc] sm:$0xf]  ;;  %v1751_v47 = vld [vmem:[#allocation2 + $0x14] sm:$0x1] }
 0x17e   : > { %v1292_v59 = vsel %vm9238_vm2, %v1019_v50, %v1291_v27  ;;  %1297 = vst.msk [vmem:[#allocation2 + $0x4c] sm:$0xf] %vm1256_vm5, %v1035_v56  ;;  %1300 = vst [vmem:[#allocation2 + $0x50] sm:$0x1] %v1299_v57  ;;  %v1060_v62 = vor.u32 %v1058_v40, %v1057_v51  ;;  %v1061_v63 = vrot.slane %v1057_v51, 4  ;;  %v1043_v0 = vor.u32 %v1041_v44, %v1040_v53 }
 0x17f   : > { %1290 = vst.msk [vmem:[#allocation2 + $0x40] sm:$0xf] %vm1256_vm5, %v1018_v58  ;;  %1293 = vst [vmem:[#allocation2 + $0x44] sm:$0x1] %v1292_v59  ;;  %v1044_v1 = vrot.slane %v1040_v53, 4  ;;  %v1063_v3 = vshrl.u32 %v7597_v54, 16  ;;  %v754_v18 = vadd.f32 %v7985_v38, %v9367_v60  ;;  %v746_v19 = vadd.f32 %v9367_v60, %v745_v45 }
 0x180   : > { %v1066_v6 = vshll.u32 %v7597_v54, 16  ;;  %v1046_v7 = vshrl.u32 %v7595_v55, 16  ;;  %v1049_v8 = vshll.u32 %v7595_v55, 16  ;;  %v9456_v4 = vpop.f32.mrb[20].mxu0  ;;  %v1309_v9 = vsel %vm9376_vm11, %v1060_v62, %v1308_v52  ;;  %v1717_v38 = vld [vmem:[#allocation2 + $0x10] sm:$0xf] }
 0x181   : > { %v1302_v11 = vsel %vm9376_vm11, %v1043_v0, %v1301_v61  ;;  %v823_v12 = vmax.f32 %v751_v36, 0.0  ;;  %v821_v13 = vmax.f32 %v743_v37, 0.0  ;;  %v9462_v14 = vpop.f32.mrb[21].mxu0  ;;  %1310 = vst [vmem:[#allocation2 + $0x60] sm:$0xf] %v1309_v9  ;;  %v1065_v15 = vrot.slane %v1063_v3, 7 }
 0x182   : > { %1303 = vst [vmem:[#allocation2 + $0x54] sm:$0xf] %v1302_v11  ;;  %v1048_v17 = vrot.slane %v1046_v7, 7  ;;  %v9466_v20 = vpop.f32.mrb[22].mxu0  ;;  %v1794_v26 = vshrl.u32 %v1716_v2, 16  ;;  %v1797_v27 = vshll.u32 %v1716_v2, 16 }
 0x183   : > { %v7600_v22 = vpack.c.bf16 %v823_v12, %v823_v12  ;;  %v7598_v23 = vpack.c.bf16 %v821_v13, %v821_v13  ;;  %v9468_v28 = vpop.f32.mrb[23].mxu0  ;;  %v1068_v30 = vor.u32 %v1066_v6, %v1065_v15  ;;  %v1070_v31 = vrot.slane %v1065_v15, 4  ;;  %v1322_v45 = vld [vmem:[#allocation2 + $0x78] sm:$0xf]  ;;  %v1315_v46 = vld [vmem:[#allocation2 + $0x6c] sm:$0xf] }
 0x184   : > { %v1051_v32 = vor.u32 %v1049_v8, %v1048_v17  ;;  %v1053_v33 = vrot.slane %v1048_v17, 4  ;;  %v824_v52 = vmax.f32 %v754_v18, 0.0  ;;  %v822_v53 = vmax.f32 %v746_v19, 0.0  ;;  %v8732_v55 = vld [vmem:[#allocation6 + $0x48] sm:$0xff]   ;;  %v1718_v9 = vld [vmem:[#allocation2 + $0x18] sm:$0xf] }
 0x185   : > { %v1089_v34 = vshrl.u32 %v7600_v22, 16  ;;  %v1092_v35 = vshll.u32 %v7600_v22, 16  ;;  %v1072_v36 = vshrl.u32 %v7598_v23, 16  ;;  %v1075_v37 = vshll.u32 %v7598_v23, 16  ;;  %v8726_v54 = vld [vmem:[#allocation2 + $0x48] sm:$0xff]  }
 0x186   : > { %v1069_v39 = vsel %vm9383_vm12, %v1061_v63, %v1068_v30  ;;  %v1313_v40 = vsel %vm9238_vm2, %v1070_v31, %v1312_v16  ;;  %v1052_v43 = vsel %vm9383_vm12, %v1044_v1, %v1051_v32  ;;  %v1306_v44 = vsel %vm9238_vm2, %v1053_v33, %v1305_v21  ;;  %v8724_v48 = vld [vmem:[#allocation2 + $0x3c] sm:$0xff]   ;;  %v8738_v19 = vld [vmem:[#allocation6 + $0x50] sm:$0xff]  }
 0x187   : > { %1311 = vst.msk [vmem:[#allocation2 + $0x64] sm:$0xf] %vm1256_vm5, %v1069_v39  ;;  %1314 = vst [vmem:[#allocation2 + $0x68] sm:$0x1] %v1313_v40  ;;  %v9480_v50 = vrot.slane %v1089_v34, 7  ;;  %v9482_v51 = vrot.slane %v1072_v36, 7  ;;  %8118 = vmatprep.mubr.msk.bf16.mxu1 %vm2218_vm9, %v8724_v48  ;;  %v7601_v3 = vpack.c.bf16 %v824_v52, %v824_v52  ;;  %v7599_v6 = vpack.c.bf16 %v822_v53, %v822_v53 }
 0x188   : > { %1304 = vst.msk [vmem:[#allocation2 + $0x58] sm:$0xf] %vm1256_vm5, %v1052_v43  ;;  %1307 = vst [vmem:[#allocation2 + $0x5c] sm:$0x1] %v1306_v44  ;;  %v1796_v56 = vrot.slane %v1794_v26, 4  ;;  %v1799_v57 = vrot.slane %v1797_v27, 5  ;;  %8119 = vmatmul.mubr.msk.bf16.vlgmr.msra.gmra.mrb[0].mxu1 %vm2218_vm9, %v8726_v54 }
 0x189   : > { %v1803_v58 = vshll.u32 %v1717_v38, 16  ;;  %v1807_v59 = vshrl.u32 %v1717_v38, 16  ;;  %v9485_v61 = vpop.f32.mrb[24].mxu0  ;;  %v1094_v62 = vor.u32 %v1092_v35, %v9480_v50  ;;  %v1095_v63 = vrot.slane %v9480_v50, 4  ;;  %v1719_v11 = vld [vmem:[#allocation2 + $0x1c] sm:$0xf]  ;;  %8143 = vmatpush3.bf16.msra.mxu1 %v9343_v41 }
 0x18a   : > { %v1077_v0 = vor.u32 %v1075_v37, %v9482_v51  ;;  %v1078_v1 = vrot.slane %v9482_v51, 4  ;;  %v9492_v2 = vpop.f32.mrb[25].mxu0  ;;  %v1800_v7 = vor.u32 %v1799_v57, %v1796_v56  ;;  %v1813_v17 = vshll.u32 %v1751_v47, 16  ;;  %8144 = vmatprep.subr.bf16.mxu1 %v8732_v55  ;;  %v1326_v26 = vld [vmem:[#allocation2 + $0x80] sm:$0x1] }
 0x18b   : > { %v1805_v8 = vrot.slane %v1803_v58, 5  ;;  %v9495_v12 = vpop.f32.mrb[26].mxu0  ;;  %v1323_v13 = vsel %vm9376_vm11, %v1094_v62, %v1322_v45  ;;  %v1809_v16 = vrot.slane %v1807_v59, 4  ;;  %v1097_v21 = vshrl.u32 %v7601_v3, 16  ;;  %v1319_v27 = vld [vmem:[#allocation2 + $0x74] sm:$0x1] }
 0x18c   : > { %v1316_v15 = vsel %vm9376_vm11, %v1077_v0, %v1315_v46  ;;  %v9501_v18 = vpop.f32.mrb[27].mxu0  ;;  %1324 = vst [vmem:[#allocation2 + $0x78] sm:$0xf] %v1323_v13  ;;  %v1100_v22 = vshll.u32 %v7601_v3, 16  ;;  %v1080_v23 = vshrl.u32 %v7599_v6, 16  ;;  %v1083_v41 = vshll.u32 %v7599_v6, 16 }
 0x18d   : > { %1317 = vst [vmem:[#allocation2 + $0x6c] sm:$0xf] %v1316_v15  ;;  %v1801_v30 = vrot.slane %v1800_v7, 4  ;;  %v1810_v31 = vor.u32 %v1809_v16, %v1805_v8  ;;  %v1815_v32 = vrot.slane %v1813_v17, 5  ;;  %v1818_v33 = vshrl.u32 %v1718_v9, 16  ;;  %8145 = vmatpush3.bf16.msra.mxu1 %v8732_v55  ;;  %v8740_v7 = vld [vmem:[#allocation6 + $0x8] sm:$0xff]  }
 0x18e   : > { %v1099_v34 = vrot.slane %v1097_v21, 7  ;;  %v1082_v35 = vrot.slane %v1080_v23, 7  ;;  %v1821_v36 = vshll.u32 %v1718_v9, 16  ;;  %v1827_v37 = vshll.u32 %v1719_v11, 16  ;;  %8178 = vmatprep.subr.bf16.mxu1 %v8738_v19  ;;  %v1752_v50 = vld [vmem:[#allocation2 + $0x20] sm:$0x1] }
 0x18f   : > { %v1806_v38 = vsel %vm9326_vm8, %v1801_v30, %v1805_v8  ;;  %v1811_v39 = vrot.slane %v1810_v31, 4  ;;  %v1820_v40 = vrot.slane %v1818_v33, 4  ;;  %v1831_v43 = vshrl.u32 %v1719_v11, 16  ;;  %v8727_v44 = vld [vmem:[#allocation2 + $0x54] sm:$0xff]   ;;  %v8728_v51 = vld [vmem:[#allocation2 + $0x60] sm:$0xff]   ;;  %v9505_v52 = vpop.f32.mrb[28].mxu0 }
 0x190   : > { %v1102_v45 = vor.u32 %v1100_v22, %v1099_v34  ;;  %v1104_v46 = vrot.slane %v1099_v34, 4  ;;  %v1085_v47 = vor.u32 %v1083_v41, %v1082_v35  ;;  %v1087_v48 = vrot.slane %v1082_v35, 4  ;;  %8122 = vmatprep.mubr.msk.bf16.mxu1 %vm2218_vm9, %v8727_v44  ;;  %v9510_v57 = vpop.f32.mrb[29].mxu0  ;;  %v1720_v3 = vld [vmem:[#allocation2 + $0x24] sm:$0xf] }
 0x191   : > { %v1816_v53 = vsel %vm9326_vm8, %v1811_v39, %v1815_v32  ;;  %v1823_v54 = vrot.slane %v1821_v36, 5  ;;  %v1829_v55 = vrot.slane %v1827_v37, 5  ;;  %v1833_v56 = vrot.slane %v1831_v43, 4  ;;  %8123 = vmatmul.mubr.msk.bf16.gmra.mrb[4].mxu1 %vm2218_vm9, %v8728_v51  ;;  %v9521_v6 = vpop.f32.mrb[30].mxu0  ;;  %v1753_v37 = vld [vmem:[#allocation2 + $0x2c] sm:$0x1] }
 0x192   : > { %v1103_v58 = vsel %vm9383_vm12, %v1095_v63, %v1102_v45  ;;  %v1327_v59 = vsel %vm9238_vm2, %v1104_v46, %v1326_v26  ;;  %v1086_v62 = vsel %vm9383_vm12, %v1078_v1, %v1085_v47  ;;  %v1320_v0 = vsel %vm9238_vm2, %v1087_v48, %v1319_v27  ;;  %v9525_v1 = vpop.f32.mrb[31].mxu0  ;;  %v1336_v46 = vld [vmem:[#allocation2 + $0x90] sm:$0xf] }
 0x193   : > { %1325 = vst.msk [vmem:[#allocation2 + $0x7c] sm:$0xf] %vm1256_vm5, %v1103_v58  ;;  %1328 = vst [vmem:[#allocation2 + $0x80] sm:$0x1] %v1327_v59  ;;  %v7171_v63 = vcombine.low %v1806_v38, %v1816_v53  ;;  %v1824_v8 = vor.u32 %v1823_v54, %v1820_v40  ;;  %v1834_v9 = vor.u32 %v1833_v56, %v1829_v55  ;;  %v1837_v11 = vshll.u32 %v1752_v50, 16 }
 0x194   : > { %1318 = vst.msk [vmem:[#allocation2 + $0x70] sm:$0xf] %vm1256_vm5, %v1086_v62  ;;  %1321 = vst [vmem:[#allocation2 + $0x74] sm:$0x1] %v1320_v0  ;;  %v767_v13 = vadd.f32 %v9456_v4, %v9367_v60  ;;  %v759_v15 = vadd.f32 %v9367_v60, %v9462_v14  ;;  %v770_v16 = vadd.f32 %v9466_v20, %v9367_v60  ;;  %v1842_v23 = vshrl.u32 %v1720_v3, 16 }
 0x195   : > { %v762_v17 = vadd.f32 %v9367_v60, %v9468_v28  ;;  %8003 = vmatmul.mubr.msk.bf16.vlgmr.msra.gmra.mrb[32].mxu0 %vm2218_vm9, %v7171_v63  ;;  %v1825_v19 = vrot.slane %v1824_v8, 4  ;;  %v1835_v21 = vrot.slane %v1834_v9, 4  ;;  %v1839_v22 = vrot.slane %v1837_v11, 5  ;;  %v1721_v4 = vld [vmem:[#allocation2 + $0x28] sm:$0xf] }
 0x196   : > { %v827_v41 = vmax.f32 %v767_v13, 0.0  ;;  %v825_v26 = vmax.f32 %v759_v15, 0.0  ;;  %v828_v27 = vmax.f32 %v770_v16, 0.0  ;;  %8035 = vmatpush3.bf16.msra.mxu0 %v9433_v10  ;;  %v1844_v28 = vrot.slane %v1842_v23, 4  ;;  %v1329_v62 = vld [vmem:[#allocation2 + $0x84] sm:$0xf] }
 0x197   : > { %v826_v30 = vmax.f32 %v762_v17, 0.0  ;;  %v1830_v14 = vsel %vm9326_vm8, %v1825_v19, %v1829_v55  ;;  %v1840_v20 = vsel %vm9326_vm8, %v1835_v21, %v1839_v22  ;;  %v1845_v31 = vshll.u32 %v1720_v3, 16  ;;  %8036 = vmatprep.subr.bf16.mxu0 %v8740_v7  ;;  %v1340_v15 = vld [vmem:[#allocation2 + $0x98] sm:$0x1]  ;;  %v1333_v16 = vld [vmem:[#allocation2 + $0x8c] sm:$0x1] }
 0x198   : > { %v7172_v32 = vcombine.low %v1830_v14, %v1840_v20  ;;  %v7604_v33 = vpack.c.bf16 %v827_v41, %v827_v41  ;;  %v7602_v34 = vpack.c.bf16 %v825_v26, %v825_v26  ;;  %v7605_v35 = vpack.c.bf16 %v828_v27, %v828_v27  ;;  %v1722_v23 = vld [vmem:[#allocation2 + $0x30] sm:$0xf]  ;;  %v1754_v14 = vld [vmem:[#allocation2 + $0x38] sm:$0x1] }
 0x199   : > { %v7603_v36 = vpack.c.bf16 %v826_v30, %v826_v30  ;;  %v1847_v38 = vrot.slane %v1845_v31, 5  ;;  %v1851_v39 = vshll.u32 %v1721_v4, 16  ;;  %v1855_v40 = vshrl.u32 %v1721_v4, 16  ;;  %v1723_v4 = vld [vmem:[#allocation2 + $0x34] sm:$0xf] }
 0x19a   : > { %8006 = vmatprep.mubr.msk.bf16.mxu0 %vm2218_vm9, %v7172_v32  ;;  %v1123_v10 = vshrl.u32 %v7604_v33, 16  ;;  %v1126_v43 = vshll.u32 %v7604_v33, 16  ;;  %v1106_v44 = vshrl.u32 %v7602_v34, 16  ;;  %v1109_v45 = vshll.u32 %v7602_v34, 16  ;;  %8037 = vmatpush3.bf16.msra.mxu0 %v8740_v7  ;;  %v8730_v59 = vld [vmem:[#allocation2 + $0x78] sm:$0xff]  }
 0x19b   : > { %v1131_v47 = vshrl.u32 %v7605_v35, 16  ;;  %v1134_v48 = vshll.u32 %v7605_v35, 16  ;;  %v1114_v50 = vshrl.u32 %v7603_v36, 16  ;;  %v1117_v51 = vshll.u32 %v7603_v36, 16  ;;  %v8729_v53 = vld [vmem:[#allocation2 + $0x6c] sm:$0xff]  }
 0x19c   : > { %v1125_v54 = vrot.slane %v1123_v10, 7  ;;  %v1108_v55 = vrot.slane %v1106_v44, 7  ;;  %v1848_v56 = vor.u32 %v1847_v38, %v1844_v28  ;;  %v1853_v58 = vrot.slane %v1851_v39, 5  ;;  %8126 = vmatprep.mubr.msk.bf16.mxu1 %vm2218_vm9, %v8729_v53 }
 0x19d   : > { %v1133_v0 = vrot.slane %v1131_v47, 7  ;;  %v1116_v3 = vrot.slane %v1114_v50, 7  ;;  %v1857_v63 = vrot.slane %v1855_v40, 4  ;;  %v1861_v8 = vshll.u32 %v1753_v37, 16  ;;  %8127 = vmatmul.mubr.msk.bf16.gmra.mrb[8].mxu1 %vm2218_vm9, %v8730_v59 }
 0x19e   : > { %v1128_v9 = vor.u32 %v1126_v43, %v1125_v54  ;;  %v1129_v7 = vrot.slane %v1125_v54, 4  ;;  %v1111_v11 = vor.u32 %v1109_v45, %v1108_v55  ;;  %v1112_v13 = vrot.slane %v1108_v55, 4 }
 0x19f   : > { %v1136_v17 = vor.u32 %v1134_v48, %v1133_v0  ;;  %v1138_v19 = vrot.slane %v1133_v0, 4  ;;  %v1119_v21 = vor.u32 %v1117_v51, %v1116_v3  ;;  %v1121_v22 = vrot.slane %v1116_v3, 4 }
 0x1a0   : > { %v1337_v41 = vsel %vm9376_vm11, %v1128_v9, %v1336_v46  ;;  %v1330_v26 = vsel %vm9376_vm11, %v1111_v11, %v1329_v62  ;;  %v1849_v27 = vrot.slane %v1848_v56, 4  ;;  %v1858_v30 = vor.u32 %v1857_v63, %v1853_v58  ;;  %v1724_v46 = vld [vmem:[#allocation2 + $0x3c] sm:$0xf] }
 0x1a1   : > { %1338 = vst [vmem:[#allocation2 + $0x90] sm:$0xf] %v1337_v41  ;;  %1331 = vst [vmem:[#allocation2 + $0x84] sm:$0xf] %v1330_v26  ;;  %v1137_v20 = vsel %vm9383_vm12, %v1129_v7, %v1136_v17  ;;  %v1341_v28 = vsel %vm9238_vm2, %v1138_v19, %v1340_v15  ;;  %v1120_v31 = vsel %vm9383_vm12, %v1112_v13, %v1119_v21  ;;  %v1863_v35 = vrot.slane %v1861_v8, 5 }
 0x1a2   : > { %v1334_v32 = vsel %vm9238_vm2, %v1121_v22, %v1333_v16  ;;  %1339 = vst.msk [vmem:[#allocation2 + $0x94] sm:$0xf] %vm1256_vm5, %v1137_v20  ;;  %1342 = vst [vmem:[#allocation2 + $0x98] sm:$0x1] %v1341_v28  ;;  %v1854_v33 = vsel %vm9326_vm8, %v1849_v27, %v1853_v58  ;;  %v1859_v34 = vrot.slane %v1858_v30, 4  ;;  %v1866_v36 = vshrl.u32 %v1722_v23, 16 }
 0x1a3   : > { %1332 = vst.msk [vmem:[#allocation2 + $0x88] sm:$0xf] %vm1256_vm5, %v1120_v31  ;;  %1335 = vst [vmem:[#allocation2 + $0x8c] sm:$0x1] %v1334_v32  ;;  %v1869_v37 = vshll.u32 %v1722_v23, 16  ;;  %v1875_v38 = vshll.u32 %v1723_v4, 16  ;;  %v783_v44 = vadd.f32 %v9485_v61, %v9367_v60  ;;  %v775_v45 = vadd.f32 %v9367_v60, %v9492_v2 }
 0x1a4   : > { %v1879_v39 = vshrl.u32 %v1723_v4, 16  ;;  %v1885_v40 = vshll.u32 %v1754_v14, 16  ;;  %v1864_v10 = vsel %vm9326_vm8, %v1859_v34, %v1863_v35  ;;  %v1868_v43 = vrot.slane %v1866_v36, 4  ;;  %v1343_v21 = vld [vmem:[#allocation2 + $0x9c] sm:$0xf] }
 0x1a5   : > { %v7173_v47 = vcombine.low %v1854_v33, %v1864_v10  ;;  %v1871_v48 = vrot.slane %v1869_v37, 5  ;;  %v1877_v50 = vrot.slane %v1875_v38, 5  ;;  %v831_v54 = vmax.f32 %v783_v44, 0.0  ;;  %v9575_v4 = vld [vmem:[#allocation2 + $0x40] sm:$0xf] }
 0x1a6   : > { %v1881_v51 = vrot.slane %v1879_v39, 4  ;;  %v1887_v53 = vrot.slane %v1885_v40, 5  ;;  %v829_v55 = vmax.f32 %v775_v45, 0.0  ;;  %v786_v56 = vadd.f32 %v9495_v12, %v9367_v60  ;;  %v1755_v33 = vld [vmem:[#allocation2 + $0x44] sm:$0x1] }
 0x1a7   : > { %8007 = vmatmul.mubr.msk.bf16.gmra.mrb[36].mxu0 %vm2218_vm9, %v7173_v47  ;;  %v1872_v58 = vor.u32 %v1871_v48, %v1868_v43  ;;  %v778_v61 = vadd.f32 %v9367_v60, %v9501_v18  ;;  %v1890_v62 = vshrl.u32 %v1724_v46, 16  ;;  %v7608_v2 = vpack.c.bf16 %v831_v54, %v831_v54  ;;  %v1350_v18 = vld [vmem:[#allocation2 + $0xa8] sm:$0xf]  ;;  %v1354_v45 = vld [vmem:[#allocation2 + $0xb0] sm:$0x1] }
 0x1a8   : > { %v1882_v59 = vor.u32 %v1881_v51, %v1877_v50  ;;  %v7606_v0 = vpack.c.bf16 %v829_v55, %v829_v55  ;;  %v832_v3 = vmax.f32 %v786_v56, 0.0  ;;  %v1893_v63 = vshll.u32 %v1724_v46, 16  ;;  %v1347_v46 = vld [vmem:[#allocation2 + $0xa4] sm:$0x1]  ;;  %v9586_v55 = vld [vmem:[#allocation2 + $0x48] sm:$0xf] }
 0x1a9   : > { %v1873_v8 = vrot.slane %v1872_v58, 4  ;;  %v830_v7 = vmax.f32 %v778_v61, 0.0  ;;  %v1892_v11 = vrot.slane %v1890_v62, 4  ;;  %v1157_v13 = vshrl.u32 %v7608_v2, 16  ;;  %v8733_v41 = vld [vmem:[#allocation2 + $0x90] sm:$0xff]  }
 0x1aa   : > { %v1883_v9 = vrot.slane %v1882_v59, 4  ;;  %v1160_v15 = vshll.u32 %v7608_v2, 16  ;;  %v1140_v16 = vshrl.u32 %v7606_v0, 16  ;;  %v1143_v12 = vshll.u32 %v7606_v0, 16  ;;  %v8731_v17 = vld [vmem:[#allocation2 + $0x84] sm:$0xff]  }
 0x1ab   : > { %v1878_v19 = vsel %vm9326_vm8, %v1873_v8, %v1877_v50  ;;  %v7609_v22 = vpack.c.bf16 %v832_v3, %v832_v3  ;;  %v7607_v23 = vpack.c.bf16 %v830_v7, %v830_v7  ;;  %v1159_v27 = vrot.slane %v1157_v13, 7  ;;  %8130 = vmatprep.mubr.msk.bf16.mxu1 %vm2218_vm9, %v8731_v17  ;;  %v9588_v56 = vld [vmem:[#allocation2 + $0x4c] sm:$0xf]  ;;  %v1756_v2 = vld [vmem:[#allocation2 + $0x50] sm:$0x1] }
 0x1ac   : > { %v1888_v60 = vsel %vm9326_vm8, %v1883_v9, %v1887_v53  ;;  %v1142_v30 = vrot.slane %v1140_v16, 7  ;;  %v1895_v14 = vrot.slane %v1893_v63, 5  ;;  %8131 = vmatmul.mubr.msk.bf16.gmra.mrb[12].mxu1 %vm2218_vm9, %v8733_v41  ;;  %v1899_v10 = vshll.u32 %v9575_v4, 16  ;;  %v8797_v17 = vld [vmem:[%s11090_s2] ss:$0 sm:$0xff] }
 0x1ad   : > { %v7174_v26 = vcombine.low %v1878_v19, %v1888_v60  ;;  %v1165_v20 = vshrl.u32 %v7609_v22, 16  ;;  %v1168_v28 = vshll.u32 %v7609_v22, 16  ;;  %v1148_v31 = vshrl.u32 %v7607_v23, 16  ;;  %v9610_v60 = vld [vmem:[#allocation2 + $0x54] sm:$0xf] }
 0x1ae   : > { %v1151_v32 = vshll.u32 %v7607_v23, 16  ;;  %v1162_v34 = vor.u32 %v1160_v15, %v1159_v27  ;;  %v1163_v35 = vrot.slane %v1159_v27, 4  ;;  %v1145_v36 = vor.u32 %v1143_v12, %v1142_v30 }
 0x1af   : > { %8010 = vmatprep.mubr.msk.bf16.mxu0 %vm2218_vm9, %v7174_v26  ;;  %v1146_v37 = vrot.slane %v1142_v30, 4  ;;  %v1167_v38 = vrot.slane %v1165_v20, 7  ;;  %v1150_v39 = vrot.slane %v1148_v31, 7  ;;  %v1896_v40 = vor.u32 %v1895_v14, %v1892_v11  ;;  %v9613_v14 = vld [vmem:[#allocation6 + $0x20] sm:$0xff]  }
 0x1b0   : > { %v1351_v43 = vsel %vm9376_vm11, %v1162_v34, %v1350_v18  ;;  %v1344_v44 = vsel %vm9376_vm11, %v1145_v36, %v1343_v21  ;;  %v1903_v47 = vshrl.u32 %v9575_v4, 16  ;;  %v1909_v48 = vshll.u32 %v1755_v33, 16  ;;  %8070 = vmatprep.subr.bf16.mxu0 %v9613_v14 }
 0x1b1   : > { %1352 = vst [vmem:[#allocation2 + $0xa8] sm:$0xf] %v1351_v43  ;;  %1345 = vst [vmem:[#allocation2 + $0x9c] sm:$0xf] %v1344_v44  ;;  %v1170_v50 = vor.u32 %v1168_v28, %v1167_v38  ;;  %v1172_v51 = vrot.slane %v1167_v38, 4  ;;  %v1153_v53 = vor.u32 %v1151_v32, %v1150_v39  ;;  %v1155_v54 = vrot.slane %v1150_v39, 4 }
 0x1b2   : > { %v1897_v58 = vrot.slane %v1896_v40, 4  ;;  %v1901_v59 = vrot.slane %v1899_v10, 5  ;;  %v1905_v61 = vrot.slane %v1903_v47, 4  ;;  %v1911_v62 = vrot.slane %v1909_v48, 5 }
 0x1b3   : > { %v1171_v0 = vsel %vm9383_vm12, %v1163_v35, %v1170_v50  ;;  %v1355_v3 = vsel %vm9238_vm2, %v1172_v51, %v1354_v45  ;;  %v1154_v63 = vsel %vm9383_vm12, %v1146_v37, %v1153_v53  ;;  %v1348_v8 = vsel %vm9238_vm2, %v1155_v54, %v1347_v46  ;;  %v1364_v50 = vld [vmem:[#allocation2 + $0xc0] sm:$0xf] }
 0x1b4   : > { %1353 = vst.msk [vmem:[#allocation2 + $0xac] sm:$0xf] %vm1256_vm5, %v1171_v0  ;;  %1356 = vst [vmem:[#allocation2 + $0xb0] sm:$0x1] %v1355_v3  ;;  %v1902_v9 = vsel %vm9326_vm8, %v1897_v58, %v1901_v59  ;;  %v1906_v7 = vor.u32 %v1905_v61, %v1901_v59  ;;  %v1914_v11 = vshrl.u32 %v9586_v55, 16  ;;  %v1917_v13 = vshll.u32 %v9586_v55, 16 }
 0x1b5   : > { %1346 = vst.msk [vmem:[#allocation2 + $0xa0] sm:$0xf] %vm1256_vm5, %v1154_v63  ;;  %1349 = vst [vmem:[#allocation2 + $0xa4] sm:$0x1] %v1348_v8  ;;  %v1923_v15 = vshll.u32 %v9588_v56, 16  ;;  %v1927_v16 = vshrl.u32 %v9588_v56, 16  ;;  %v799_v19 = vadd.f32 %v8797_v17, %v9505_v52  ;;  %v791_v23 = vadd.f32 %v8797_v17, %v9510_v57 }
 0x1b6   : > { %v1933_v12 = vshll.u32 %v1756_v2, 16  ;;  %v1907_v18 = vrot.slane %v1906_v7, 4  ;;  %v1916_v21 = vrot.slane %v1914_v11, 4  ;;  %v1919_v22 = vrot.slane %v1917_v13, 5  ;;  %v9626_v2 = vld [vmem:[#allocation2 + $0x58] sm:$0xf] }
 0x1b7   : > { %v1925_v41 = vrot.slane %v1923_v15, 5  ;;  %v1929_v26 = vrot.slane %v1927_v16, 4  ;;  %v835_v30 = vmax.f32 %v799_v19, 0.0  ;;  %v833_v31 = vmax.f32 %v791_v23, 0.0  ;;  %v1357_v63 = vld [vmem:[#allocation2 + $0xb4] sm:$0xf] }
 0x1b8   : > { %v1935_v27 = vrot.slane %v1933_v12, 5  ;;  %v1912_v20 = vsel %vm9326_vm8, %v1907_v18, %v1911_v62  ;;  %v1920_v28 = vor.u32 %v1919_v22, %v1916_v21  ;;  %v802_v52 = vadd.f32 %v8797_v17, %v9521_v6  ;;  %v1368_v15 = vld [vmem:[#allocation2 + $0xc8] sm:$0x1]  ;;  %v1757_v19 = vld [vmem:[#allocation2 + $0x5c] sm:$0x1] }
 0x1b9   : > { %v7175_v32 = vcombine.low %v1902_v9, %v1912_v20  ;;  %v1930_v33 = vor.u32 %v1929_v26, %v1925_v41  ;;  %v7612_v34 = vpack.c.bf16 %v835_v30, %v835_v30  ;;  %v794_v35 = vadd.f32 %v8797_v17, %v9525_v1  ;;  %v1361_v26 = vld [vmem:[#allocation2 + $0xbc] sm:$0x1]  ;;  %v9638_v30 = vld [vmem:[#allocation2 + $0x60] sm:$0xf] }
 0x1ba   : > { %v1921_v57 = vrot.slane %v1920_v28, 4  ;;  %v7610_v36 = vpack.c.bf16 %v833_v31, %v833_v31  ;;  %v836_v37 = vmax.f32 %v802_v52, 0.0  ;;  %v1938_v38 = vshrl.u32 %v9610_v60, 16 }
 0x1bb   : > { %8011 = vmatmul.mubr.msk.bf16.gmra.mrb[40].mxu0 %vm2218_vm9, %v7175_v32  ;;  %v1931_v39 = vrot.slane %v1930_v33, 4  ;;  %v1191_v40 = vshrl.u32 %v7612_v34, 16  ;;  %v1194_v10 = vshll.u32 %v7612_v34, 16  ;;  %v834_v43 = vmax.f32 %v794_v35, 0.0  ;;  %v8735_v54 = vld [vmem:[#allocation2 + $0xa8] sm:$0xff]  }
 0x1bc   : > { %v1926_v6 = vsel %vm9326_vm8, %v1921_v57, %v1925_v41  ;;  %v1174_v44 = vshrl.u32 %v7610_v36, 16  ;;  %v1177_v45 = vshll.u32 %v7610_v36, 16  ;;  %v7613_v46 = vpack.c.bf16 %v836_v37, %v836_v37  ;;  %v8734_v1 = vld [vmem:[#allocation2 + $0x9c] sm:$0xff]   ;;  %v9640_v32 = vld [vmem:[#allocation2 + $0x64] sm:$0xf] }
 0x1bd   : > { %v1936_v47 = vsel %vm9326_vm8, %v1931_v39, %v1935_v27  ;;  %v1193_v48 = vrot.slane %v1191_v40, 7  ;;  %v7611_v51 = vpack.c.bf16 %v834_v43, %v834_v43  ;;  %v1940_v53 = vrot.slane %v1938_v38, 4  ;;  %8134 = vmatprep.mubr.msk.bf16.mxu1 %vm2218_vm9, %v8734_v1  ;;  %v1758_v57 = vld [vmem:[#allocation2 + $0x68] sm:$0x1]  ;;  %v9652_v40 = vld [vmem:[#allocation2 + $0x6c] sm:$0xf] }
 0x1be   : > { %v7176_v58 = vcombine.low %v1926_v6, %v1936_v47  ;;  %v1176_v59 = vrot.slane %v1174_v44, 7  ;;  %v1199_v61 = vshrl.u32 %v7613_v46, 16  ;;  %v1202_v62 = vshll.u32 %v7613_v46, 16  ;;  %8135 = vmatmul.mubr.msk.bf16.gmra.mrb[16].mxu1 %vm2218_vm9, %v8735_v54 }
 0x1bf   : > { %v1196_v0 = vor.u32 %v1194_v10, %v1193_v48  ;;  %v1197_v3 = vrot.slane %v1193_v48, 4  ;;  %v1182_v8 = vshrl.u32 %v7611_v51, 16  ;;  %v1185_v9 = vshll.u32 %v7611_v51, 16  ;;  %v1759_v48 = vld [vmem:[#allocation2 + $0x74] sm:$0x1] }
 0x1c0   : > { %8014 = vmatprep.mubr.msk.bf16.mxu0 %vm2218_vm9, %v7176_v58  ;;  %v1179_v7 = vor.u32 %v1177_v45, %v1176_v59  ;;  %v1180_v11 = vrot.slane %v1176_v59, 4  ;;  %v1201_v13 = vrot.slane %v1199_v61, 7  ;;  %v1941_v16 = vshll.u32 %v9610_v60, 16  ;;  %v9657_v45 = vld [vmem:[#allocation2 + $0x70] sm:$0xf] }
 0x1c1   : > { %v1365_v12 = vsel %vm9376_vm11, %v1196_v0, %v1364_v50  ;;  %v1184_v17 = vrot.slane %v1182_v8, 7  ;;  %v1947_v18 = vshll.u32 %v9626_v2, 16  ;;  %v1951_v21 = vshrl.u32 %v9626_v2, 16  ;;  %v9660_v50 = vld [vmem:[#allocation2 + $0x78] sm:$0xf] }
 0x1c2   : > { %1366 = vst [vmem:[#allocation2 + $0xc0] sm:$0xf] %v1365_v12  ;;  %v1358_v22 = vsel %vm9376_vm11, %v1179_v7, %v1357_v63  ;;  %v1204_v23 = vor.u32 %v1202_v62, %v1201_v13  ;;  %v1206_v41 = vrot.slane %v1201_v13, 4  ;;  %v1943_v27 = vrot.slane %v1941_v16, 5  ;;  %v9669_v7 = vld [vmem:[#allocation2 + $0x7c] sm:$0xf] }
 0x1c3   : > { %1359 = vst [vmem:[#allocation2 + $0xb4] sm:$0xf] %v1358_v22  ;;  %v1187_v20 = vor.u32 %v1185_v9, %v1184_v17  ;;  %v1189_v28 = vrot.slane %v1184_v17, 4  ;;  %v1949_v31 = vrot.slane %v1947_v18, 5  ;;  %v1953_v52 = vrot.slane %v1951_v21, 4 }
 0x1c4   : > { %v1205_v33 = vsel %vm9383_vm12, %v1197_v3, %v1204_v23  ;;  %v1369_v24 = vsel %vm9238_vm2, %v1206_v41, %v1368_v15  ;;  %v1944_v34 = vor.u32 %v1943_v27, %v1940_v53  ;;  %v1957_v35 = vshll.u32 %v1757_v19, 16  ;;  %v1760_v12 = vld [vmem:[#allocation2 + $0x80] sm:$0x1] }
 0x1c5   : > { %1367 = vst.msk [vmem:[#allocation2 + $0xc4] sm:$0xf] %vm1256_vm5, %v1205_v33  ;;  %1370 = vst [vmem:[#allocation2 + $0xc8] sm:$0x1] %v1369_v24  ;;  %v1188_v36 = vsel %vm9383_vm12, %v1180_v11, %v1187_v20  ;;  %v1362_v37 = vsel %vm9238_vm2, %v1189_v28, %v1361_v26  ;;  %v1954_v38 = vor.u32 %v1953_v52, %v1949_v31  ;;  %v1962_v39 = vshrl.u32 %v9638_v30, 16 }
 0x1c6   : > { %1360 = vst.msk [vmem:[#allocation2 + $0xb8] sm:$0xf] %vm1256_vm5, %v1188_v36  ;;  %1363 = vst [vmem:[#allocation2 + $0xbc] sm:$0x1] %v1362_v37  ;;  %v1945_v10 = vrot.slane %v1944_v34, 4  ;;  %v1959_v43 = vrot.slane %v1957_v35, 5 }
 0x1c7   : > { %v1965_v6 = vshll.u32 %v9638_v30, 16  ;;  %v1971_v44 = vshll.u32 %v9640_v32, 16  ;;  %v1955_v42 = vrot.slane %v1954_v38, 4  ;;  %v1964_v46 = vrot.slane %v1962_v39, 4  ;;  %v9678_v33 = vld [vmem:[#allocation2 + $0x84] sm:$0xf] }
 0x1c8   : > { %v1975_v1 = vshrl.u32 %v9640_v32, 16  ;;  %v1981_v47 = vshll.u32 %v1758_v57, 16  ;;  %v1950_v51 = vsel %vm9326_vm8, %v1945_v10, %v1949_v31  ;;  %v1986_v58 = vshrl.u32 %v9652_v40, 16  ;;  %v9683_v37 = vld [vmem:[#allocation2 + $0x88] sm:$0xf] }
 0x1c9   : > { %v1967_v53 = vrot.slane %v1965_v6, 5  ;;  %v1973_v54 = vrot.slane %v1971_v44, 5  ;;  %v1960_v59 = vsel %vm9326_vm8, %v1955_v42, %v1959_v43  ;;  %v1989_v0 = vshll.u32 %v9652_v40, 16 }
 0x1ca   : > { %v1977_v61 = vrot.slane %v1975_v1, 4  ;;  %v1983_v62 = vrot.slane %v1981_v47, 5  ;;  %v7177_v3 = vcombine.low %v1950_v51, %v1960_v59  ;;  %v1988_v8 = vrot.slane %v1986_v58, 4 }
 0x1cb   : > { %v1968_v63 = vor.u32 %v1967_v53, %v1964_v46  ;;  %v1995_v9 = vshll.u32 %v9657_v45, 16  ;;  %v1991_v13 = vrot.slane %v1989_v0, 5  ;;  %v1999_v15 = vshrl.u32 %v9657_v45, 16  ;;  %v1761_v46 = vld [vmem:[#allocation2 + $0x8c] sm:$0x1] }
 0x1cc   : > { %v1978_v11 = vor.u32 %v1977_v61, %v1973_v54  ;;  %v2005_v16 = vshll.u32 %v1759_v48, 16  ;;  %8015 = vmatmul.mubr.msk.bf16.gmra.mrb[44].mxu0 %vm2218_vm9, %v7177_v3  ;;  %v2010_v18 = vshrl.u32 %v9660_v50, 16  ;;  %v2013_v21 = vshll.u32 %v9660_v50, 16  ;;  %v8737_v24 = vld [vmem:[#allocation2 + $0xc0] sm:$0xff]   ;;  %v9698_v0 = vld [vmem:[#allocation2 + $0x94] sm:$0xf] }
 0x1cd   : > { %v1969_v17 = vrot.slane %v1968_v63, 4  ;;  %v1997_v19 = vrot.slane %v1995_v9, 5  ;;  %v1992_v23 = vor.u32 %v1991_v13, %v1988_v8  ;;  %v2001_v41 = vrot.slane %v1999_v15, 4  ;;  %v8736_v27 = vld [vmem:[#allocation2 + $0xb4] sm:$0xff]  }
 0x1ce   : > { %v1979_v22 = vrot.slane %v1978_v11, 4  ;;  %v2007_v26 = vrot.slane %v2005_v16, 5  ;;  %v2012_v28 = vrot.slane %v2010_v18, 4  ;;  %v2015_v31 = vrot.slane %v2013_v21, 5  ;;  %8138 = vmatprep.mubr.msk.bf16.mxu1 %vm2218_vm9, %v8736_v27  ;;  %v1762_v16 = vld [vmem:[#allocation2 + $0x98] sm:$0x1] }
 0x1cf   : > { %v1974_v20 = vsel %vm9326_vm8, %v1969_v17, %v1973_v54  ;;  %v2019_v52 = vshll.u32 %v9669_v7, 16  ;;  %v1993_v35 = vrot.slane %v1992_v23, 4  ;;  %v2002_v57 = vor.u32 %v2001_v41, %v1997_v19  ;;  %8139 = vmatmul.mubr.msk.bf16.gmra.mrb[20].mxu1 %vm2218_vm9, %v8737_v24  ;;  %v9693_v54 = vld [vmem:[#allocation2 + $0x90] sm:$0xf] }
 0x1d0   : > { %v1984_v34 = vsel %vm9326_vm8, %v1979_v22, %v1983_v62  ;;  %v2023_v36 = vshrl.u32 %v9669_v7, 16  ;;  %v2016_v39 = vor.u32 %v2015_v31, %v2012_v28  ;;  %v2029_v43 = vshll.u32 %v1760_v12, 16  ;;  %v9707_v22 = vld [vmem:[#allocation2 + $0x9c] sm:$0xf] }
 0x1d1   : > { %v7178_v38 = vcombine.low %v1974_v20, %v1984_v34  ;;  %v2021_v10 = vrot.slane %v2019_v52, 5  ;;  %v1998_v6 = vsel %vm9326_vm8, %v1993_v35, %v1997_v19  ;;  %v2003_v44 = vrot.slane %v2002_v57, 4  ;;  %v9711_v20 = vld [vmem:[#allocation2 + $0xa0] sm:$0xf]  ;;  %v9713_v34 = vld [vmem:[#allocation2 + $0xa8] sm:$0xf] }
 0x1d2   : > { %v2025_v42 = vrot.slane %v2023_v36, 4  ;;  %v2034_v1 = vshrl.u32 %v9678_v33, 16  ;;  %v2017_v47 = vrot.slane %v2016_v39, 4  ;;  %v2031_v48 = vrot.slane %v2029_v43, 5 }
 0x1d3   : > { %8018 = vmatprep.mubr.msk.bf16.mxu0 %vm2218_vm9, %v7178_v38  ;;  %v2037_v51 = vshll.u32 %v9678_v33, 16  ;;  %v2043_v53 = vshll.u32 %v9683_v37, 16  ;;  %v2008_v58 = vsel %vm9326_vm8, %v2003_v44, %v2007_v26  ;;  %v2047_v62 = vshrl.u32 %v9683_v37, 16  ;;  %v1763_v38 = vld [vmem:[#allocation2 + $0xa4] sm:$0x1] }
 0x1d4   : > { %v2026_v59 = vor.u32 %v2025_v42, %v2021_v10  ;;  %v2036_v61 = vrot.slane %v2034_v1, 4  ;;  %v7179_v3 = vcombine.low %v1998_v6, %v2008_v58  ;;  %v2022_v63 = vsel %vm9326_vm8, %v2017_v47, %v2021_v10  ;;  %v9721_v42 = vld [vmem:[#allocation2 + $0xac] sm:$0xf] }
 0x1d5   : > { %v2039_v8 = vrot.slane %v2037_v51, 5  ;;  %v2045_v9 = vrot.slane %v2043_v53, 5  ;;  %v2049_v13 = vrot.slane %v2047_v62, 4  ;;  %v2053_v15 = vshll.u32 %v1761_v46, 16 }
 0x1d6   : > { %v2027_v11 = vrot.slane %v2026_v59, 4  ;;  %v2058_v12 = vshrl.u32 %v9693_v54, 16  ;;  %8019 = vmatmul.mubr.msk.bf16.gmra.mrb[48].mxu0 %vm2218_vm9, %v7179_v3  ;;  %v2061_v19 = vshll.u32 %v9693_v54, 16  ;;  %v2067_v18 = vshll.u32 %v9698_v0, 16 }
 0x1d7   : > { %v2040_v17 = vor.u32 %v2039_v8, %v2036_v61  ;;  %v2071_v21 = vshrl.u32 %v9698_v0, 16  ;;  %v2050_v41 = vor.u32 %v2049_v13, %v2045_v9  ;;  %v2055_v26 = vrot.slane %v2053_v15, 5  ;;  %v3568_v61 = vld [vmem:[#allocation2 + $0xc] sm:$0xf]  ;;  %v1764_v13 = vld [vmem:[#allocation2 + $0xb0] sm:$0x1] }
 0x1d8   : > { %v2032_v23 = vsel %vm9326_vm8, %v2027_v11, %v2031_v48  ;;  %v2060_v27 = vrot.slane %v2058_v12, 4  ;;  %v2063_v52 = vrot.slane %v2061_v19, 5  ;;  %v2069_v24 = vrot.slane %v2067_v18, 5 }
 0x1d9   : > { %v7180_v28 = vcombine.low %v2022_v63, %v2032_v23  ;;  %v2041_v31 = vrot.slane %v2040_v17, 4  ;;  %v2051_v35 = vrot.slane %v2050_v41, 4  ;;  %v2073_v57 = vrot.slane %v2071_v21, 4  ;;  %v9734_v21 = vld [vmem:[#allocation2 + $0x10] sm:$0xf] }
 0x1da   : > { %v2077_v36 = vshll.u32 %v1762_v16, 16  ;;  %v2082_v39 = vshrl.u32 %v9707_v22, 16  ;;  %v2064_v43 = vor.u32 %v2063_v52, %v2060_v27  ;;  %v2085_v6 = vshll.u32 %v9707_v22, 16 }
 0x1db   : > { %8022 = vmatprep.mubr.msk.bf16.mxu0 %vm2218_vm9, %v7180_v28  ;;  %v2046_v10 = vsel %vm9326_vm8, %v2041_v31, %v2045_v9  ;;  %v2091_v44 = vshll.u32 %v9711_v20, 16  ;;  %v2056_v46 = vsel %vm9326_vm8, %v2051_v35, %v2055_v26  ;;  %v2074_v1 = vor.u32 %v2073_v57, %v2069_v24 }
 0x1dc   : > { %v2079_v47 = vrot.slane %v2077_v36, 5  ;;  %v2084_v48 = vrot.slane %v2082_v39, 4  ;;  %v7181_v51 = vcombine.low %v2046_v10, %v2056_v46  ;;  %v2065_v53 = vrot.slane %v2064_v43, 4  ;;  %v9743_v10 = vld [vmem:[#allocation2 + $0xb4] sm:$0xf] }
 0x1dd   : > { %v2087_v58 = vrot.slane %v2085_v6, 5  ;;  %v2093_v59 = vrot.slane %v2091_v44, 5  ;;  %v2075_v62 = vrot.slane %v2074_v1, 4  ;;  %v2095_v3 = vshrl.u32 %v9711_v20, 16  ;;  %v9745_v1 = vld [vmem:[#allocation2 + $0xb8] sm:$0xf] }
 0x1de   : > { %v2101_v63 = vshll.u32 %v1763_v38, 16  ;;  %v2106_v8 = vshrl.u32 %v9713_v34, 16  ;;  %8023 = vmatmul.mubr.msk.bf16.gmra.mrb[52].mxu0 %vm2218_vm9, %v7181_v51  ;;  %v2070_v9 = vsel %vm9326_vm8, %v2065_v53, %v2069_v24  ;;  %v2109_v15 = vshll.u32 %v9713_v34, 16  ;;  %v9737_v24 = vld [vmem:[#allocation2 + $0x14] sm:$0x1] }
 0x1df   : > { %v2088_v11 = vor.u32 %v2087_v58, %v2084_v48  ;;  %v2115_v16 = vshll.u32 %v9721_v42, 16  ;;  %v2080_v12 = vsel %vm9326_vm8, %v2075_v62, %v2079_v47  ;;  %v2097_v17 = vrot.slane %v2095_v3, 4  ;;  %v3571_v58 = vld [vmem:[#allocation2 + $0x18] sm:$0xf] }
 0x1e0   : > { %v2103_v19 = vrot.slane %v2101_v63, 5  ;;  %v2108_v18 = vrot.slane %v2106_v8, 4  ;;  %v7182_v23 = vcombine.low %v2070_v9, %v2080_v12  ;;  %v2111_v26 = vrot.slane %v2109_v15, 5 }
 0x1e1   : > { %v2089_v41 = vrot.slane %v2088_v11, 4  ;;  %v2117_v27 = vrot.slane %v2115_v16, 5  ;;  %v2098_v28 = vor.u32 %v2097_v17, %v2093_v59  ;;  %v2119_v31 = vshrl.u32 %v9721_v42, 16 }
 0x1e2   : > { %v2125_v52 = vshll.u32 %v1764_v13, 16  ;;  %v3617_v35 = vshrl.u32 %v3568_v61, 16  ;;  %8026 = vmatprep.mubr.msk.bf16.mxu0 %vm2218_vm9, %v7182_v23  ;;  %v2112_v36 = vor.u32 %v2111_v26, %v2108_v18  ;;  %v3620_v38 = vshll.u32 %v3568_v61, 16  ;;  %v1765_v13 = vld [vmem:[#allocation2 + $0xbc] sm:$0x1] }
 0x1e3   : > { %v2094_v57 = vsel %vm9326_vm8, %v2089_v41, %v2093_v59  ;;  %v3626_v39 = vshll.u32 %v9734_v21, 16  ;;  %v2099_v43 = vrot.slane %v2098_v28, 4  ;;  %v2121_v6 = vrot.slane %v2119_v31, 4  ;;  %v9755_v18 = vld [vmem:[#allocation2 + $0x1c] sm:$0xf] }
 0x1e4   : > { %v2127_v44 = vrot.slane %v2125_v52, 5  ;;  %v3619_v46 = vrot.slane %v3617_v35, 4  ;;  %v2113_v47 = vrot.slane %v2112_v36, 4  ;;  %v3622_v48 = vrot.slane %v3620_v38, 5  ;;  %v9762_v52 = vld [vmem:[#allocation2 + $0x20] sm:$0x1] }
 0x1e5   : > { %v3628_v51 = vrot.slane %v3626_v39, 5  ;;  %v3630_v53 = vshrl.u32 %v9734_v21, 16  ;;  %v2104_v59 = vsel %vm9326_vm8, %v2099_v43, %v2103_v19  ;;  %v2122_v61 = vor.u32 %v2121_v6, %v2117_v27  ;;  %v3574_v43 = vld [vmem:[#allocation2 + $0x24] sm:$0xf] }
 0x1e6   : > { %v3636_v62 = vshll.u32 %v9737_v24, 16  ;;  %v2130_v3 = vshrl.u32 %v9743_v10, 16  ;;  %v7183_v63 = vcombine.low %v2094_v57, %v2104_v59  ;;  %v2118_v8 = vsel %vm9326_vm8, %v2113_v47, %v2117_v27 }
 0x1e7   : > { %v3623_v9 = vor.u32 %v3622_v48, %v3619_v46  ;;  %v3632_v11 = vrot.slane %v3630_v53, 4  ;;  %v2123_v15 = vrot.slane %v2122_v61, 4  ;;  %v2133_v17 = vshll.u32 %v9743_v10, 16  ;;  %v9766_v53 = vld [vmem:[#allocation2 + $0x28] sm:$0xf] }
 0x1e8   : > { %v3638_v16 = vrot.slane %v3636_v62, 5  ;;  %v2132_v12 = vrot.slane %v2130_v3, 4  ;;  %8027 = vmatmul.mubr.msk.bf16.gmra.mrb[56].mxu0 %vm2218_vm9, %v7183_v63  ;;  %v2139_v41 = vshll.u32 %v9745_v1, 16  ;;  %v2143_v26 = vshrl.u32 %v9745_v1, 16 }
 0x1e9   : > { %v3624_v19 = vrot.slane %v3623_v9, 4  ;;  %v3633_v23 = vor.u32 %v3632_v11, %v3628_v51  ;;  %v2128_v27 = vsel %vm9326_vm8, %v2123_v15, %v2127_v44  ;;  %v2135_v28 = vrot.slane %v2133_v17, 5  ;;  %v9774_v15 = vld [vmem:[#allocation2 + $0x2c] sm:$0x1] }
 0x1ea   : > { %v2149_v31 = vshll.u32 %v1765_v13, 16  ;;  %v3641_v35 = vshrl.u32 %v3571_v58, 16  ;;  %v7184_v57 = vcombine.low %v2118_v8, %v2128_v27  ;;  %v2141_v39 = vrot.slane %v2139_v41, 5 }
 0x1eb   : > { %v3629_v36 = vsel %vm9326_vm8, %v3624_v19, %v3628_v51  ;;  %v3634_v38 = vrot.slane %v3633_v23, 4  ;;  %v2136_v6 = vor.u32 %v2135_v28, %v2132_v12  ;;  %v2145_v46 = vrot.slane %v2143_v26, 4  ;;  %v3577_v23 = vld [vmem:[#allocation2 + $0x30] sm:$0xf] }
 0x1ec   : > { %v2151_v47 = vrot.slane %v2149_v31, 5  ;;  %v3643_v48 = vrot.slane %v3641_v35, 4  ;;  %8030 = vmatprep.mubr.msk.bf16.mxu0 %vm2218_vm9, %v7184_v57  ;;  %v3644_v59 = vshll.u32 %v3571_v58, 16  ;;  %v3650_v61 = vshll.u32 %v9755_v18, 16 }
 0x1ed   : > { %v3639_v44 = vsel %vm9326_vm8, %v3634_v38, %v3638_v16  ;;  %v3654_v62 = vshrl.u32 %v9755_v18, 16  ;;  %v2137_v3 = vrot.slane %v2136_v6, 4  ;;  %v2146_v63 = vor.u32 %v2145_v46, %v2141_v39  ;;  %v9784_v38 = vld [vmem:[#allocation2 + $0x34] sm:$0xf] }
 0x1ee   : > { %v7322_v51 = vcombine.low %v3629_v36, %v3639_v44  ;;  %v3660_v8 = vshll.u32 %v9762_v52, 16  ;;  %v3646_v9 = vrot.slane %v3644_v59, 5  ;;  %v3652_v11 = vrot.slane %v3650_v61, 5  ;;  %v9786_v44 = vld [vmem:[#allocation2 + $0x38] sm:$0x1] }
 0x1ef   : > { %v3656_v13 = vrot.slane %v3654_v62, 4  ;;  %v3665_v12 = vshrl.u32 %v3574_v43, 16  ;;  %v2142_v58 = vsel %vm9326_vm8, %v2137_v3, %v2141_v39  ;;  %v2147_v16 = vrot.slane %v2146_v63, 4  ;;  %v8798_v62 = vld [vmem:[#allocation2] sm:$0xf] }
 0x1f0   : > { %8146 = vmatprep.mubr.msk.bf16.mxu1 %vm2218_vm9, %v7322_v51  ;;  %v3662_v17 = vrot.slane %v3660_v8, 5  ;;  %v3668_v19 = vshll.u32 %v3574_v43, 16  ;;  %v3647_v41 = vor.u32 %v3646_v9, %v3643_v48  ;;  %v3674_v28 = vshll.u32 %v9766_v53, 16  ;;  %v9788_v51 = vld [vmem:[#allocation2 + $0x4] sm:$0xf] }
 0x1f1   : > { %v3657_v26 = vor.u32 %v3656_v13, %v3652_v11  ;;  %v3667_v27 = vrot.slane %v3665_v12, 4  ;;  %v2152_v31 = vsel %vm9326_vm8, %v2147_v16, %v2151_v47  ;;  %v3678_v57 = vshrl.u32 %v9766_v53, 16  ;;  %v8800_v8 = vld [vmem:[#allocation2 + $0xc] sm:$0xf]  ;;  %v9796_v9 = vld [vmem:[#allocation2 + $0x10] sm:$0xf] }
 0x1f2   : > { %v3670_v35 = vrot.slane %v3668_v19, 5  ;;  %v3684_v36 = vshll.u32 %v9774_v15, 16  ;;  %v7185_v39 = vcombine.low %v2142_v58, %v2152_v31  ;;  %v3648_v6 = vrot.slane %v3647_v41, 4 }
 0x1f3   : > { %v3658_v46 = vrot.slane %v3657_v26, 4  ;;  %v3676_v43 = vrot.slane %v3674_v28, 5  ;;  %v3680_v59 = vrot.slane %v3678_v57, 4  ;;  %v7204_v47 = vcombine.low %v8798_v62, %v9788_v51  ;;  %v3580_v26 = vld [vmem:[#allocation2 + $0x3c] sm:$0xf] }
 0x1f4   : > { %v3671_v48 = vor.u32 %v3670_v35, %v3667_v27  ;;  %v3686_v61 = vrot.slane %v3684_v36, 5  ;;  %8031 = vmatmul.mubr.msk.bf16.gmra.mrb[60].mxu0 %vm2218_vm9, %v7185_v39  ;;  %v3653_v3 = vsel %vm9326_vm8, %v3648_v6, %v3652_v11  ;;  %v7205_v13 = vcombine.low %v8800_v8, %v9796_v9  ;;  %v8741_v27 = vld [vmem:[#allocation6 + $0x58] sm:$0xff]   ;;  %v9803_v35 = vld [vmem:[#allocation2 + $0x40] sm:$0xf]  ;;  %v8802_v6 = vld [vmem:[#allocation2 + $0x18] sm:$0xf] }
 0x1f5   : > { %v3663_v63 = vsel %vm9326_vm8, %v3658_v46, %v3662_v17  ;;  %v3689_v12 = vshrl.u32 %v3577_v23, 16  ;;  %v3681_v19 = vor.u32 %v3680_v59, %v3676_v43  ;;  %8038 = vmatprep.mubr.msk.bf16.mxu0 %vm2218_vm9, %v7204_v47  ;;  %v3692_v41 = vshll.u32 %v3577_v23, 16  ;;  %v9808_v23 = vld [vmem:[#allocation2 + $0x1c] sm:$0xf] }
 0x1f6   : > { %v7323_v58 = vcombine.low %v3653_v3, %v3663_v63  ;;  %v3672_v16 = vrot.slane %v3671_v48, 4  ;;  %v3698_v11 = vshll.u32 %v9784_v38, 16  ;;  %v3702_v31 = vshrl.u32 %v9784_v38, 16  ;;  %v8804_v48 = vld [vmem:[#allocation6 + $0x50] sm:$0xff]   ;;  %v9811_v3 = vld [vmem:[#allocation2 + $0x44] sm:$0x1] }
 0x1f7   : > { %v3691_v28 = vrot.slane %v3689_v12, 4  ;;  %v3708_v17 = vshll.u32 %v9786_v44, 16  ;;  %v3682_v36 = vrot.slane %v3681_v19, 4  ;;  %v3694_v39 = vrot.slane %v3692_v41, 5  ;;  %11155 = vst [vmem:[#allocation14_spill] sm:$0xff] %v9811_v3 }
 0x1f8   : > { %8147 = vmatmul.mubr.msk.bf16.vlgmr.msra.gmra.mrb[24].mxu1 %vm2218_vm9, %v7323_v58  ;;  %v3677_v57 = vsel %vm9326_vm8, %v3672_v16, %v3676_v43  ;;  %v7206_v46 = vcombine.low %v8802_v6, %v9808_v23  ;;  %v3700_v59 = vrot.slane %v3698_v11, 5  ;;  %v3704_v62 = vrot.slane %v3702_v31, 4  ;;  %v3583_v16 = vld [vmem:[#allocation2 + $0x48] sm:$0xf]  ;;  %v9817_v11 = vld [vmem:[#allocation2 + $0x4c] sm:$0xf] }
 0x1f9   : > { %8179 = vmatpush3.bf16.msra.mxu1 %v8804_v48  ;;  %v3710_v47 = vrot.slane %v3708_v17, 5  ;;  %v3713_v63 = vshrl.u32 %v3580_v26, 16  ;;  %v3687_v8 = vsel %vm9326_vm8, %v3682_v36, %v3686_v61  ;;  %v3695_v12 = vor.u32 %v3694_v39, %v3691_v28  ;;  %11156 = vst [vmem:[#allocation15_spill] sm:$0xff] %v9817_v11  ;;  %v9819_v31 = vld [vmem:[#allocation6 + $0x60] sm:$0xff]   ;;  %v8753_v28 = vld [vmem:[#allocation6 + $0x28] sm:$0xff]  }
 0x1fa   : > { %v3716_v43 = vshll.u32 %v3580_v26, 16  ;;  %v3722_v58 = vshll.u32 %v9803_v35, 16  ;;  %8180 = vmatprep.subr.bf16.mxu1 %v8741_v27  ;;  %v7324_v19 = vcombine.low %v3677_v57, %v3687_v8  ;;  %v3705_v41 = vor.u32 %v3704_v62, %v3700_v59  ;;  %11157 = vst [vmem:[#allocation16_spill] sm:$0xff] %v9819_v31  ;;  %v8805_v36 = vld [vmem:[#allocation2 + $0x24] sm:$0xf] }
 0x1fb   : > { %v3715_v6 = vrot.slane %v3713_v63, 4  ;;  %v3726_v48 = vshrl.u32 %v9803_v35, 16  ;;  %v3696_v17 = vrot.slane %v3695_v12, 4  ;;  %v3732_v61 = vshll.u32 %v9811_v3, 16  ;;  %v9824_v39 = vld [vmem:[#allocation2 + $0x28] sm:$0xf] }
 0x1fc   : > { %v3718_v49 = vrot.slane %v3716_v43, 5  ;;  %v3724_v29 = vrot.slane %v3722_v58, 5  ;;  %8150 = vmatprep.mubr.msk.bf16.mxu1 %vm2218_vm9, %v7324_v19  ;;  %8039 = vmatmul.mubr.msk.bf16.vlgmr.msra.gmra.mrb[32].mxu0 %vm2218_vm9, %v7205_v13  ;;  %v3706_v26 = vrot.slane %v3705_v41, 4  ;;  %v7207_v62 = vcombine.low %v8805_v36, %v9824_v39  ;;  %v9830_v58 = vld [vmem:[#allocation2 + $0x50] sm:$0x1] }
 0x1fd   : > { %v3728_v57 = vrot.slane %v3726_v48, 4  ;;  %v3737_v63 = vshrl.u32 %v3583_v16, 16  ;;  %v3701_v8 = vsel %vm9326_vm8, %v3696_v17, %v3700_v59  ;;  %8042 = vmatprep.mubr.msk.bf16.mxu0 %vm2218_vm9, %v7206_v46  ;;  %v3734_v43 = vrot.slane %v3732_v61, 5  ;;  %11158 = vst [vmem:[#allocation17_spill] sm:$0xff] %v9830_v58  ;;  %8181 = vmatpush3.bf16.msra.mxu1 %v8741_v27  ;;  %v3586_v36 = vld [vmem:[#allocation2 + $0x54] sm:$0xf] }
 0x1fe   : > { %v3719_v12 = vor.u32 %v3718_v49, %v3715_v6  ;;  %v3740_v19 = vshll.u32 %v3583_v16, 16  ;;  %v3711_v13 = vsel %vm9326_vm8, %v3706_v26, %v3710_v47  ;;  %v3746_v5 = vshll.u32 %v9817_v11, 16  ;;  %8214 = vmatprep.subr.bf16.mxu1 %v9819_v31  ;;  %8071 = vmatpush3.bf16.msra.mxu0 %v9613_v14  ;;  %v9838_v17 = vld [vmem:[#allocation2 + $0x58] sm:$0xf]  ;;  %v8807_v61 = vld [vmem:[#allocation2 + $0x30] sm:$0xf] }
 0x1ff   : > { %v3729_v41 = vor.u32 %v3728_v57, %v3724_v29  ;;  %v3739_v48 = vrot.slane %v3737_v63, 4  ;;  %v7325_v59 = vcombine.low %v3701_v8, %v3711_v13  ;;  %v3750_v6 = vshrl.u32 %v9817_v11, 16  ;;  %8072 = vmatprep.subr.bf16.mxu0 %v8753_v28  ;;  %v9841_v26 = vld [vmem:[#allocation2 + $0x34] sm:$0xf]  ;;  %v3589_v11 = vld [vmem:[#allocation2 + $0x60] sm:$0xf] }
 0x200   : > { %v3720_v46 = vrot.slane %v3719_v12, 4  ;;  %v3742_v49 = vrot.slane %v3740_v19, 5  ;;  %v3748_v16 = vrot.slane %v3746_v5, 5  ;;  %v3756_v47 = vshll.u32 %v9830_v58, 16  ;;  %11159 = vst [vmem:[#allocation18_spill] sm:$0xff] %v9841_v26  ;;  %v9852_v31 = vld [vmem:[#allocation6 + $0x30] sm:$0xff]  }
 0x201   : > { %v3730_v27 = vrot.slane %v3729_v41, 4  ;;  %v7208_v57 = vcombine.low %v8807_v61, %v9841_v26  ;;  %8151 = vmatmul.mubr.msk.bf16.gmra.mrb[28].mxu1 %vm2218_vm9, %v7325_v59  ;;  %v3752_v8 = vrot.slane %v3750_v6, 4  ;;  %v9847_v12 = vld [vmem:[#allocation2 + $0x5c] sm:$0x1]  ;;  %v3761_v19 = vshrl.u32 %v3586_v36, 16 }
 0x202   : > { %v3725_v14 = vsel %vm9326_vm8, %v3720_v46, %v3724_v29  ;;  %v3743_v63 = vor.u32 %v3742_v49, %v3739_v48  ;;  %v3758_v13 = vrot.slane %v3756_v47, 5  ;;  %v3764_v41 = vshll.u32 %v3586_v36, 16  ;;  %8073 = vmatpush3.bf16.msra.mxu0 %v8753_v28  ;;  %v9858_v46 = vld [vmem:[#allocation2 + $0x64] sm:$0xf]  ;;  %v8810_v6 = vld [vmem:[#allocation2 + $0x3c] sm:$0xf] }
 0x203   : > { %v3735_v5 = vsel %vm9326_vm8, %v3730_v27, %v3734_v43  ;;  %v3770_v58 = vshll.u32 %v9838_v17, 16  ;;  %v3753_v59 = vor.u32 %v3752_v8, %v3748_v16  ;;  %v3763_v3 = vrot.slane %v3761_v19, 4  ;;  %8106 = vmatprep.subr.bf16.mxu0 %v9852_v31 }
 0x204   : > { %v7326_v61 = vcombine.low %v3725_v14, %v3735_v5  ;;  %v3744_v26 = vrot.slane %v3743_v63, 4  ;;  %8043 = vmatmul.mubr.msk.bf16.gmra.mrb[36].mxu0 %vm2218_vm9, %v7207_v62  ;;  %v3766_v29 = vrot.slane %v3764_v41, 5  ;;  %v3774_v43 = vshrl.u32 %v9838_v17, 16  ;;  %v9865_v63 = vld [vmem:[#allocation2 + $0x68] sm:$0x1] }
 0x205   : > { %v3772_v48 = vrot.slane %v3770_v58, 5  ;;  %v3780_v36 = vshll.u32 %v9847_v12, 16  ;;  %v3754_v49 = vrot.slane %v3753_v59, 4  ;;  %8046 = vmatprep.mubr.msk.bf16.mxu0 %vm2218_vm9, %v7208_v57  ;;  %v7209_v27 = vcombine.low %v8810_v6, %v9575_v4  ;;  %v9871_v6 = vld [vmem:[#allocation2 + $0x70] sm:$0xf] }
 0x206   : > { %8154 = vmatprep.mubr.msk.bf16.mxu1 %vm2218_vm9, %v7326_v61  ;;  %v3749_v28 = vsel %vm9326_vm8, %v3744_v26, %v3748_v16  ;;  %v3785_v62 = vshrl.u32 %v3589_v11, 16  ;;  %v3767_v47 = vor.u32 %v3766_v29, %v3763_v3  ;;  %v3776_v58 = vrot.slane %v3774_v43, 4  ;;  %v3592_v26 = vld [vmem:[#allocation2 + $0x6c] sm:$0xf] }
 0x207   : > { %v3782_v14 = vrot.slane %v3780_v36, 5  ;;  %v3788_v8 = vshll.u32 %v3589_v11, 16  ;;  %v3759_v19 = vsel %vm9326_vm8, %v3754_v49, %v3758_v13  ;;  %v3794_v41 = vshll.u32 %v9858_v46, 16 }
 0x208   : > { %v3787_v5 = vrot.slane %v3785_v62, 4  ;;  %v3798_v16 = vshrl.u32 %v9858_v46, 16  ;;  %v7327_v57 = vcombine.low %v3749_v28, %v3759_v19  ;;  %v3768_v61 = vrot.slane %v3767_v47, 4 }
 0x209   : > { %v3777_v59 = vor.u32 %v3776_v58, %v3772_v48  ;;  %v3790_v4 = vrot.slane %v3788_v8, 5  ;;  %v3796_v3 = vrot.slane %v3794_v41, 5  ;;  %v3804_v43 = vshll.u32 %v9865_v63, 16  ;;  %v9879_v58 = vld [vmem:[#allocation2 + $0x74] sm:$0x1] }
 0x20a   : > { %v3800_v29 = vrot.slane %v3798_v16, 4  ;;  %v7210_v11 = vcombine.low %v9586_v55, %v9588_v56  ;;  %8155 = vmatmul.mubr.msk.bf16.gmra.mrb[0].mxu1 %vm2218_vm9, %v7327_v57  ;;  %v3773_v13 = vsel %vm9326_vm8, %v3768_v61, %v3772_v48  ;;  %v3809_v28 = vshrl.u32 %v3592_v26, 16  ;;  %v3595_v48 = vld [vmem:[#allocation2 + $0x78] sm:$0xf] }
 0x20b   : > { %v3778_v36 = vrot.slane %v3777_v59, 4  ;;  %v3791_v49 = vor.u32 %v3790_v4, %v3787_v5  ;;  %v3806_v47 = vrot.slane %v3804_v43, 5  ;;  %v3812_v8 = vshll.u32 %v3592_v26, 16  ;;  %v9887_v4 = vld [vmem:[#allocation2 + $0x7c] sm:$0xf] }
 0x20c   : > { %v3801_v62 = vor.u32 %v3800_v29, %v3796_v3  ;;  %v3818_v19 = vshll.u32 %v9871_v6, 16  ;;  %8047 = vmatmul.mubr.msk.bf16.gmra.mrb[40].mxu0 %vm2218_vm9, %v7209_v27  ;;  %v3811_v56 = vrot.slane %v3809_v28, 4  ;;  %v3822_v16 = vshrl.u32 %v9871_v6, 16 }
 0x20d   : > { %v3783_v41 = vsel %vm9326_vm8, %v3778_v36, %v3782_v14  ;;  %v3792_v55 = vrot.slane %v3791_v49, 4  ;;  %8050 = vmatprep.mubr.msk.bf16.mxu0 %vm2218_vm9, %v7210_v11  ;;  %v3814_v61 = vrot.slane %v3812_v8, 5  ;;  %v3828_v14 = vshll.u32 %v9879_v58, 16  ;;  %v9897_v11 = vld [vmem:[#allocation2 + $0x80] sm:$0x1] }
 0x20e   : > { %v7328_v57 = vcombine.low %v3773_v13, %v3783_v41  ;;  %v3802_v5 = vrot.slane %v3801_v62, 4  ;;  %v3820_v59 = vrot.slane %v3818_v19, 5  ;;  %v3824_v29 = vrot.slane %v3822_v16, 4  ;;  %v3598_v19 = vld [vmem:[#allocation2 + $0x84] sm:$0xf] }
 0x20f   : > { %v3797_v26 = vsel %vm9326_vm8, %v3792_v55, %v3796_v3  ;;  %v7211_v27 = vcombine.low %v9610_v60, %v9626_v2  ;;  %v3815_v13 = vor.u32 %v3814_v61, %v3811_v56  ;;  %v3833_v36 = vshrl.u32 %v3595_v48, 16  ;;  %v9901_v2 = vld [vmem:[#allocation2 + $0x88] sm:$0xf] }
 0x210   : > { %8158 = vmatprep.mubr.msk.bf16.mxu1 %vm2218_vm9, %v7328_v57  ;;  %v3807_v43 = vsel %vm9326_vm8, %v3802_v5, %v3806_v47  ;;  %v3836_v49 = vshll.u32 %v3595_v48, 16  ;;  %v3825_v62 = vor.u32 %v3824_v29, %v3820_v59  ;;  %v3830_v8 = vrot.slane %v3828_v14, 5  ;;  %v9909_v29 = vld [vmem:[#allocation2 + $0x8c] sm:$0x1] }
 0x211   : > { %v7329_v28 = vcombine.low %v3797_v26, %v3807_v43  ;;  %v3842_v3 = vshll.u32 %v9887_v4, 16  ;;  %v3816_v41 = vrot.slane %v3815_v13, 4  ;;  %v3835_v55 = vrot.slane %v3833_v36, 4 }
 0x212   : > { %v3838_v16 = vrot.slane %v3836_v49, 5  ;;  %v3846_v60 = vshrl.u32 %v9887_v4, 16  ;;  %v3826_v47 = vrot.slane %v3825_v62, 4  ;;  %v3852_v57 = vshll.u32 %v9897_v11, 16 }
 0x213   : > { %8159 = vmatmul.mubr.msk.bf16.gmra.mrb[4].mxu1 %vm2218_vm9, %v7329_v28  ;;  %v3844_v56 = vrot.slane %v3842_v3, 5  ;;  %v7212_v48 = vcombine.low %v9638_v30, %v9640_v32  ;;  %v3821_v5 = vsel %vm9326_vm8, %v3816_v41, %v3820_v59  ;;  %v3857_v14 = vshrl.u32 %v3598_v19, 16  ;;  %v3601_v28 = vld [vmem:[#allocation2 + $0x90] sm:$0xf] }
 0x214   : > { %v3839_v61 = vor.u32 %v3838_v16, %v3835_v55  ;;  %v3848_v26 = vrot.slane %v3846_v60, 4  ;;  %v3831_v43 = vsel %vm9326_vm8, %v3826_v47, %v3830_v8  ;;  %8051 = vmatmul.mubr.msk.bf16.gmra.mrb[44].mxu0 %vm2218_vm9, %v7211_v27  ;;  %v3854_v13 = vrot.slane %v3852_v57, 5  ;;  %v9918_v8 = vld [vmem:[#allocation2 + $0x94] sm:$0xf] }
 0x215   : > { %v3860_v36 = vshll.u32 %v3598_v19, 16  ;;  %v3866_v49 = vshll.u32 %v9901_v2, 16  ;;  %v7330_v62 = vcombine.low %v3821_v5, %v3831_v43  ;;  %8054 = vmatprep.mubr.msk.bf16.mxu0 %vm2218_vm9, %v7212_v48  ;;  %v3859_v59 = vrot.slane %v3857_v14, 4 }
 0x216   : > { %v3840_v30 = vrot.slane %v3839_v61, 4  ;;  %v3849_v32 = vor.u32 %v3848_v26, %v3844_v56  ;;  %v3870_v55 = vshrl.u32 %v9901_v2, 16  ;;  %v3876_v16 = vshll.u32 %v9909_v29, 16  ;;  %v9925_v61 = vld [vmem:[#allocation2 + $0x98] sm:$0x1] }
 0x217   : > { %v3862_v3 = vrot.slane %v3860_v36, 5  ;;  %v3868_v41 = vrot.slane %v3866_v49, 5  ;;  %8162 = vmatprep.mubr.msk.bf16.mxu1 %vm2218_vm9, %v7330_v62  ;;  %v7213_v60 = vcombine.low %v9652_v40, %v9657_v45  ;;  %v3881_v47 = vshrl.u32 %v3601_v28, 16  ;;  %v9931_v45 = vld [vmem:[#allocation2 + $0xa0] sm:$0xf] }
 0x218   : > { %v3845_v27 = vsel %vm9326_vm8, %v3840_v30, %v3844_v56  ;;  %v3850_v19 = vrot.slane %v3849_v32, 4  ;;  %v3872_v48 = vrot.slane %v3870_v55, 4  ;;  %v3878_v5 = vrot.slane %v3876_v16, 5  ;;  %v3604_v56 = vld [vmem:[#allocation2 + $0x9c] sm:$0xf] }
 0x219   : > { %v3863_v57 = vor.u32 %v3862_v3, %v3859_v59  ;;  %v3884_v26 = vshll.u32 %v3601_v28, 16  ;;  %v3883_v43 = vrot.slane %v3881_v47, 4  ;;  %v3890_v36 = vshll.u32 %v9918_v8, 16 }
 0x21a   : > { %v3855_v14 = vsel %vm9326_vm8, %v3850_v19, %v3854_v13  ;;  %v3894_v49 = vshrl.u32 %v9918_v8, 16  ;;  %v3873_v32 = vor.u32 %v3872_v48, %v3868_v41  ;;  %v3900_v55 = vshll.u32 %v9925_v61, 16  ;;  %v9941_v48 = vld [vmem:[#allocation2 + $0xa4] sm:$0x1] }
 0x21b   : > { %v7331_v62 = vcombine.low %v3845_v27, %v3855_v14  ;;  %v3864_v30 = vrot.slane %v3863_v57, 4  ;;  %v3886_v40 = vrot.slane %v3884_v26, 5  ;;  %v3892_v59 = vrot.slane %v3890_v36, 5 }
 0x21c   : > { %v3896_v3 = vrot.slane %v3894_v49, 4  ;;  %v7214_v28 = vcombine.low %v9660_v50, %v9669_v7  ;;  %v3874_v16 = vrot.slane %v3873_v32, 4  ;;  %8055 = vmatmul.mubr.msk.bf16.gmra.mrb[48].mxu0 %vm2218_vm9, %v7213_v60  ;;  %v3905_v19 = vshrl.u32 %v3604_v56, 16  ;;  %v3607_v49 = vld [vmem:[#allocation2 + $0xa8] sm:$0xf] }
 0x21d   : > { %8163 = vmatmul.mubr.msk.bf16.gmra.mrb[8].mxu1 %vm2218_vm9, %v7331_v62  ;;  %v3869_v13 = vsel %vm9326_vm8, %v3864_v30, %v3868_v41  ;;  %v3887_v27 = vor.u32 %v3886_v40, %v3883_v43  ;;  %v3902_v57 = vrot.slane %v3900_v55, 5  ;;  %v3908_v26 = vshll.u32 %v3604_v56, 16  ;;  %v9947_v32 = vld [vmem:[#allocation2 + $0xac] sm:$0xf] }
 0x21e   : > { %v3897_v47 = vor.u32 %v3896_v3, %v3892_v59  ;;  %8058 = vmatprep.mubr.msk.bf16.mxu0 %vm2218_vm9, %v7214_v28  ;;  %v3914_v14 = vshll.u32 %v9931_v45, 16  ;;  %v3879_v50 = vsel %vm9326_vm8, %v3874_v16, %v3878_v5  ;;  %v3907_v36 = vrot.slane %v3905_v19, 4 }
 0x21f   : > { %v3888_v7 = vrot.slane %v3887_v27, 4  ;;  %v3918_v41 = vshrl.u32 %v9931_v45, 16  ;;  %v7332_v60 = vcombine.low %v3869_v13, %v3879_v50  ;;  %v3910_v62 = vrot.slane %v3908_v26, 5  ;;  %v9957_v13 = vld [vmem:[#allocation2 + $0xb0] sm:$0x1] }
 0x220   : > { %v3898_v43 = vrot.slane %v3897_v47, 4  ;;  %v3916_v30 = vrot.slane %v3914_v14, 5  ;;  %v3924_v3 = vshll.u32 %v9941_v48, 16  ;;  %v7215_v5 = vcombine.low %v9678_v33, %v9683_v37  ;;  %v3610_v14 = vld [vmem:[#allocation2 + $0xb4] sm:$0xf] }
 0x221   : > { %v3893_v40 = vsel %vm9326_vm8, %v3888_v7, %v3892_v59  ;;  %v3920_v56 = vrot.slane %v3918_v41, 4  ;;  %8166 = vmatprep.mubr.msk.bf16.mxu1 %vm2218_vm9, %v7332_v60  ;;  %v3911_v28 = vor.u32 %v3910_v62, %v3907_v36  ;;  %v3929_v16 = vshrl.u32 %v3607_v49, 16  ;;  %v9961_v37 = vld [vmem:[#allocation2 + $0xb8] sm:$0xf] }
 0x222   : > { %v3903_v55 = vsel %vm9326_vm8, %v3898_v43, %v3902_v57  ;;  %v3932_v27 = vshll.u32 %v3607_v49, 16  ;;  %v3926_v26 = vrot.slane %v3924_v3, 5  ;;  %v3938_v59 = vshll.u32 %v9947_v32, 16 }
 0x223   : > { %v7333_v19 = vcombine.low %v3893_v40, %v3903_v55  ;;  %v3921_v47 = vor.u32 %v3920_v56, %v3916_v30  ;;  %v3912_v50 = vrot.slane %v3911_v28, 4  ;;  %v3931_v7 = vrot.slane %v3929_v16, 4  ;;  %v9973_v55 = vld [vmem:[#allocation2 + $0xbc] sm:$0x1]  ;;  %v3613_v16 = vld [vmem:[#allocation2 + $0xc0] sm:$0xf] }
 0x224   : > { %v3934_v41 = vrot.slane %v3932_v27, 5  ;;  %v3942_v33 = vshrl.u32 %v9947_v32, 16  ;;  %8059 = vmatmul.mubr.msk.bf16.gmra.mrb[52].mxu0 %vm2218_vm9, %v7215_v5  ;;  %v3940_v36 = vrot.slane %v3938_v59, 5  ;;  %v3948_v49 = vshll.u32 %v9957_v13, 16 }
 0x225   : > { %8167 = vmatmul.mubr.msk.bf16.gmra.mrb[12].mxu1 %vm2218_vm9, %v7333_v19  ;;  %v3922_v57 = vrot.slane %v3921_v47, 4  ;;  %v7216_v60 = vcombine.low %v9693_v54, %v9698_v0  ;;  %v3953_v40 = vshrl.u32 %v3610_v14, 16  ;;  %v3917_v56 = vsel %vm9326_vm8, %v3912_v50, %v3916_v30  ;;  %v9977_v50 = vld [vmem:[#allocation2 + $0xc4] sm:$0xf] }
 0x226   : > { %v3935_v43 = vor.u32 %v3934_v41, %v3931_v7  ;;  %v3944_v62 = vrot.slane %v3942_v33, 4  ;;  %v3956_v5 = vshll.u32 %v3610_v14, 16  ;;  %v3962_v28 = vshll.u32 %v9961_v37, 16 }
 0x227   : > { %v3927_v3 = vsel %vm9326_vm8, %v3922_v57, %v3926_v26  ;;  %8062 = vmatprep.mubr.msk.bf16.mxu0 %vm2218_vm9, %v7216_v60  ;;  %v3955_v0 = vrot.slane %v3953_v40, 4  ;;  %v3950_v47 = vrot.slane %v3948_v49, 5  ;;  %v3966_v30 = vshrl.u32 %v9961_v37, 16 }
 0x228   : > { %v7334_v27 = vcombine.low %v3917_v56, %v3927_v3  ;;  %v3936_v19 = vrot.slane %v3935_v43, 4  ;;  %v3945_v54 = vor.u32 %v3944_v62, %v3940_v36  ;;  %v3958_v59 = vrot.slane %v3956_v5, 5  ;;  %v9985_v43 = vld [vmem:[#allocation2 + $0xc8] sm:$0x1] }
 0x229   : > { %v3964_v7 = vrot.slane %v3962_v28, 5  ;;  %v3972_v41 = vshll.u32 %v9973_v55, 16  ;;  %v3977_v33 = vshrl.u32 %v3613_v16, 16  ;;  %v3968_v60 = vrot.slane %v3966_v30, 4  ;;  %v4306_v30 = vld [vmem:[#allocation2 + $0xc] sm:$0xe] }
 0x22a   : > { %8170 = vmatprep.mubr.msk.bf16.mxu1 %vm2218_vm9, %v7334_v27  ;;  %v3941_v26 = vsel %vm9326_vm8, %v3936_v19, %v3940_v36  ;;  %v3946_v14 = vrot.slane %v3945_v54, 4  ;;  %v3959_v57 = vor.u32 %v3958_v59, %v3955_v0  ;;  %v7217_v49 = vcombine.low %v9707_v22, %v9711_v20 }
 0x22b   : > { %v3980_v62 = vshll.u32 %v3613_v16, 16  ;;  %v3979_v56 = vrot.slane %v3977_v33, 4  ;;  %v3986_v3 = vshll.u32 %v9977_v50, 16  ;;  %v3990_v36 = vshrl.u32 %v9977_v50, 16 }
 0x22c   : > { %v3951_v40 = vsel %vm9326_vm8, %v3946_v14, %v3950_v47  ;;  %v3960_v28 = vrot.slane %v3959_v57, 4  ;;  %v3969_v27 = vor.u32 %v3968_v60, %v3964_v7  ;;  %8063 = vmatmul.mubr.msk.bf16.gmra.mrb[56].mxu0 %vm2218_vm9, %v7217_v49  ;;  %v3996_v22 = vshll.u32 %v9985_v43, 16 }
 0x22d   : > { %v7335_v5 = vcombine.low %v3941_v26, %v3951_v40  ;;  %v3982_v19 = vrot.slane %v3980_v62, 5  ;;  %v3988_v54 = vrot.slane %v3986_v3, 5  ;;  %v3992_v0 = vrot.slane %v3990_v36, 4  ;;  %v4307_v40 = vld [vmem:[#allocation2 + $0x18] sm:$0xe] }
 0x22e   : > { %v7218_v20 = vcombine.low %v9713_v34, %v9721_v42  ;;  %v3970_v16 = vrot.slane %v3969_v27, 4  ;;  %v3974_v47 = vrot.slane %v3972_v41, 5  ;;  %v3965_v14 = vsel %vm9326_vm8, %v3960_v28, %v3964_v7 }
 0x22f   : > { %8171 = vmatmul.mubr.msk.bf16.gmra.mrb[16].mxu1 %vm2218_vm9, %v7335_v5  ;;  %v3983_v59 = vor.u32 %v3982_v19, %v3979_v56  ;;  %v3993_v26 = vor.u32 %v3992_v0, %v3988_v54  ;;  %v4372_v42 = vrot.slane %v9734_v21, 5  ;;  %v3998_v49 = vrot.slane %v3996_v22, 5  ;;  %v4308_v5 = vld [vmem:[#allocation2 + $0x24] sm:$0xe] }
 0x230   : > { %8066 = vmatprep.mubr.msk.bf16.mxu0 %vm2218_vm9, %v7218_v20  ;;  %v3975_v33 = vsel %vm9326_vm8, %v3970_v16, %v3974_v47  ;;  %v7356_v62 = vrot.slane %v4306_v30, 9  ;;  %v4375_v3 = vrot.slane %v9737_v24, 5  ;;  %v7219_v7 = vcombine.low %v9743_v10, %v9745_v1  ;;  %v2729_v24 = vld [vmem:[#allocation2] sm:$0xe]  ;;  %v2730_v47 = vld [vmem:[#allocation2 + $0xc] sm:$0xe] }
 0x231   : > { %v3984_v57 = vrot.slane %v3983_v59, 4  ;;  %v7336_v41 = vcombine.low %v3965_v14, %v3975_v33  ;;  %v3994_v60 = vrot.slane %v3993_v26, 4  ;;  %v4374_v56 = vrot.slane %v4372_v42, 4  ;;  %v8811_v26 = vld [vmem:[#allocation2 + $0x8] sm:$0x1] }
 0x232   : > { %v4379_v36 = vrot.slane %v9755_v18, 5  ;;  %v4373_v27 = vsel %vm10001_vm15, %v7356_v62, %v4372_v42  ;;  %v4386_v19 = vrot.slane %v9766_v53, 5  ;;  %v4382_v18 = vrot.slane %v9762_v52, 5 }
 0x233   : > { %8174 = vmatprep.mubr.msk.bf16.mxu1 %vm2218_vm9, %v7336_v41  ;;  %v3989_v28 = vsel %vm9326_vm8, %v3984_v57, %v3988_v54  ;;  %v3999_v21 = vsel %vm9326_vm8, %v3994_v60, %v3998_v49  ;;  %v4376_v10 = vsel %vm10001_vm15, %v4374_v56, %v4375_v3  ;;  %v7357_v54 = vrot.slane %v4307_v40, 9  ;;  %v4309_v41 = vld [vmem:[#allocation2 + $0x30] sm:$0xe]  ;;  %v8812_v3 = vld [vmem:[#allocation2 + $0x14] sm:$0x1] }
 0x234   : > { %v7337_v0 = vcombine.low %v3989_v28, %v3999_v21  ;;  %8067 = vmatmul.mubr.msk.bf16.gmra.mrb[60].mxu0 %vm2218_vm9, %v7219_v7  ;;  %v4381_v1 = vrot.slane %v4379_v36, 4  ;;  %v7372_v22 = vcombine.low %v4373_v27, %v4376_v10  ;;  %v7358_v20 = vrot.slane %v4308_v5, 9  ;;  %v2731_v5 = vld [vmem:[#allocation2 + $0x18] sm:$0xe]  ;;  %v4310_v10 = vld [vmem:[#allocation2 + $0x3c] sm:$0xe] }
 0x235   : > { %v4388_v16 = vrot.slane %v4386_v19, 4  ;;  %v7238_v59 = vrot.slane %v2729_v24, 9  ;;  %v2782_v30 = vrot.slane %v9788_v51, 5  ;;  %v2785_v14 = vrot.slane %v8811_v26, 5 }
 0x236   : > { %v4383_v53 = vsel %vm10001_vm15, %v4381_v1, %v4382_v18  ;;  %v4380_v52 = vsel %vm10001_vm15, %v7357_v54, %v4379_v36  ;;  %v4387_v33 = vsel %vm10001_vm15, %v7358_v20, %v4386_v19  ;;  %v4389_v57 = vrot.slane %v9774_v15, 5  ;;  %v2732_v20 = vld [vmem:[#allocation2 + $0x24] sm:$0xe] }
 0x237   : > { %8175 = vmatmul.mubr.msk.bf16.gmra.mrb[20].mxu1 %vm2218_vm9, %v7337_v0  ;;  %v2789_v42 = vrot.slane %v9796_v9, 5  ;;  %v7373_v60 = vcombine.low %v4380_v52, %v4383_v53  ;;  %v2783_v49 = vsel %vm10001_vm15, %v7238_v59, %v2782_v30  ;;  %v2784_v51 = vrot.slane %v2782_v30, 4  ;;  %v11162_v52 = vld [vmem:[#allocation16_spill] sm:$0xff] }
 0x238   : > { %8182 = vmatprep.mubr.msk.bf16.mxu1 %vm2218_vm9, %v7372_v22  ;;  %v7239_v62 = vrot.slane %v2730_v47, 9  ;;  %v4390_v40 = vsel %vm10001_vm15, %v4388_v16, %v4389_v57  ;;  %v2792_v7 = vrot.slane %v8812_v3, 5  ;;  %v4393_v36 = vrot.slane %v9784_v38, 5  ;;  %v8813_v22 = vld [vmem:[#allocation2 + $0x20] sm:$0x1] }
 0x239   : > { %v2791_v56 = vrot.slane %v2789_v42, 4  ;;  %v2786_v15 = vsel %vm10001_vm15, %v2784_v51, %v2785_v14  ;;  %v7359_v28 = vrot.slane %v4309_v41, 9  ;;  %v2796_v21 = vrot.slane %v9808_v23, 5  ;;  %v8754_v16 = vld [vmem:[#allocation6 + $0x68] sm:$0xff]  }
 0x23a   : > { %v2790_v9 = vsel %vm10001_vm15, %v7239_v62, %v2789_v42  ;;  %v7254_v27 = vcombine.low %v2783_v49, %v2786_v15  ;;  %v4395_v24 = vrot.slane %v4393_v36, 4  ;;  %v4396_v0 = vrot.slane %v9786_v44, 5  ;;  %v8814_v62 = vld [vmem:[#allocation2 + $0x2c] sm:$0x1] }
 0x23b   : > { %v2793_v19 = vsel %vm10001_vm15, %v2791_v56, %v2792_v7  ;;  %v7240_v38 = vrot.slane %v2731_v5, 9  ;;  %v2798_v18 = vrot.slane %v2796_v21, 4  ;;  %v2799_v54 = vrot.slane %v8813_v22, 5  ;;  %v11164_v56 = vld [vmem:[#allocation15_spill] sm:$0xff]  ;;  %v2733_v7 = vld [vmem:[#allocation2 + $0x30] sm:$0xe] }
 0x23c   : > { %v7255_v1 = vcombine.low %v2790_v9, %v2793_v19  ;;  %v7374_v47 = vcombine.low %v4387_v33, %v4390_v40  ;;  %8074 = vmatprep.mubr.msk.bf16.mxu0 %vm2218_vm9, %v7254_v27  ;;  %v4394_v23 = vsel %vm10001_vm15, %v7359_v28, %v4393_v36  ;;  %v4397_v53 = vsel %vm10001_vm15, %v4395_v24, %v4396_v0  ;;  %v10063_v36 = vld [vmem:[#allocation6 + $0x70] sm:$0xff]   ;;  %v11165_v9 = vld [vmem:[#allocation18_spill] sm:$0xff]  ;;  %v11166_v24 = vld [vmem:[#allocation17_spill] sm:$0xff] }
 0x23d   : > { %v4400_v59 = vrot.slane %v9803_v35, 5  ;;  %v2797_v44 = vsel %vm10001_vm15, %v7240_v38, %v2796_v21  ;;  %v2800_v30 = vsel %vm10001_vm15, %v2798_v18, %v2799_v54  ;;  %v7360_v26 = vrot.slane %v4310_v10, 9  ;;  %v11163_v35 = vld [vmem:[#allocation14_spill] sm:$0xff]  ;;  %v8815_v21 = vld [vmem:[#allocation6 + $0x38] sm:$0xff]  }
 0x23e   : > { %8075 = vmatmul.mubr.msk.bf16.vlgmr.msra.gmra.mrb[32].mxu0 %vm2218_vm9, %v7255_v1  ;;  %v2803_v14 = vrot.slane %v9824_v39, 5  ;;  %v7256_v33 = vcombine.low %v2797_v44, %v2800_v30  ;;  %v4403_v42 = vrot.slane %v11163_v35, 5  ;;  %v7241_v41 = vrot.slane %v2732_v20, 9  ;;  %v4312_v10 = vld [vmem:[#allocation2 + $0x54] sm:$0xe] }
 0x23f   : > { %8183 = vmatmul.mubr.msk.bf16.vlgmr.msra.gmra.mrb[24].mxu1 %vm2218_vm9, %v7373_v60  ;;  %v4402_v57 = vrot.slane %v4400_v59, 4  ;;  %v4311_v60 = vld [vmem:[#allocation2 + $0x48] sm:$0xe]  ;;  %v7375_v49 = vcombine.low %v4394_v23, %v4397_v53  ;;  %v2806_v40 = vrot.slane %v8814_v62, 5  ;;  %v4407_v3 = vrot.slane %v11164_v56, 5  ;;  %8107 = vmatpush3.bf16.msra.mxu0 %v9852_v31 }
 0x240   : > { %8215 = vmatpush3.bf16.msra.mxu1 %v11162_v52  ;;  %8186 = vmatprep.mubr.msk.bf16.mxu1 %vm2218_vm9, %v7374_v47  ;;  %v2805_v51 = vrot.slane %v2803_v14, 4  ;;  %v4401_v39 = vsel %vm10001_vm15, %v7360_v26, %v4400_v59  ;;  %v2804_v15 = vsel %vm10001_vm15, %v7241_v41, %v2803_v14  ;;  %v2810_v28 = vrot.slane %v11165_v9, 5  ;;  %v8816_v22 = vld [vmem:[#allocation2 + $0x38] sm:$0x1]  ;;  %v2734_v20 = vld [vmem:[#allocation2 + $0x3c] sm:$0xe] }
 0x241   : > { %8216 = vmatprep.subr.bf16.mxu1 %v8754_v16  ;;  %8078 = vmatprep.mubr.msk.bf16.mxu0 %vm2218_vm9, %v7256_v33  ;;  %v4404_v5 = vsel %vm10001_vm15, %v4402_v57, %v4403_v42  ;;  %v7361_v19 = vrot.slane %v4311_v60, 9  ;;  %v4409_v31 = vrot.slane %v4407_v3, 4  ;;  %v4410_v0 = vrot.slane %v11166_v24, 5  ;;  %v4313_v35 = vld [vmem:[#allocation2 + $0x60] sm:$0xe] }
 0x242   : > { %8108 = vmatprep.subr.bf16.mxu0 %v8815_v21  ;;  %v2807_v27 = vsel %vm10001_vm15, %v2805_v51, %v2806_v40  ;;  %v7376_v1 = vcombine.low %v4401_v39, %v4404_v5  ;;  %v7242_v38 = vrot.slane %v2733_v7, 9  ;;  %v2812_v18 = vrot.slane %v2810_v28, 4  ;;  %v8818_v60 = vld [vmem:[#allocation2 + $0x44] sm:$0x1]  ;;  %v2735_v40 = vld [vmem:[#allocation2 + $0x48] sm:$0xe] }
 0x243   : > { %v2813_v54 = vrot.slane %v8816_v22, 5  ;;  %v7257_v47 = vcombine.low %v2804_v15, %v2807_v27  ;;  %v4408_v23 = vsel %vm10001_vm15, %v7361_v19, %v4407_v3  ;;  %v4411_v53 = vsel %vm10001_vm15, %v4409_v31, %v4410_v0  ;;  %8109 = vmatpush3.bf16.msra.mxu0 %v8815_v21  ;;  %v8819_v3 = vld [vmem:[#allocation2 + $0x4c] sm:$0xf]  ;;  %v8820_v27 = vld [vmem:[#allocation2 + $0x50] sm:$0x1] }
 0x244   : > { %8217 = vmatpush3.bf16.msra.mxu1 %v8754_v16  ;;  %v4414_v59 = vrot.slane %v9838_v17, 5  ;;  %v2811_v44 = vsel %vm10001_vm15, %v7242_v38, %v2810_v28  ;;  %v7362_v26 = vrot.slane %v4312_v10, 9  ;;  %v8817_v16 = vld [vmem:[#allocation2 + $0x40] sm:$0xf]  ;;  %v4417_v17 = vrot.slane %v9847_v12, 5 }
 0x245   : > { %8250 = vmatprep.subr.bf16.mxu1 %v10063_v36  ;;  %v2814_v30 = vsel %vm10001_vm15, %v2812_v18, %v2813_v54  ;;  %v2817_v14 = vrot.slane %v8817_v16, 5  ;;  %v7243_v57 = vrot.slane %v2734_v20, 9  ;;  %v7377_v42 = vcombine.low %v4408_v23, %v4411_v53  ;;  %v4314_v31 = vld [vmem:[#allocation2 + $0x6c] sm:$0xe]  ;;  %v2736_v38 = vld [vmem:[#allocation2 + $0x54] sm:$0xe] }
 0x246   : > { %8079 = vmatmul.mubr.msk.bf16.gmra.mrb[36].mxu0 %vm2218_vm9, %v7257_v47  ;;  %v7258_v52 = vcombine.low %v2811_v44, %v2814_v30  ;;  %v4416_v33 = vrot.slane %v4414_v59, 4  ;;  %v2820_v51 = vrot.slane %v8818_v60, 5  ;;  %v4421_v62 = vrot.slane %v9858_v46, 5  ;;  %v8821_v54 = vld [vmem:[#allocation2 + $0x58] sm:$0xf] }
 0x247   : > { %8187 = vmatmul.mubr.msk.bf16.gmra.mrb[28].mxu1 %vm2218_vm9, %v7375_v49  ;;  %v2819_v41 = vrot.slane %v2817_v14, 4  ;;  %v4415_v49 = vsel %vm10001_vm15, %v7362_v26, %v4414_v59  ;;  %v2818_v12 = vsel %vm10001_vm15, %v7243_v57, %v2817_v14  ;;  %v2824_v7 = vrot.slane %v8819_v3, 5  ;;  %v4315_v47 = vld [vmem:[#allocation2 + $0x78] sm:$0xe]  ;;  %v8822_v26 = vld [vmem:[#allocation2 + $0x5c] sm:$0x1] }
 0x248   : > { %8190 = vmatprep.mubr.msk.bf16.mxu1 %vm2218_vm9, %v7376_v1  ;;  %8082 = vmatprep.mubr.msk.bf16.mxu0 %vm2218_vm9, %v7258_v52  ;;  %v4418_v56 = vsel %vm10001_vm15, %v4416_v33, %v4417_v17  ;;  %v7363_v5 = vrot.slane %v4313_v35, 9  ;;  %v4423_v15 = vrot.slane %v4421_v62, 4  ;;  %v4424_v46 = vrot.slane %v9865_v63, 5  ;;  %v2737_v17 = vld [vmem:[#allocation2 + $0x60] sm:$0xe] }
 0x249   : > { %v2821_v39 = vsel %vm10001_vm15, %v2819_v41, %v2820_v51  ;;  %v7378_v9 = vcombine.low %v4415_v49, %v4418_v56  ;;  %v7244_v28 = vrot.slane %v2735_v40, 9  ;;  %v2826_v21 = vrot.slane %v2824_v7, 4  ;;  %v8823_v57 = vld [vmem:[#allocation2 + $0x64] sm:$0xf]  ;;  %v8824_v40 = vld [vmem:[#allocation2 + $0x68] sm:$0x1] }
 0x24a   : > { %v2827_v19 = vrot.slane %v8820_v27, 5  ;;  %v7259_v24 = vcombine.low %v2818_v12, %v2821_v39  ;;  %v4422_v0 = vsel %vm10001_vm15, %v7363_v5, %v4421_v62  ;;  %v4425_v10 = vsel %vm10001_vm15, %v4423_v15, %v4424_v46  ;;  %v4316_v56 = vld [vmem:[#allocation2 + $0x84] sm:$0xe]  ;;  %v8825_v46 = vld [vmem:[#allocation2 + $0x70] sm:$0xf] }
 0x24b   : > { %v4428_v1 = vrot.slane %v9871_v6, 5  ;;  %v7379_v18 = vcombine.low %v4422_v0, %v4425_v10  ;;  %v2825_v63 = vsel %vm10001_vm15, %v7244_v28, %v2824_v7  ;;  %v2831_v20 = vrot.slane %v8821_v54, 5  ;;  %v2738_v0 = vld [vmem:[#allocation2 + $0x6c] sm:$0xe] }
 0x24c   : > { %v2828_v22 = vsel %vm10001_vm15, %v2826_v21, %v2827_v19  ;;  %v7364_v53 = vrot.slane %v4314_v31, 9  ;;  %v4431_v44 = vrot.slane %v9879_v58, 5  ;;  %v7245_v6 = vrot.slane %v2736_v38, 9  ;;  %v4317_v31 = vld [vmem:[#allocation2 + $0x90] sm:$0xe] }
 0x24d   : > { %v7260_v23 = vcombine.low %v2825_v63, %v2828_v22  ;;  %v4430_v59 = vrot.slane %v4428_v1, 4  ;;  %v2833_v30 = vrot.slane %v2831_v20, 4  ;;  %v2834_v16 = vrot.slane %v8822_v26, 5  ;;  %v8826_v22 = vld [vmem:[#allocation2 + $0x74] sm:$0x1] }
 0x24e   : > { %8083 = vmatmul.mubr.msk.bf16.gmra.mrb[40].mxu0 %vm2218_vm9, %v7259_v24  ;;  %v4435_v14 = vrot.slane %v9887_v4, 5  ;;  %v4429_v52 = vsel %vm10001_vm15, %v7364_v53, %v4428_v1  ;;  %v7365_v33 = vrot.slane %v4315_v47, 9  ;;  %v2838_v35 = vrot.slane %v8823_v57, 5  ;;  %v2739_v1 = vld [vmem:[#allocation2 + $0x78] sm:$0xe] }
 0x24f   : > { %8191 = vmatmul.mubr.msk.bf16.gmra.mrb[0].mxu1 %vm2218_vm9, %v7377_v42  ;;  %8086 = vmatprep.mubr.msk.bf16.mxu0 %vm2218_vm9, %v7260_v23  ;;  %v4432_v58 = vsel %vm10001_vm15, %v4430_v59, %v4431_v44  ;;  %v2835_v41 = vsel %vm10001_vm15, %v2833_v30, %v2834_v16  ;;  %v4438_v4 = vrot.slane %v9897_v11, 5  ;;  %v2832_v51 = vsel %vm10001_vm15, %v7245_v6, %v2831_v20  ;;  %v8828_v6 = vld [vmem:[#allocation2 + $0x80] sm:$0x1]  ;;  %v4318_v26 = vld [vmem:[#allocation2 + $0x9c] sm:$0xe] }
 0x250   : > { %8194 = vmatprep.mubr.msk.bf16.mxu1 %vm2218_vm9, %v7378_v9  ;;  %v7380_v42 = vcombine.low %v4429_v52, %v4432_v58  ;;  %v4437_v60 = vrot.slane %v4435_v14, 4  ;;  %v2840_v62 = vrot.slane %v2838_v35, 4  ;;  %v2841_v49 = vrot.slane %v8824_v40, 5  ;;  %v8829_v57 = vld [vmem:[#allocation2 + $0x88] sm:$0xf] }
 0x251   : > { %v10128_v12 = vsel %vm10001_vm15, %v7365_v33, %v4435_v14  ;;  %v7246_v7 = vrot.slane %v2737_v17, 9  ;;  %v4442_v39 = vrot.slane %v9901_v2, 5  ;;  %v7261_v5 = vcombine.low %v2832_v51, %v2835_v41  ;;  %v4319_v51 = vld [vmem:[#allocation2 + $0xa8] sm:$0xe] }
 0x252   : > { %v10132_v3 = vsel %vm10001_vm15, %v4437_v60, %v4438_v4  ;;  %v2842_v15 = vsel %vm10001_vm15, %v2840_v62, %v2841_v49  ;;  %v2845_v9 = vrot.slane %v8825_v46, 5  ;;  %v7366_v21 = vrot.slane %v4316_v56, 9 }
 0x253   : > { %v7381_v11 = vcombine.low %v10128_v12, %v10132_v3  ;;  %v2839_v28 = vsel %vm10001_vm15, %v7246_v7, %v2838_v35  ;;  %v4444_v27 = vrot.slane %v4442_v39, 4  ;;  %v4445_v19 = vrot.slane %v9909_v29, 5  ;;  %v8827_v29 = vld [vmem:[#allocation2 + $0x7c] sm:$0xf]  ;;  %v2740_v12 = vld [vmem:[#allocation2 + $0x84] sm:$0xe] }
 0x254   : > { %v7262_v24 = vcombine.low %v2839_v28, %v2842_v15  ;;  %v2847_v2 = vrot.slane %v2845_v9, 4  ;;  %v4449_v10 = vrot.slane %v9918_v8, 5  ;;  %v4443_v38 = vsel %vm10001_vm15, %v7366_v21, %v4442_v39  ;;  %v2741_v7 = vld [vmem:[#allocation2 + $0x90] sm:$0xe]  ;;  %v8830_v39 = vld [vmem:[#allocation2 + $0x94] sm:$0xf] }
 0x255   : > { %v4446_v63 = vsel %vm10001_vm15, %v4444_v27, %v4445_v19  ;;  %v2848_v54 = vrot.slane %v8826_v22, 5  ;;  %v2852_v20 = vrot.slane %v8827_v29, 5  ;;  %v7367_v47 = vrot.slane %v4317_v31, 9  ;;  %v8832_v27 = vld [vmem:[#allocation2 + $0x98] sm:$0x1] }
 0x256   : > { %8087 = vmatmul.mubr.msk.bf16.gmra.mrb[44].mxu0 %vm2218_vm9, %v7261_v5  ;;  %v7382_v8 = vcombine.low %v4443_v38, %v4446_v63  ;;  %v4451_v23 = vrot.slane %v4449_v10, 4  ;;  %v7247_v53 = vrot.slane %v2738_v0, 9  ;;  %v7248_v59 = vrot.slane %v2739_v1, 9  ;;  %v8833_v1 = vld [vmem:[#allocation2 + $0xa0] sm:$0xf] }
 0x257   : > { %8195 = vmatmul.mubr.msk.bf16.gmra.mrb[4].mxu1 %vm2218_vm9, %v7379_v18  ;;  %8090 = vmatprep.mubr.msk.bf16.mxu0 %vm2218_vm9, %v7262_v24  ;;  %v4452_v18 = vrot.slane %v9925_v61, 5  ;;  %v2854_v44 = vrot.slane %v2852_v20, 4  ;;  %v2855_v30 = vrot.slane %v8828_v6, 5  ;;  %v2849_v16 = vsel %vm10001_vm15, %v2847_v2, %v2848_v54  ;;  %v4321_v22 = vld [vmem:[#allocation2 + $0xc0] sm:$0xe] }
 0x258   : > { %8198 = vmatprep.mubr.msk.bf16.mxu1 %vm2218_vm9, %v7380_v42  ;;  %v4450_v14 = vsel %vm10001_vm15, %v7367_v47, %v4449_v10  ;;  %v4456_v58 = vrot.slane %v9931_v45, 5  ;;  %v2846_v61 = vsel %vm10001_vm15, %v7247_v53, %v2845_v9  ;;  %v2859_v35 = vrot.slane %v8829_v57, 5  ;;  %v8831_v9 = vld [vmem:[#allocation2 + $0x8c] sm:$0x1]  ;;  %v8836_v57 = vld [vmem:[#allocation2 + $0xb0] sm:$0x1] }
 0x259   : > { %v4453_v52 = vsel %vm10001_vm15, %v4451_v23, %v4452_v18  ;;  %v2856_v17 = vsel %vm10001_vm15, %v2854_v44, %v2855_v30  ;;  %v2853_v42 = vsel %vm10001_vm15, %v7248_v59, %v2852_v20  ;;  %v7368_v41 = vrot.slane %v4318_v26, 9  ;;  %v8834_v23 = vld [vmem:[#allocation2 + $0xac] sm:$0xf]  ;;  %v2742_v26 = vld [vmem:[#allocation2 + $0x9c] sm:$0xe] }
 0x25a   : > { %v7383_v33 = vcombine.low %v4450_v14, %v4453_v52  ;;  %v4458_v60 = vrot.slane %v4456_v58, 4  ;;  %v4459_v4 = vrot.slane %v9941_v48, 5  ;;  %v7263_v62 = vcombine.low %v2846_v61, %v2849_v16  ;;  %v383_v30 = vld [vmem:[#allocation2 + $0xcc] sm:$0x1]  ;;  %v8835_v14 = vld [vmem:[#allocation2 + $0xa4] sm:$0x1] }
 0x25b   : > { %v7264_v40 = vcombine.low %v2853_v42, %v2856_v17  ;;  %v4463_v45 = vrot.slane %v9947_v32, 5  ;;  %v4457_v49 = vsel %vm10001_vm15, %v7368_v41, %v4456_v58  ;;  %v2861_v3 = vrot.slane %v2859_v35, 4  ;;  %v2743_v61 = vld [vmem:[#allocation2 + $0xa8] sm:$0xe] }
 0x25c   : > { %v4460_v56 = vsel %vm10001_vm15, %v4458_v60, %v4459_v4  ;;  %v2866_v5 = vrot.slane %v8830_v39, 5  ;;  %v7369_v15 = vrot.slane %v4319_v51, 9  ;;  %v4466_v32 = vrot.slane %v9957_v13, 5  ;;  %v8837_v51 = vld [vmem:[#allocation2 + $0xb8] sm:$0xf] }
 0x25d   : > { %v7384_v48 = vcombine.low %v4457_v49, %v4460_v56  ;;  %v4465_v46 = vrot.slane %v4463_v45, 4  ;;  %v2862_v28 = vrot.slane %v8831_v9, 5  ;;  %v2869_v19 = vrot.slane %v8832_v27, 5 }
 0x25e   : > { %8091 = vmatmul.mubr.msk.bf16.gmra.mrb[48].mxu0 %vm2218_vm9, %v7263_v62  ;;  %v2868_v21 = vrot.slane %v2866_v5, 4  ;;  %v7249_v31 = vrot.slane %v2740_v12, 9  ;;  %v7250_v0 = vrot.slane %v2741_v7, 9  ;;  %v2873_v38 = vrot.slane %v8833_v1, 5  ;;  %v5159_v1 = vld [vmem:[#allocation2 + $0x18] sm:$0xf] }
 0x25f   : > { %8199 = vmatmul.mubr.msk.bf16.gmra.mrb[8].mxu1 %vm2218_vm9, %v7381_v11  ;;  %8094 = vmatprep.mubr.msk.bf16.mxu0 %vm2218_vm9, %v7264_v40  ;;  %v4464_v11 = vsel %vm10001_vm15, %v7369_v15, %v4463_v45  ;;  %v4467_v24 = vsel %vm10001_vm15, %v4465_v46, %v4466_v32  ;;  %v2863_v13 = vsel %vm10001_vm15, %v2861_v3, %v2862_v28  ;;  %v4470_v63 = vrot.slane %v9961_v37, 5  ;;  %v2744_v46 = vld [vmem:[#allocation2 + $0xb4] sm:$0xe]  ;;  %v8838_v32 = vld [vmem:[#allocation2 + $0xbc] sm:$0x1] }
 0x260   : > { %8202 = vmatprep.mubr.msk.bf16.mxu1 %vm2218_vm9, %v7382_v8  ;;  %v7385_v2 = vcombine.low %v4464_v11, %v4467_v24  ;;  %v2870_v10 = vsel %vm10001_vm15, %v2868_v21, %v2869_v19  ;;  %v2860_v54 = vsel %vm10001_vm15, %v7249_v31, %v2859_v35  ;;  %v2867_v29 = vsel %vm10001_vm15, %v7250_v0, %v2866_v5  ;;  %v8755_v31 = vld [vmem:[#allocation2 + $0x18] sm:$0xff]   ;;  %v8758_v11 = vld [vmem:[#allocation2 + $0xc] sm:$0xff]   ;;  %v8757_v24 = vld [vmem:[#allocation2 + $0x24] sm:$0xff]  }
 0x261   : > { %v4477_v20 = vrot.slane %v9977_v50, 5  ;;  %v7265_v8 = vcombine.low %v2860_v54, %v2863_v13  ;;  %v7266_v47 = vcombine.low %v2867_v29, %v2870_v10  ;;  %v2880_v18 = vrot.slane %v8834_v23, 5  ;;  %v4320_v50 = vld [vmem:[#allocation2 + $0xb4] sm:$0xe]  ;;  %v8760_v0 = vld [vmem:[#allocation2 + $0x18] sm:$0xff]   ;;  %v8762_v10 = vld [vmem:[#allocation2 + $0x24] sm:$0xff]  }
 0x262   : > { %v2875_v53 = vrot.slane %v2873_v38, 4  ;;  %v7371_v59 = vrot.slane %v4321_v22, 9  ;;  %v4480_v6 = vrot.slane %v9985_v43, 5  ;;  %v4472_v37 = vrot.slane %v4470_v63, 4  ;;  %v8769_v13 = vld [vmem:[#allocation6 + $0x78] sm:$0xff]   ;;  %v8761_v29 = vld [vmem:[#allocation2 + $0x3c] sm:$0xff]  }
 0x263   : > { %v4479_v44 = vrot.slane %v4477_v20, 4  ;;  %v2882_v16 = vrot.slane %v2880_v18, 4  ;;  %v2876_v52 = vrot.slane %v8835_v14, 5  ;;  %v2883_v35 = vrot.slane %v8836_v57, 5  ;;  %v8763_v23 = vld [vmem:[#allocation2 + $0x48] sm:$0xff]  }
 0x264   : > { %v4478_v58 = vsel %vm10001_vm15, %v7371_v59, %v4477_v20  ;;  %v384_v41 = vsel %vm9238_vm2, 0, %v383_v30  ;;  %v7251_v60 = vrot.slane %v2742_v26, 9  ;;  %v2887_v62 = vrot.slane %v8837_v51, 5  ;;  %v8764_v20 = vld [vmem:[#allocation2 + $0x30] sm:$0xff]   ;;  %v10255_v57 = vld [vmem:[#allocation2 + $0x2c] sm:$0x1] }
 0x265   : > { %v4481_v43 = vsel %vm10001_vm15, %v4479_v44, %v4480_v6  ;;  %v2877_v4 = vsel %vm10001_vm15, %v2875_v53, %v2876_v52  ;;  %385 = vst [vmem:[#allocation2 + $0xcc] sm:$0x1] %v384_v41  ;;  %v7370_v40 = vrot.slane %v4320_v50, 9  ;;  %v7252_v49 = vrot.slane %v2743_v61, 9  ;;  %v10245_v6 = vld [vmem:[#allocation2 + $0x20] sm:$0x1] }
 0x266   : > { %8095 = vmatmul.mubr.msk.bf16.gmra.mrb[52].mxu0 %vm2218_vm9, %v7265_v8  ;;  %v7387_v17 = vcombine.low %v4478_v58, %v4481_v43  ;;  %v11168_v56 = vmov 0   ;;  %v2874_v12 = vsel %vm10001_vm15, %v7251_v60, %v2873_v38  ;;  %v2889_v15 = vrot.slane %v2887_v62, 4  ;;  %v10233_v38 = vld [vmem:[#allocation6 + $0x80] sm:$0xff]   ;;  %v5165_v14 = vld [vmem:[#allocation2 + $0x30] sm:$0xf]  ;;  %v8766_v60 = vld [vmem:[#allocation2 + $0x60] sm:$0xff]  }
 0x267   : > { %8203 = vmatmul.mubr.msk.bf16.gmra.mrb[12].mxu1 %vm2218_vm9, %v7383_v33  ;;  %8098 = vmatprep.mubr.msk.bf16.mxu0 %vm2218_vm9, %v7266_v47  ;;  %v4473_v33 = vrot.slane %v9973_v55, 5  ;;  %v2884_v55 = vsel %vm10001_vm15, %v2882_v16, %v2883_v35  ;;  %1546 = vst.msk [vmem:[#allocation2 + $0xcc] sm:$0xf] %vm1256_vm5, %v11168_v56  ;;  %v4471_v3 = vsel %vm10001_vm15, %v7370_v40, %v4470_v63  ;;  %v2890_v9 = vrot.slane %v8838_v32, 5  ;;  %v10235_v63 = vld [vmem:[#allocation2 + $0x1c] sm:$0xf] }
 0x268   : > { %8206 = vmatprep.mubr.msk.bf16.mxu1 %vm2218_vm9, %v7384_v48  ;;  %v7267_v7 = vcombine.low %v2874_v12, %v2877_v4  ;;  %v2881_v39 = vsel %vm10001_vm15, %v7252_v49, %v2880_v18  ;;  %v7253_v28 = vrot.slane %v2744_v46, 9  ;;  %v5208_v22 = vshrl.u32 %v5159_v1, 16  ;;  %v10240_v18 = vld [vmem:[#allocation2 + $0x28] sm:$0xf]  ;;  %v10251_v52 = vld [vmem:[#allocation2 + $0x34] sm:$0xf] }
 0x269   : > { %v4474_v45 = vsel %vm10001_vm15, %v4472_v37, %v4473_v33  ;;  %v7268_v48 = vcombine.low %v2881_v39, %v2884_v55  ;;  %v2891_v21 = vsel %vm10001_vm15, %v2889_v15, %v2890_v9  ;;  %v5211_v54 = vshll.u32 %v5159_v1, 16  ;;  %v8765_v33 = vld [vmem:[#allocation2 + $0x54] sm:$0xff]   ;;  %v5168_v55 = vld [vmem:[#allocation2 + $0x3c] sm:$0xf]  ;;  %v10264_v12 = vld [vmem:[#allocation2 + $0x40] sm:$0xf] }
 0x26a   : > { %v7386_v5 = vcombine.low %v4471_v3, %v4474_v45  ;;  %v2888_v27 = vsel %vm10001_vm15, %v7253_v28, %v2887_v62  ;;  %v5217_v8 = vshll.u32 %v10235_v63, 16  ;;  %v5221_v47 = vshrl.u32 %v10235_v63, 16  ;;  %v10269_v9 = vld [vmem:[#allocation2 + $0x38] sm:$0x1] }
 0x26b   : > { %v7269_v19 = vcombine.low %v2888_v27, %v2891_v21  ;;  %v5210_v53 = vrot.slane %v5208_v22, 4  ;;  %v5213_v59 = vrot.slane %v5211_v54, 5  ;;  %v5241_v16 = vshll.u32 %v10240_v18, 16  ;;  %v8768_v1 = vld [vmem:[#allocation2 + $0x78] sm:$0xff]  }
 0x26c   : > { %v10247_v30 = vrot.slane %v5217_v8, 5  ;;  %v5223_v37 = vrot.slane %v5221_v47, 4  ;;  %v5245_v50 = vshrl.u32 %v10240_v18, 16  ;;  %v5227_v43 = vshll.u32 %v10245_v6, 16  ;;  %v10282_v8 = vld [vmem:[#allocation2 + $0x58] sm:$0xf] }
 0x26d   : > { %v5214_v58 = vor.u32 %v5213_v59, %v5210_v53  ;;  %v10257_v42 = vrot.slane %v5241_v16, 5  ;;  %v5256_v41 = vshrl.u32 %v5165_v14, 16  ;;  %v5259_v51 = vshll.u32 %v5165_v14, 16 }
 0x26e   : > { %8099 = vmatmul.mubr.msk.bf16.gmra.mrb[56].mxu0 %vm2218_vm9, %v7267_v7  ;;  %v5247_v4 = vrot.slane %v5245_v50, 4  ;;  %v5265_v62 = vshll.u32 %v10251_v52, 16  ;;  %v5269_v40 = vshrl.u32 %v10251_v52, 16  ;;  %v5229_v45 = vrot.slane %v5227_v43, 5 }
 0x26f   : > { %8207 = vmatmul.mubr.msk.bf16.gmra.mrb[16].mxu1 %vm2218_vm9, %v7385_v2  ;;  %8102 = vmatprep.mubr.msk.bf16.mxu0 %vm2218_vm9, %v7268_v48  ;;  %v8759_v2 = vld [vmem:[#allocation2 + $0x30] sm:$0xff]   ;;  %v5251_v49 = vshll.u32 %v10255_v57, 16  ;;  %v5215_v3 = vrot.slane %v5214_v58, 4  ;;  %v5261_v15 = vrot.slane %v5259_v51, 5  ;;  %v5280_v28 = vshrl.u32 %v5168_v55, 16 }
 0x270   : > { %8210 = vmatprep.mubr.msk.bf16.mxu1 %vm2218_vm9, %v7386_v5  ;;  %v5258_v5 = vrot.slane %v5256_v41, 4  ;;  %v5248_v48 = vor.u32 %v5247_v4, %v10257_v42  ;;  %v10267_v46 = vrot.slane %v5265_v62, 5  ;;  %v5271_v32 = vrot.slane %v5269_v40, 4  ;;  %v10299_v41 = vld [vmem:[#allocation2 + $0x44] sm:$0x1] }
 0x271   : > { %v5283_v21 = vshll.u32 %v5168_v55, 16  ;;  %v5289_v27 = vshll.u32 %v10264_v12, 16  ;;  %v5282_v47 = vrot.slane %v5280_v28, 4  ;;  %v5337_v14 = vshll.u32 %v10282_v8, 16  ;;  %v10302_v40 = vld [vmem:[#allocation2 + $0x64] sm:$0xf] }
 0x272   : > { %v5249_v22 = vrot.slane %v5248_v48, 4  ;;  %v5262_v54 = vor.u32 %v5261_v15, %v5258_v5  ;;  %v5341_v58 = vshrl.u32 %v10282_v8, 16 }
 0x274   : > { %v5343_v5 = vrot.slane %v5341_v58, 4 }
 0x276   : > { %8103 = vmatmul.mubr.msk.bf16.gmra.mrb[60].mxu0 %vm2218_vm9, %v7269_v19  ;;  %v5293_v19 = vshrl.u32 %v10264_v12, 16 }
 0x277   : > { %8211 = vmatmul.mubr.msk.bf16.gmra.mrb[20].mxu1 %vm2218_vm9, %v7387_v17  ;;  %8110 = vmatprep.mubr.msk.bf16.mxu0 %vm2218_vm9, %v8758_v11  ;;  %v5224_v17 = vor.u32 %v5223_v37, %v10247_v30  ;;  %v5220_v11 = vsel %vm9326_vm8, %v5215_v3, %v10247_v30 }
 0x278   : > { %8218 = vmatprep.mubr.msk.bf16.mxu1 %vm2218_vm9, %v8755_v31  ;;  %v8767_v31 = vld [vmem:[#allocation2 + $0x6c] sm:$0xff]   ;;  %v5295_v53 = vrot.slane %v5293_v19, 4  ;;  %v5365_v19 = vshrl.u32 %v10302_v40, 16 }
 0x279   : > { %v5225_v7 = vrot.slane %v5224_v17, 4 }
 0x27e   : > { %8111 = vmatmul.mubr.msk.bf16.vlgmr.msra.gmra.mrb[32].mxu0 %vm2218_vm9, %v8760_v0 }
 0x27f   : > { %8219 = vmatmul.mubr.msk.bf16.vlgmr.msra.gmra.mrb[24].mxu1 %vm2218_vm9, %v8757_v24  ;;  %8114 = vmatprep.mubr.msk.bf16.mxu0 %vm2218_vm9, %v8762_v10  ;;  %v5230_v24 = vsel %vm9326_vm8, %v5225_v7, %v5229_v45  ;;  %v10278_v10 = vld [vmem:[#allocation2 + $0x4c] sm:$0xf]  ;;  %v10306_v7 = vld [vmem:[#allocation2 + $0x50] sm:$0x1] }
 0x280   : > { %8251 = vmatpush3.bf16.msra.mxu1 %v10063_v36  ;;  %8222 = vmatprep.mubr.msk.bf16.mxu1 %vm2218_vm9, %v8759_v2  ;;  %v5162_v36 = vld [vmem:[#allocation2 + $0x24] sm:$0xf]  ;;  %v5171_v2 = vld [vmem:[#allocation2 + $0x48] sm:$0xf]  ;;  %v5313_v30 = vshll.u32 %v10278_v10, 16  ;;  %v5317_v37 = vshrl.u32 %v10278_v10, 16  ;;  %v10290_v16 = vcombine.low %v5220_v11, %v5230_v24 }
 0x281   : > { %8252 = vmatprep.subr.bf16.mxu1 %v8769_v13  ;;  %v5232_v44 = vshrl.u32 %v5162_v36, 16  ;;  %v5235_v26 = vshll.u32 %v5162_v36, 16  ;;  %v5285_v36 = vrot.slane %v5283_v21, 5  ;;  %v5304_v59 = vshrl.u32 %v5171_v2, 16 }
 0x282   : > { %v10304_v55 = vrot.slane %v5313_v30, 5  ;;  %v5319_v3 = vrot.slane %v5317_v37, 4  ;;  %v5299_v21 = vshll.u32 %v10299_v41, 16 }
 0x283   : > { %v5234_v61 = vrot.slane %v5232_v44, 4  ;;  %v5237_v35 = vrot.slane %v5235_v26, 5  ;;  %v5307_v44 = vshll.u32 %v5171_v2, 16  ;;  %v5174_v26 = vld [vmem:[#allocation2 + $0x54] sm:$0xf]  ;;  %v5306_v45 = vrot.slane %v5304_v59, 4 }
 0x284   : > { %8253 = vmatpush3.bf16.msra.mxu1 %v8769_v13  ;;  %v5253_v13 = vrot.slane %v5251_v49, 5  ;;  %v5328_v51 = vshrl.u32 %v5174_v26, 16  ;;  %v5331_v62 = vshll.u32 %v5174_v26, 16 }
 0x285   : > { %8286 = vmatprep.subr.bf16.mxu1 %v10233_v38  ;;  %v5238_v39 = vor.u32 %v5237_v35, %v5234_v61  ;;  %v5263_v61 = vrot.slane %v5262_v54, 4  ;;  %v5177_v35 = vld [vmem:[#allocation2 + $0x60] sm:$0xf]  ;;  %v5309_v49 = vrot.slane %v5307_v44, 5  ;;  %v5323_v54 = vshll.u32 %v10306_v7, 16 }
 0x286   : > { %8115 = vmatmul.mubr.msk.bf16.gmra.mrb[36].mxu0 %vm2218_vm9, %v8764_v20  ;;  %v5275_v20 = vshll.u32 %v10269_v9, 16  ;;  %v5254_v43 = vsel %vm9326_vm8, %v5249_v22, %v5253_v13  ;;  %v5352_v48 = vshrl.u32 %v5177_v35, 16  ;;  %v5355_v15 = vshll.u32 %v5177_v35, 16  ;;  %v5180_v13 = vld [vmem:[#allocation2 + $0x6c] sm:$0xf] }
 0x287   : > { %8223 = vmatmul.mubr.msk.bf16.gmra.mrb[28].mxu1 %vm2218_vm9, %v8761_v29  ;;  %v5239_v0 = vrot.slane %v5238_v39, 4  ;;  %v5272_v29 = vor.u32 %v5271_v32, %v10267_v46  ;;  %v10308_v39 = vrot.slane %v5337_v14, 5  ;;  %v8771_v32 = vld [vmem:[#allocation2 + $0x90] sm:$0xff]   ;;  %v5330_v24 = vrot.slane %v5328_v51, 4 }
 0x288   : > { %8226 = vmatprep.mubr.msk.bf16.mxu1 %vm2218_vm9, %v8763_v23  ;;  %v10285_v23 = vrot.slane %v5289_v27, 5  ;;  %v5277_v17 = vrot.slane %v5275_v20, 5  ;;  %v5361_v27 = vshll.u32 %v10302_v40, 16  ;;  %v5310_v22 = vor.u32 %v5309_v49, %v5306_v45  ;;  %v439_v49 = vld [vmem:[#allocation2 + $0xd4] sm:$0x1] }
 0x289   : > { %v5244_v50 = vsel %vm9326_vm8, %v5239_v0, %v10257_v42  ;;  %v8770_v42 = vld [vmem:[#allocation2 + $0x84] sm:$0xff]   ;;  %v5333_v0 = vrot.slane %v5331_v62, 5  ;;  %v5320_v20 = vor.u32 %v5319_v3, %v10304_v55  ;;  %v5367_v44 = vrot.slane %v5365_v19, 4  ;;  %v10347_v19 = vld [vmem:[#allocation2 + $0x7c] sm:$0xf] }
 0x28a   : > { %v5296_v4 = vor.u32 %v5295_v53, %v10285_v23  ;;  %v10310_v28 = vcombine.low %v5244_v50, %v5254_v43  ;;  %v10327_v53 = vld [vmem:[#allocation2 + $0x70] sm:$0xf]  ;;  %v10329_v59 = vrot.slane %v5361_v27, 5  ;;  %v5376_v30 = vshrl.u32 %v5180_v13, 16  ;;  %v8772_v43 = vld [vmem:[#allocation2 + $0x9c] sm:$0xff]   ;;  %v8773_v3 = vld [vmem:[#allocation2 + $0xa8] sm:$0xff]  }
 0x28b   : > { %v5379_v37 = vshll.u32 %v5180_v13, 16  ;;  %v5301_v50 = vrot.slane %v5299_v21, 5  ;;  %v5334_v14 = vor.u32 %v5333_v0, %v5330_v24  ;;  %v5389_v35 = vshrl.u32 %v10327_v53, 16 }
 0x28c   : > { %v5311_v51 = vrot.slane %v5310_v22, 4  ;;  %v5321_v62 = vrot.slane %v5320_v20, 4 }
 0x28d   : > { %v5335_v21 = vrot.slane %v5334_v14, 4  ;;  %v5391_v13 = vrot.slane %v5389_v35, 4  ;;  %v10387_v35 = vld [vmem:[#allocation2 + $0x84] sm:$0xf] }
 0x28f   : > { %8227 = vmatmul.mubr.msk.bf16.gmra.mrb[0].mxu1 %vm2218_vm9, %v8765_v33  ;;  %v5273_v33 = vrot.slane %v5272_v29, 4  ;;  %v10323_v29 = vld [vmem:[#allocation2 + $0x5c] sm:$0x1] }
 0x290   : > { %8230 = vmatprep.mubr.msk.bf16.mxu1 %vm2218_vm9, %v8766_v60  ;;  %v5286_v60 = vor.u32 %v5285_v36, %v5282_v47  ;;  %v5344_v47 = vor.u32 %v5343_v5, %v10308_v39  ;;  %v5357_v36 = vrot.slane %v5355_v15, 5  ;;  %v5347_v58 = vshll.u32 %v10323_v29, 16 }
 0x291   : > { %v5278_v11 = vsel %vm9326_vm8, %v5273_v33, %v5277_v17  ;;  %v5325_v33 = vrot.slane %v5323_v54, 5  ;;  %v5385_v17 = vshll.u32 %v10327_v53, 16  ;;  %v5378_v15 = vrot.slane %v5376_v30, 4 }
 0x292   : > { %v5287_v2 = vrot.slane %v5286_v60, 4  ;;  %v5183_v60 = vld [vmem:[#allocation2 + $0x78] sm:$0xf]  ;;  %v5345_v5 = vrot.slane %v5344_v47, 4  ;;  %v5349_v27 = vrot.slane %v5347_v58, 5  ;;  %v5409_v30 = vshll.u32 %v10347_v19, 16 }
 0x293   : > { %v10351_v0 = vrot.slane %v5385_v17, 5  ;;  %v5326_v54 = vsel %vm9326_vm8, %v5321_v62, %v5325_v33  ;;  %v5340_v33 = vsel %vm9326_vm8, %v5335_v21, %v10308_v39  ;;  %v8775_v39 = vld [vmem:[#allocation2 + $0xc0] sm:$0xff]  }
 0x297   : > { %8231 = vmatmul.mubr.msk.bf16.gmra.mrb[4].mxu1 %vm2218_vm9, %v8767_v31  ;;  %v5268_v31 = vsel %vm9326_vm8, %v5263_v61, %v10267_v46  ;;  %v5354_v46 = vrot.slane %v5352_v48, 4  ;;  %v5292_v61 = vsel %vm9326_vm8, %v5287_v2, %v10285_v23  ;;  %v5368_v48 = vor.u32 %v5367_v44, %v10329_v59  ;;  %v10344_v23 = vld [vmem:[#allocation2 + $0x74] sm:$0x1] }
 0x298   : > { %8234 = vmatprep.mubr.msk.bf16.mxu1 %vm2218_vm9, %v8768_v1  ;;  %v5297_v1 = vrot.slane %v5296_v4, 4  ;;  %v10331_v26 = vcombine.low %v5268_v31, %v5278_v11  ;;  %v5400_v31 = vshrl.u32 %v5183_v60, 16  ;;  %v5403_v11 = vshll.u32 %v5183_v60, 16  ;;  %v8774_v60 = vld [vmem:[#allocation2 + $0xb4] sm:$0xff]  }
 0x299   : > { %v5358_v45 = vor.u32 %v5357_v36, %v5354_v46  ;;  %v5395_v47 = vshll.u32 %v10344_v23, 16  ;;  %v5350_v46 = vsel %vm9326_vm8, %v5345_v5, %v5349_v27  ;;  %v10364_v36 = vrot.slane %v5368_v48, 4  ;;  %v5902_v48 = vld [vmem:[#allocation2 + $0x54] sm:$0xe] }
 0x29a   : > { %v5302_v4 = vsel %vm9326_vm8, %v5297_v1, %v5301_v50  ;;  %v440_v1 = vsel %vm9275_vm4, 0, %v439_v49  ;;  %v10372_v50 = vld [vmem:[#allocation2 + $0x80] sm:$0x1]  ;;  %v10374_v14 = vrot.slane %v5400_v31, 4  ;;  %v10376_v58 = vrot.slane %v5403_v11, 5 }
 0x29b   : > { %v10355_v22 = vcombine.low %v5292_v61, %v5302_v4  ;;  %v10359_v20 = vrot.slane %v5358_v45, 4  ;;  %441 = vst [vmem:[#allocation2 + $0xd4] sm:$0x1] %v440_v1  ;;  %v10389_v4 = vcombine.low %v5340_v33, %v5350_v46  ;;  %v10395_v62 = vrot.slane %v5395_v47, 5  ;;  %v5899_v31 = vld [vmem:[#allocation2 + $0x30] sm:$0xe] }
 0x29c   : > { %1549 = vst.msk [vmem:[#allocation2 + $0xd4] sm:$0x1] %vm329_vm0, %v11168_v56  ;;  %v5392_v56 = vor.u32 %v5391_v13, %v10351_v0  ;;  %v5970_v45 = vrot.slane %v10240_v18, 5  ;;  %v10404_v5 = vrot.slane %v5409_v30, 5  ;;  %v5973_v2 = vrot.slane %v10255_v57, 5 }
 0x29d   : > { %v5977_v1 = vrot.slane %v10251_v52, 5  ;;  %v5900_v30 = vld [vmem:[#allocation2 + $0x3c] sm:$0xe]  ;;  %v5980_v57 = vrot.slane %v10269_v9, 5  ;;  %v5901_v52 = vld [vmem:[#allocation2 + $0x48] sm:$0xe] }
 0x29e   : > { %v10416_v11 = vrot.slane %v5392_v56, 4  ;;  %v5972_v13 = vrot.slane %v5970_v45, 4  ;;  %v8776_v56 = vld [vmem:[#allocation2 + $0xcc] sm:$0xff]   ;;  %v7478_v49 = vrot.slane %v5901_v52, 9  ;;  %v10558_v47 = vld [vmem:[#allocation2 + $0xb8] sm:$0xf] }
 0x29f   : > { %8235 = vmatmul.mubr.msk.bf16.gmra.mrb[8].mxu1 %vm2218_vm9, %v8770_v42  ;;  %v10341_v42 = vld [vmem:[#allocation2 + $0x68] sm:$0x1]  ;;  %v5979_v33 = vrot.slane %v5977_v1, 4  ;;  %v5907_v52 = vld [vmem:[#allocation2 + $0x90] sm:$0xe] }
 0x2a0   : > { %8238 = vmatprep.mubr.msk.bf16.mxu1 %vm2218_vm9, %v8771_v32  ;;  %v5381_v32 = vrot.slane %v5379_v37, 5  ;;  %v5371_v24 = vshll.u32 %v10341_v42, 16  ;;  %v5316_v37 = vsel %vm9326_vm8, %v5311_v51, %v10304_v55  ;;  %v5898_v55 = vld [vmem:[#allocation2 + $0x24] sm:$0xe] }
 0x2a1   : > { %v10379_v61 = vcombine.low %v5316_v37, %v5326_v54  ;;  %v7475_v27 = vrot.slane %v5898_v55, 9  ;;  %v10431_v37 = vsel %vm10001_vm15, %v5972_v13, %v5973_v2  ;;  %v10434_v55 = vld [vmem:[#allocation2 + $0x94] sm:$0xf]  ;;  %v10447_v9 = vsel %vm10001_vm15, %v5979_v33, %v5980_v57 }
 0x2a2   : > { %v5382_v44 = vor.u32 %v5381_v32, %v5378_v15  ;;  %v10384_v17 = vrot.slane %v5371_v24, 5  ;;  %v10407_v15 = vld [vmem:[#allocation2 + $0x88] sm:$0xf]  ;;  %v10418_v24 = vld [vmem:[#allocation2 + $0x90] sm:$0xf]  ;;  %v5991_v2 = vrot.slane %v10278_v10, 5 }
 0x2a3   : > { %v7479_v33 = vrot.slane %v5902_v48, 9  ;;  %v5998_v57 = vrot.slane %v10282_v8, 5  ;;  %v10514_v32 = vld [vmem:[#allocation2 + $0xa0] sm:$0xf] }
 0x2a5   : > { %v10482_v8 = vsel %vm10001_vm15, %v7479_v33, %v5998_v57  ;;  %v6000_v48 = vrot.slane %v5998_v57, 4  ;;  %v6015_v33 = vrot.slane %v10344_v23, 5  ;;  %v6019_v57 = vrot.slane %v10347_v19, 5 }
 0x2a7   : > { %8239 = vmatmul.mubr.msk.bf16.gmra.mrb[12].mxu1 %vm2218_vm9, %v8772_v43  ;;  %v5413_v43 = vshrl.u32 %v10347_v19, 16 }
 0x2a8   : > { %8242 = vmatprep.mubr.msk.bf16.mxu1 %vm2218_vm9, %v8773_v3  ;;  %v10402_v3 = vrot.slane %v5382_v44, 4  ;;  %v10427_v44 = vsel %vm10001_vm15, %v7475_v27, %v5970_v45  ;;  %v5984_v27 = vrot.slane %v10264_v12, 5  ;;  %v5987_v45 = vrot.slane %v10299_v41, 5  ;;  %v5903_v12 = vld [vmem:[#allocation2 + $0x60] sm:$0xe] }
 0x2a9   : > { %v10412_v18 = vrot.slane %v5413_v43, 4  ;;  %v7476_v43 = vrot.slane %v5899_v31, 9  ;;  %v7477_v31 = vrot.slane %v5900_v30, 9  ;;  %v5994_v30 = vrot.slane %v10306_v7, 5 }
 0x2aa   : > { %v5986_v51 = vrot.slane %v5984_v27, 4  ;;  %v10466_v41 = vsel %vm10001_vm15, %v7478_v49, %v5991_v2  ;;  %v10497_v49 = vld [vmem:[#allocation2 + $0x98] sm:$0x1]  ;;  %v11196_v25 = vcombine.low %v10427_v44, %v10431_v37 }
 0x2ab   : > { %v10443_v13 = vsel %vm10001_vm15, %v7476_v43, %v5977_v1  ;;  %v10456_v1 = vsel %vm10001_vm15, %v7477_v31, %v5984_v27  ;;  %v5993_v43 = vrot.slane %v5991_v2, 4  ;;  %v5905_v27 = vld [vmem:[#allocation2 + $0x78] sm:$0xe]  ;;  %v6036_v46 = vrot.slane %v10497_v49, 5 }
 0x2ac   : > { %v10462_v10 = vsel %vm10001_vm15, %v5986_v51, %v5987_v45  ;;  %v6005_v51 = vrot.slane %v10302_v40, 5  ;;  %v5904_v45 = vld [vmem:[#allocation2 + $0x6c] sm:$0xe]  ;;  %v6012_v40 = vrot.slane %v10327_v53, 5 }
 0x2ad   : > { %v10475_v7 = vsel %vm10001_vm15, %v5993_v43, %v5994_v30  ;;  %v7481_v30 = vrot.slane %v5904_v45, 9  ;;  %v6021_v45 = vrot.slane %v6019_v57, 4 }
 0x2ae   : > { %v6007_v2 = vrot.slane %v6005_v51, 4  ;;  %v6014_v53 = vrot.slane %v6012_v40, 4  ;;  %v11199_v34 = vcombine.low %v10466_v41, %v10475_v7 }
 0x2af   : > { %8243 = vmatmul.mubr.msk.bf16.gmra.mrb[16].mxu1 %vm2218_vm9, %v8774_v60  ;;  %v10511_v19 = vsel %vm10001_vm15, %v7481_v30, %v6012_v40  ;;  %v10529_v40 = vld [vmem:[#allocation2 + $0xa4] sm:$0x1] }
 0x2b0   : > { %8246 = vmatprep.mubr.msk.bf16.mxu1 %vm2218_vm9, %v8775_v39  ;;  %11173 = vst [vmem:[#allocation18_spill] sm:$0xff] %v10511_v19  ;;  %v6026_v39 = vrot.slane %v10407_v15, 5  ;;  %v10550_v30 = vld [vmem:[#allocation2 + $0xc4] sm:$0xf]  ;;  %v6043_v54 = vrot.slane %v10529_v40, 5 }
 0x2b1   : > { %v5910_v19 = vld [vmem:[#allocation2 + $0xb4] sm:$0xe] }
 0x2b7   : > { %8247 = vmatmul.mubr.msk.bf16.gmra.mrb[20].mxu1 %vm2218_vm9, %v8776_v56  ;;  %v7480_v56 = vrot.slane %v5903_v12, 9  ;;  %v6008_v12 = vrot.slane %v10341_v42, 5 }
 0x2b8   : > { %8254 = vmatprep.mubr.msk.bf16.mxu1 %vm2218_vm9, %v10290_v16  ;;  %v6001_v16 = vrot.slane %v10323_v29, 5  ;;  %v5906_v29 = vld [vmem:[#allocation2 + $0x84] sm:$0xe] }
 0x2b9   : > { %v10487_v31 = vsel %vm10001_vm15, %v7480_v56, %v6005_v51  ;;  %v10503_v42 = vsel %vm10001_vm15, %v6007_v2, %v6008_v12  ;;  %v7482_v51 = vrot.slane %v5905_v27, 9  ;;  %v6022_v56 = vrot.slane %v10372_v50, 5  ;;  %v10516_v2 = vld [vmem:[#allocation2 + $0xac] sm:$0xf] }
 0x2ba   : > { %11170 = vst [vmem:[#allocation16_spill] sm:$0xff] %v10487_v31  ;;  %v10493_v43 = vsel %vm10001_vm15, %v6000_v48, %v6001_v16  ;;  %11172 = vst [vmem:[#allocation15_spill] sm:$0xff] %v10503_v42  ;;  %v8778_v48 = vld [vmem:[#allocation6 + $0x88] sm:$0xff]   ;;  %v10505_v16 = vld [vmem:[#allocation2 + $0x8c] sm:$0x1]  ;;  %v10520_v27 = vsel %vm10001_vm15, %v6014_v53, %v6015_v33  ;;  %v7483_v23 = vrot.slane %v5906_v29, 9 }
 0x2bb   : > { %11171 = vst [vmem:[#allocation14_spill] sm:$0xff] %v10493_v43  ;;  %11174 = vst [vmem:[#allocation17_spill] sm:$0xff] %v10520_v27  ;;  %v10524_v12 = vsel %vm10001_vm15, %v7482_v51, %v6019_v57  ;;  %v10535_v60 = vsel %vm10001_vm15, %v6021_v45, %v6022_v56  ;;  %v7484_v33 = vrot.slane %v5907_v52, 9  ;;  %v6033_v53 = vrot.slane %v10434_v55, 5  ;;  %v5908_v57 = vld [vmem:[#allocation2 + $0x9c] sm:$0xe] }
 0x2bc   : > { %11175 = vst [vmem:[#allocation12_spill] sm:$0xff] %v10524_v12  ;;  %11176 = vst [vmem:[#allocation13_spill] sm:$0xff] %v10535_v60  ;;  %v10541_v29 = vld [vmem:[#allocation2 + $0xb0] sm:$0x1]  ;;  %v10547_v51 = vsel %vm10001_vm15, %v7483_v23, %v6026_v39  ;;  %v6028_v56 = vrot.slane %v6026_v39, 4  ;;  %v6029_v52 = vrot.slane %v10505_v16, 5 }
 0x2bd   : > { %v5909_v45 = vld [vmem:[#allocation2 + $0xa8] sm:$0xe]  ;;  %v7485_v23 = vrot.slane %v5908_v57, 9  ;;  %v6047_v21 = vrot.slane %v10516_v2, 5  ;;  %v10566_v60 = vld [vmem:[#allocation2 + $0xbc] sm:$0x1] }
 0x2be   : > { %v10562_v39 = vsel %vm10001_vm15, %v6028_v56, %v6029_v52  ;;  %v7486_v27 = vrot.slane %v5909_v45, 9  ;;  %v5461_v56 = vshrl.u32 %v10434_v55, 16  ;;  %v6050_v42 = vrot.slane %v10541_v29, 5  ;;  %v5911_v31 = vld [vmem:[#allocation2 + $0xc0] sm:$0xe] }
 0x2bf   : > { %8255 = vmatmul.mubr.msk.bf16.vlgmr.msra.gmra.mrb[24].mxu1 %vm2218_vm9, %v10310_v28  ;;  %v6040_v28 = vrot.slane %v10514_v32, 5  ;;  %v6049_v52 = vrot.slane %v6047_v21, 4  ;;  %v10578_v43 = vld [vmem:[#allocation2 + $0xc8] sm:$0x1]  ;;  %v6054_v45 = vrot.slane %v10558_v47, 5  ;;  %v11211_v7 = vcombine.low %v10547_v51, %v10562_v39 }
 0x2c0   : > { %8287 = vmatpush3.bf16.msra.mxu1 %v10233_v38  ;;  %8258 = vmatprep.mubr.msk.bf16.mxu1 %vm2218_vm9, %v10331_v26  ;;  %v10554_v38 = vsel %vm10001_vm15, %v7484_v33, %v6033_v53  ;;  %v6035_v26 = vrot.slane %v6033_v53, 4 }
 0x2c1   : > { %8288 = vmatprep.subr.bf16.mxu1 %v8778_v48  ;;  %11177 = vst [vmem:[#allocation19_spill] sm:$0xff] %v10554_v38  ;;  %v6042_v12 = vrot.slane %v6040_v28, 4  ;;  %v10582_v33 = vsel %vm10001_vm15, %v7485_v23, %v6040_v28  ;;  %v7487_v28 = vrot.slane %v5910_v19, 9  ;;  %v6061_v23 = vrot.slane %v10550_v30, 5  ;;  %v11202_v37 = vld [vmem:[#allocation16_spill] sm:$0xff] }
 0x2c2   : > { %v10572_v53 = vsel %vm10001_vm15, %v6035_v26, %v6036_v46  ;;  %v5912_v26 = vld [vmem:[#allocation2 + $0xcc] sm:$0xe]  ;;  %v7488_v38 = vrot.slane %v5911_v31, 9 }
 0x2c3   : > { %11178 = vst [vmem:[#allocation20_spill] sm:$0xff] %v10572_v53  ;;  %v10586_v46 = vsel %vm10001_vm15, %v6042_v12, %v6043_v54  ;;  %v10597_v53 = vsel %vm10001_vm15, %v6049_v52, %v6050_v42  ;;  %v10602_v54 = vld [vmem:[#allocation2 + $0xd0] sm:$0xf]  ;;  %v6057_v12 = vrot.slane %v10566_v60, 5  ;;  %v10609_v42 = vld [vmem:[#allocation2 + $0xd4] sm:$0x1] }
 0x2c4   : > { %8289 = vmatpush3.bf16.msra.mxu1 %v8778_v48  ;;  %11179 = vst [vmem:[#allocation21_spill] sm:$0xff] %v10586_v46  ;;  %v10590_v48 = vsel %vm10001_vm15, %v7486_v27, %v6047_v21  ;;  %11181 = vst [vmem:[#allocation23_spill] sm:$0xff] %v10597_v53  ;;  %v6056_v27 = vrot.slane %v6054_v45, 4  ;;  %v6063_v19 = vrot.slane %v6061_v23, 4  ;;  %v6064_v52 = vrot.slane %v10578_v43, 5 }
 0x2c5   : > { %11180 = vst [vmem:[#allocation22_spill] sm:$0xff] %v10590_v48  ;;  %v7489_v57 = vrot.slane %v5912_v26, 9  ;;  %v10615_v46 = vsel %vm10001_vm15, %v7487_v28, %v6054_v45  ;;  %v10623_v31 = vsel %vm10001_vm15, %v7488_v38, %v6061_v23  ;;  %v11185_v38 = vshrl.u32 %v10387_v35, 16 }
 0x2c6   : > { %11182 = vst [vmem:[#allocation24_spill] sm:$0xff] %v10615_v46  ;;  %v10619_v21 = vsel %vm10001_vm15, %v6056_v27, %v6057_v12  ;;  %v10630_v26 = vsel %vm10001_vm15, %v6063_v19, %v6064_v52  ;;  %v5416_v27 = vor.u32 %v10412_v18, %v10404_v5  ;;  %v11186_v12 = vshll.u32 %v10387_v35, 16 }
 0x2c7   : > { %8259 = vmatmul.mubr.msk.bf16.gmra.mrb[28].mxu1 %vm2218_vm9, %v10355_v22  ;;  %v6068_v22 = vrot.slane %v10602_v54, 5  ;;  %11183 = vst [vmem:[#allocation25_spill] sm:$0xff] %v10619_v21  ;;  %11184 = vst [vmem:[#allocation26_spill] sm:$0xff] %v10630_v26  ;;  %v5426_v23 = vrot.slane %v11185_v38, 4  ;;  %v11187_v19 = vshll.u32 %v10407_v15, 16  ;;  %v11190_v35 = vshll.u32 %v10418_v24, 16 }
 0x2c8   : > { %8262 = vmatprep.mubr.msk.bf16.mxu1 %vm2218_vm9, %v10379_v61  ;;  %v6071_v61 = vrot.slane %v10609_v42, 5  ;;  %v5429_v48 = vrot.slane %v11186_v12, 5  ;;  %v11191_v12 = vshll.u32 %v10434_v55, 16  ;;  %v5463_v26 = vrot.slane %v5461_v56, 4 }
 0x2c9   : > { %v10634_v45 = vsel %vm10001_vm15, %v7489_v57, %v6068_v22  ;;  %v6070_v28 = vrot.slane %v6068_v22, 4  ;;  %v10646_v52 = vrot.slane %v11187_v19, 5  ;;  %v11188_v57 = vshrl.u32 %v10407_v15, 16  ;;  %v5192_v19 = vld [vmem:[#allocation2 + $0x9c] sm:$0xf] }
 0x2ca   : > { %v11189_v22 = vshrl.u32 %v10418_v24, 16  ;;  %v5453_v38 = vrot.slane %v11190_v35, 5  ;;  %v10660_v53 = vrot.slane %v11191_v12, 5  ;;  %v11193_v24 = vsel %vm9326_vm8, %v10359_v20, %v10329_v59 }
 0x2cb   : > { %v5439_v21 = vrot.slane %v11188_v57, 4  ;;  %v10654_v18 = vsel %vm10001_vm15, %v6070_v28, %v6071_v61  ;;  %v11192_v57 = vsel %vm9326_vm8, %v10364_v36, %v10384_v17  ;;  %v11194_v55 = vor.u32 %v10376_v58, %v10374_v14  ;;  %v11218_v39 = vld [vmem:[#allocation23_spill] sm:$0xff] }
 0x2cc   : > { %v5450_v46 = vrot.slane %v11189_v22, 4  ;;  %v7505_v15 = vcombine.low %v10634_v45, %v10654_v18  ;;  %v7446_v61 = vcombine.low %v11193_v24, %v11192_v57  ;;  %v5388_v56 = vsel %vm9326_vm8, %v10402_v3, %v10351_v0  ;;  %v11217_v51 = vld [vmem:[#allocation22_spill] sm:$0xff] }
 0x2cd   : > { %v5407_v28 = vrot.slane %v11194_v55, 4  ;;  %v5398_v36 = vsel %vm9326_vm8, %v10416_v11, %v10395_v62  ;;  %v5417_v17 = vrot.slane %v5416_v27, 4  ;;  %v5430_v59 = vor.u32 %v5429_v48, %v5426_v23 }
 0x2ce   : > { %v5440_v20 = vor.u32 %v5439_v21, %v10646_v52  ;;  %v5472_v14 = vshrl.u32 %v5192_v19, 16  ;;  %v5475_v58 = vshll.u32 %v5192_v19, 16  ;;  %v5443_v35 = vshll.u32 %v10505_v16, 16  ;;  %v5195_v21 = vld [vmem:[#allocation2 + $0xa8] sm:$0xf] }
 0x2cf   : > { %8263 = vmatmul.mubr.msk.bf16.gmra.mrb[0].mxu1 %vm2218_vm9, %v10389_v4  ;;  %v11195_v4 = vshll.u32 %v10372_v50, 16  ;;  %v5454_v12 = vor.u32 %v5453_v38, %v5450_v46  ;;  %v5464_v0 = vor.u32 %v5463_v26, %v10660_v53  ;;  %v7447_v3 = vcombine.low %v5388_v56, %v5398_v36 }
 0x2d0   : > { %8266 = vmatprep.mubr.msk.bf16.mxu1 %vm2218_vm9, %v7446_v61  ;;  %v5412_v62 = vsel %vm9326_vm8, %v5407_v28, %v10404_v5  ;;  %v5481_v11 = vshll.u32 %v10514_v32, 16  ;;  %v5485_v48 = vshrl.u32 %v10514_v32, 16  ;;  %v5467_v50 = vshll.u32 %v10497_v49, 16 }
 0x2d1   : > { %v5421_v22 = vrot.slane %v11195_v4, 5  ;;  %v5505_v16 = vshll.u32 %v10516_v2, 16  ;;  %v5509_v46 = vshrl.u32 %v10516_v2, 16  ;;  %v5431_v26 = vrot.slane %v5430_v59, 4  ;;  %v5198_v2 = vld [vmem:[#allocation2 + $0xb4] sm:$0xf] }
 0x2d2   : > { %v5441_v23 = vrot.slane %v5440_v20, 4  ;;  %v5474_v38 = vrot.slane %v5472_v14, 4  ;;  %v5477_v19 = vrot.slane %v5475_v58, 5  ;;  %v5455_v57 = vrot.slane %v5454_v12, 4 }
 0x2d3   : > { %v5422_v27 = vsel %vm9326_vm8, %v5417_v17, %v5421_v22  ;;  %v5465_v5 = vrot.slane %v5464_v0, 4  ;;  %v5496_v24 = vshrl.u32 %v5195_v21, 16  ;;  %v5499_v61 = vshll.u32 %v5195_v21, 16 }
 0x2d4   : > { %v7448_v55 = vcombine.low %v5412_v62, %v5422_v27  ;;  %v5445_v32 = vrot.slane %v5443_v35, 5  ;;  %v10703_v28 = vrot.slane %v5481_v11, 5  ;;  %v5487_v56 = vrot.slane %v5485_v48, 4  ;;  %v5201_v11 = vld [vmem:[#allocation2 + $0xc0] sm:$0xf] }
 0x2d5   : > { %v5469_v49 = vrot.slane %v5467_v50, 5  ;;  %v10706_v36 = vrot.slane %v5505_v16, 5  ;;  %v5511_v17 = vrot.slane %v5509_v46, 4  ;;  %v5436_v59 = vsel %vm9326_vm8, %v5431_v26, %v10646_v52 }
 0x2d6   : > { %v5446_v20 = vsel %vm9326_vm8, %v5441_v23, %v5445_v32  ;;  %v5478_v14 = vor.u32 %v5477_v19, %v5474_v38  ;;  %v5491_v58 = vshll.u32 %v10529_v40, 16  ;;  %v5460_v4 = vsel %vm9326_vm8, %v5455_v57, %v10660_v53  ;;  %v5204_v57 = vld [vmem:[#allocation2 + $0xcc] sm:$0xf] }
 0x2d7   : > { %8267 = vmatmul.mubr.msk.bf16.gmra.mrb[4].mxu1 %vm2218_vm9, %v7447_v3  ;;  %v5470_v22 = vsel %vm9326_vm8, %v5465_v5, %v5469_v49  ;;  %v5498_v35 = vrot.slane %v5496_v24, 4  ;;  %v5501_v12 = vrot.slane %v5499_v61, 5  ;;  %v5488_v0 = vor.u32 %v5487_v56, %v10703_v28 }
 0x2d8   : > { %8270 = vmatprep.mubr.msk.bf16.mxu1 %vm2218_vm9, %v7448_v55  ;;  %v5520_v3 = vshrl.u32 %v5198_v2, 16  ;;  %v5529_v52 = vshll.u32 %v10558_v47, 16  ;;  %v5533_v62 = vshrl.u32 %v10558_v47, 16  ;;  %v5512_v48 = vor.u32 %v5511_v17, %v10706_v36  ;;  %v8779_v47 = vld [vmem:[%s11093_s5] sm:$0xff]  }
 0x2d9   : > { %v5523_v40 = vshll.u32 %v5198_v2, 16  ;;  %v5553_v21 = vshll.u32 %v10550_v30, 16  ;;  %v5557_v53 = vshrl.u32 %v10550_v30, 16  ;;  %v7449_v27 = vcombine.low %v5436_v59, %v5446_v20  ;;  %8322 = vmatprep.subr.bf16.mxu0 %v8779_v47 }
 0x2da   : > { %v7450_v50 = vcombine.low %v5460_v4, %v5470_v22  ;;  %v5479_v16 = vrot.slane %v5478_v14, 4  ;;  %v5493_v46 = vrot.slane %v5491_v58, 5  ;;  %v5502_v26 = vor.u32 %v5501_v12, %v5498_v35  ;;  %8323 = vmatpush3.bf16.msra.mxu0 %v8779_v47 }
 0x2db   : > { %v5515_v23 = vshll.u32 %v10541_v29, 16  ;;  %v5544_v38 = vshrl.u32 %v5201_v11, 16  ;;  %v5547_v19 = vshll.u32 %v5201_v11, 16  ;;  %v5489_v5 = vrot.slane %v5488_v0, 4 }
 0x2dc   : > { %v5522_v24 = vrot.slane %v5520_v3, 4  ;;  %v5531_v61 = vrot.slane %v5529_v52, 5  ;;  %v5535_v55 = vrot.slane %v5533_v62, 4  ;;  %v5513_v30 = vrot.slane %v5512_v48, 4 }
 0x2dd   : > { %v5525_v32 = vrot.slane %v5523_v40, 5  ;;  %v5555_v56 = vrot.slane %v5553_v21, 5  ;;  %v5559_v49 = vrot.slane %v5557_v53, 4  ;;  %v5568_v29 = vshrl.u32 %v5204_v57, 16 }
 0x2de   : > { %v5571_v17 = vshll.u32 %v5204_v57, 16  ;;  %v5577_v2 = vshll.u32 %v10602_v54, 16  ;;  %v5581_v59 = vshrl.u32 %v10602_v54, 16  ;;  %v5503_v20 = vrot.slane %v5502_v26, 4 }
 0x2df   : > { %8271 = vmatmul.mubr.msk.bf16.gmra.mrb[8].mxu1 %vm2218_vm9, %v7449_v27  ;;  %v5517_v14 = vrot.slane %v5515_v23, 5  ;;  %v5546_v58 = vrot.slane %v5544_v38, 4  ;;  %v5549_v4 = vrot.slane %v5547_v19, 5  ;;  %v5484_v22 = vsel %vm9326_vm8, %v5479_v16, %v10703_v28 }
 0x2e0   : > { %8274 = vmatprep.mubr.msk.bf16.mxu1 %vm2218_vm9, %v7450_v50  ;;  %v5494_v35 = vsel %vm9326_vm8, %v5489_v5, %v5493_v46  ;;  %v5536_v12 = vor.u32 %v5535_v55, %v5531_v61  ;;  %v5526_v3 = vor.u32 %v5525_v32, %v5522_v24  ;;  %v5539_v52 = vshll.u32 %v10566_v60, 16 }
 0x2e1   : > { %v5518_v0 = vsel %vm9326_vm8, %v5513_v30, %v5517_v14  ;;  %v5560_v54 = vor.u32 %v5559_v49, %v5555_v56  ;;  %v5570_v62 = vrot.slane %v5568_v29, 4  ;;  %v5573_v11 = vrot.slane %v5571_v17, 5 }
 0x2e2   : > { %v5579_v48 = vrot.slane %v5577_v2, 5  ;;  %v5583_v40 = vrot.slane %v5581_v59, 4  ;;  %v7451_v21 = vcombine.low %v5484_v22, %v5494_v35  ;;  %v5508_v28 = vsel %vm9326_vm8, %v5503_v20, %v10706_v36  ;;  %v11200_v35 = vld [vmem:[#allocation14_spill] sm:$0xff] }
 0x2e3   : > { %v5550_v53 = vor.u32 %v5549_v4, %v5546_v58  ;;  %v5563_v27 = vshll.u32 %v10578_v43, 16  ;;  %v7452_v50 = vcombine.low %v5508_v28, %v5518_v0  ;;  %v5537_v16 = vrot.slane %v5536_v12, 4  ;;  %v11203_v12 = vld [vmem:[#allocation15_spill] sm:$0xff]  ;;  %v11206_v0 = vld [vmem:[#allocation17_spill] sm:$0xff] }
 0x2e4   : > { %v5527_v46 = vrot.slane %v5526_v3, 4  ;;  %v5561_v26 = vrot.slane %v5560_v54, 4  ;;  %v5541_v60 = vrot.slane %v5539_v52, 5  ;;  %v5574_v23 = vor.u32 %v5573_v11, %v5570_v62  ;;  %v11209_v3 = vld [vmem:[#allocation13_spill] sm:$0xff]  ;;  %v11213_v52 = vld [vmem:[#allocation20_spill] sm:$0xff] }
 0x2e5   : > { %v5584_v38 = vor.u32 %v5583_v40, %v5579_v48  ;;  %v5587_v19 = vshll.u32 %v10609_v42, 16  ;;  %v5551_v57 = vrot.slane %v5550_v53, 4  ;;  %v5565_v47 = vrot.slane %v5563_v27, 5 }
 0x2e6   : > { %v5542_v36 = vsel %vm9326_vm8, %v5537_v16, %v5541_v60  ;;  %v5963_v5 = vrot.slane %v10235_v63, 5  ;;  %v5532_v24 = vsel %vm9326_vm8, %v5527_v46, %v5531_v61  ;;  %v5575_v55 = vrot.slane %v5574_v23, 4  ;;  %v5897_v61 = vld [vmem:[#allocation2 + $0x18] sm:$0xe]  ;;  %v11221_v60 = vld [vmem:[#allocation25_spill] sm:$0xff] }
 0x2e7   : > { %8275 = vmatmul.mubr.msk.bf16.gmra.mrb[12].mxu1 %vm2218_vm9, %v7451_v21  ;;  %v5566_v43 = vsel %vm9326_vm8, %v5561_v26, %v5565_v47  ;;  %v5585_v30 = vrot.slane %v5584_v38, 4  ;;  %v5589_v32 = vrot.slane %v5587_v19, 5  ;;  %v7453_v49 = vcombine.low %v5532_v24, %v5542_v36  ;;  %v11215_v21 = vld [vmem:[#allocation21_spill] sm:$0xff]  ;;  %v11220_v26 = vld [vmem:[#allocation24_spill] sm:$0xff] }
 0x2e8   : > { %8278 = vmatprep.mubr.msk.bf16.mxu1 %vm2218_vm9, %v7452_v50  ;;  %v5556_v42 = vsel %vm9326_vm8, %v5551_v57, %v5555_v56  ;;  %v5965_v17 = vrot.slane %v5963_v5, 4  ;;  %v5580_v2 = vsel %vm9326_vm8, %v5575_v55, %v5579_v48  ;;  %v5966_v59 = vrot.slane %v10245_v6, 5 }
 0x2e9   : > { %v7454_v29 = vcombine.low %v5556_v42, %v5566_v43  ;;  %v5590_v63 = vsel %vm9326_vm8, %v5585_v30, %v5589_v32  ;;  %v7474_v14 = vrot.slane %v5897_v61, 9  ;;  %v11197_v6 = vcombine.low %v10443_v13, %v10447_v9  ;;  %v11205_v9 = vld [vmem:[#allocation18_spill] sm:$0xff] }
 0x2ea   : > { %v7455_v20 = vcombine.low %v5580_v2, %v5590_v63  ;;  %v5967_v56 = vsel %vm10001_vm15, %v5965_v17, %v5966_v59  ;;  %v11198_v22 = vcombine.low %v10456_v1, %v10462_v10  ;;  %v11201_v44 = vcombine.low %v10482_v8, %v11200_v35  ;;  %v11208_v10 = vld [vmem:[#allocation12_spill] sm:$0xff]  ;;  %v11212_v8 = vld [vmem:[#allocation19_spill] sm:$0xff] }
 0x2eb   : > { %v5964_v58 = vsel %vm10001_vm15, %v7474_v14, %v5963_v5  ;;  %v11204_v13 = vcombine.low %v11202_v37, %v11203_v12  ;;  %v11207_v1 = vcombine.low %v11205_v9, %v11206_v0  ;;  %v11210_v41 = vcombine.low %v11208_v10, %v11209_v3  ;;  %v8780_v14 = vld [vmem:[%s11093_s5 + $0x8] sm:$0xff]  }
 0x2ec   : > { %v7490_v4 = vcombine.low %v5964_v58, %v5967_v56  ;;  %v11214_v54 = vcombine.low %v11212_v8, %v11213_v52  ;;  %v11216_v28 = vcombine.low %v10582_v33, %v11215_v21  ;;  %v11219_v53 = vcombine.low %v11217_v51, %v11218_v39  ;;  %v11223_v33 = vld [vmem:[#allocation26_spill] sm:$0xff]  ;;  %8324 = vmatprep.subr.bf16.mxu0 %v8780_v14 }
 0x2ed   : > { %v11222_v23 = vcombine.low %v11220_v26, %v11221_v60  ;;  %v11224_v38 = vcombine.low %v10623_v31, %v11223_v33  ;;  %8325 = vmatpush3.bf16.msra.mxu0 %v8780_v14 }
 0x2ef   : > { %8279 = vmatmul.mubr.msk.bf16.gmra.mrb[16].mxu1 %vm2218_vm9, %v7453_v49 }
 0x2f0   : > { %8282 = vmatprep.mubr.msk.bf16.mxu1 %vm2218_vm9, %v7454_v29 }
 0x2f7   : > { %8283 = vmatmul.mubr.msk.bf16.gmra.mrb[20].mxu1 %vm2218_vm9, %v7455_v20 }
 0x2f8   : > { %8290 = vmatprep.mubr.msk.bf16.mxu1 %vm2218_vm9, %v7490_v4  ;;  %v10885_v4 = vld [vmem:[%s11092_s4] ss:$0 sm:$0xff] }
 0x2ff   : > { %8291 = vmatmul.mubr.msk.bf16.vlgmr.msra.gmra.mrb[24].mxu1 %vm2218_vm9, %v11196_v25 }
 0x300   : > { %8294 = vmatprep.mubr.msk.bf16.mxu1 %vm2218_vm9, %v11197_v6 }
 0x307   : > { %8295 = vmatmul.mubr.msk.bf16.gmra.mrb[28].mxu1 %vm2218_vm9, %v11198_v22 }
 0x308   : > { %8298 = vmatprep.mubr.msk.bf16.mxu1 %vm2218_vm9, %v11199_v34 }
 0x30f   : > { %8299 = vmatmul.mubr.msk.bf16.gmra.mrb[0].mxu1 %vm2218_vm9, %v11201_v44 }
 0x310   : > { %8302 = vmatprep.mubr.msk.bf16.mxu1 %vm2218_vm9, %v11204_v13 }
 0x317   : > { %8303 = vmatmul.mubr.msk.bf16.gmra.mrb[4].mxu1 %vm2218_vm9, %v11207_v1 }
 0x318   : > { %8306 = vmatprep.mubr.msk.bf16.mxu1 %vm2218_vm9, %v11210_v41 }
 0x31f   : > { %8307 = vmatmul.mubr.msk.bf16.gmra.mrb[8].mxu1 %vm2218_vm9, %v11211_v7 }
 0x320   : > { %8310 = vmatprep.mubr.msk.bf16.mxu1 %vm2218_vm9, %v11214_v54 }
 0x321   : > { %v10811_v62 = vpop.f32.mrb[40].mxu0 }
 0x322   : > { %v10813_v11 = vpop.f32.mrb[41].mxu0 }
 0x323   : > { %v10815_v48 = vpop.f32.mrb[42].mxu0 }
 0x324   : > { %v10817_v40 = vpop.f32.mrb[43].mxu0 }
 0x327   : > { %8311 = vmatmul.mubr.msk.bf16.gmra.mrb[12].mxu1 %vm2218_vm9, %v11216_v28 }
 0x328   : > { %8314 = vmatprep.mubr.msk.bf16.mxu1 %vm2218_vm9, %v11219_v53 }
 0x329   : > { %v10827_v27 = vpop.f32.mrb[44].mxu0 }
 0x32a   : > { %v10829_v50 = vpop.f32.mrb[45].mxu0 }
 0x32b   : > { %v10831_v16 = vpop.f32.mrb[46].mxu0 }
 0x32c   : > { %v10833_v46 = vpop.f32.mrb[47].mxu0 }
 0x32f   : > { %8315 = vmatmul.mubr.msk.bf16.gmra.mrb[16].mxu1 %vm2218_vm9, %v11222_v23 }
 0x330   : > { %8318 = vmatprep.mubr.msk.bf16.mxu1 %vm2218_vm9, %v11224_v38 }
 0x331   : > { %v10843_v19 = vpop.f32.mrb[48].mxu0 }
 0x332   : > { %v10845_v57 = vpop.f32.mrb[49].mxu0 }
 0x333   : > { %v10847_v47 = vpop.f32.mrb[50].mxu0 }
 0x334   : > { %v10849_v36 = vpop.f32.mrb[51].mxu0 }
 0x337   : > { %8319 = vmatmul.mubr.msk.bf16.gmra.mrb[20].mxu1 %vm2218_vm9, %v7505_v15 }
 0x339   : > { %v10855_v43 = vpop.f32.mrb[52].mxu0 }
 0x33a   : > { %v10857_v5 = vpop.f32.mrb[53].mxu0 }
 0x33b   : > { %v10859_v31 = vpop.f32.mrb[54].mxu0 }
 0x33c   : > { %v10861_v24 = vpop.f32.mrb[55].mxu0 }
 0x341   : > { %v10863_v55 = vpop.f32.mrb[56].mxu0 }
 0x342   : > { %v10865_v30 = vpop.f32.mrb[57].mxu0 }
 0x343   : > { %v10867_v32 = vpop.f32.mrb[58].mxu0 }
 0x344   : > { %v10869_v49 = vpop.f32.mrb[59].mxu0 }
 0x349   : > { %v10871_v42 = vpop.f32.mrb[60].mxu0 }
 0x34a   : > { %v10873_v45 = vpop.f32.mrb[61].mxu0 }
 0x34b   : > { %v10875_v18 = vpop.f32.mrb[62].mxu0 }
 0x34c   : > { %v10877_v15 = vpop.f32.mrb[63].mxu0 }
 0x351   : > { %v8112_v29 = vpop.f32.mrb[32].mxu0 }
 0x352   : > { %v3409_v17 = vpop.f32.mrb[33].mxu0 }
 0x353   : > { %v8113_v2 = vpop.f32.mrb[34].mxu0 }
 0x354   : > { %v3412_v63 = vpop.f32.mrb[35].mxu0 }
 0x359   : > { %v8116_v61 = vpop.f32.mrb[36].mxu0 }
 0x35a   : > { %v3425_v59 = vpop.f32.mrb[37].mxu0 }
 0x35b   : > { %v8117_v20 = vpop.f32.mrb[38].mxu0 }
 0x35c   : > { %v3428_v56 = vpop.f32.mrb[39].mxu0 }
 0x3d2   : > { %v8292_v58 = vpop.f32.mrb[24].mxu1 }
 0x3d3   : > { %v8362_v25 = vadd.f32 %v8292_v58, %v8112_v29  ;;  %v6220_v6 = vpop.f32.mrb[25].mxu1 }
 0x3d4   : > { %v8363_v22 = vadd.f32 %v6220_v6, %v3409_v17  ;;  %v8293_v34 = vpop.f32.mrb[26].mxu1 }
 0x3d5   : > { %v6388_v35 = vadd.f32 %v8362_v25, %v10885_v4  ;;  %v8364_v44 = vadd.f32 %v8293_v34, %v8113_v2  ;;  %v6223_v37 = vpop.f32.mrb[27].mxu1 }
 0x3d6   : > { %v6386_v12 = vadd.f32 %v8363_v22, %v10885_v4  ;;  %v8365_v13 = vadd.f32 %v6223_v37, %v3412_v63 }
 0x3d7   : > { %v6389_v9 = vadd.f32 %v8364_v44, %v10885_v4  ;;  %v6420_v1 = vmax.f32 %v6388_v35, 0.0 }
 0x3d8   : > { %v6387_v0 = vadd.f32 %v8365_v13, %v10885_v4  ;;  %v6418_v3 = vmax.f32 %v6386_v12, 0.0 }
 0x3d9   : > { %v6421_v10 = vmax.f32 %v6389_v9, 0.0 }
 0x3da   : > { %v6419_v41 = vmax.f32 %v6387_v0, 0.0  ;;  %v8296_v7 = vpop.f32.mrb[28].mxu1 }
 0x3db   : > { %v6451_v8 = vpack.c.bf16 %v6421_v10, %v6420_v1  ;;  %v8366_v52 = vadd.f32 %v8296_v7, %v8116_v61  ;;  %v6236_v54 = vpop.f32.mrb[29].mxu1 }
 0x3dc   : > { %v6450_v21 = vpack.c.bf16 %v6419_v41, %v6418_v3  ;;  %v8367_v28 = vadd.f32 %v6236_v54, %v3425_v59  ;;  %v8297_v51 = vpop.f32.mrb[30].mxu1 }
 0x3dd   : > { %v6392_v39 = vadd.f32 %v8366_v52, %v10885_v4  ;;  %v8368_v53 = vadd.f32 %v8297_v51, %v8117_v20  ;;  %v6239_v26 = vpop.f32.mrb[31].mxu1 }
 0x3de   : > { %v6390_v60 = vadd.f32 %v8367_v28, %v10885_v4  ;;  %v8369_v23 = vadd.f32 %v6239_v26, %v3428_v56  ;;  %8326 = vmatprep.mubr.msk.bf16.mxu0 %vm2218_vm9, %v6450_v21 }
 0x3df   : > { %v6393_v33 = vadd.f32 %v8368_v53, %v10885_v4  ;;  %8327 = vmatmul.mubr.msk.bf16.vlgmr.msra.gmra.mrb[64].mxu0 %vm2218_vm9, %v6451_v8  ;;  %v6424_v29 = vmax.f32 %v6392_v39, 0.0 }
 0x3e0   : > { %v6391_v38 = vadd.f32 %v8369_v23, %v10885_v4  ;;  %v6422_v2 = vmax.f32 %v6390_v60, 0.0 }
 0x3e1   : > { %v6425_v17 = vmax.f32 %v6393_v33, 0.0 }
 0x3e2   : > { %v6423_v63 = vmax.f32 %v6391_v38, 0.0  ;;  %v8300_v61 = vpop.f32.mrb[0].mxu1 }
 0x3e3   : > { %v6453_v59 = vpack.c.bf16 %v6425_v17, %v6424_v29  ;;  %v8370_v20 = vadd.f32 %v8300_v61, %v10811_v62  ;;  %v6252_v14 = vpop.f32.mrb[1].mxu1 }
 0x3e4   : > { %v6452_v58 = vpack.c.bf16 %v6423_v63, %v6422_v2  ;;  %v8371_v56 = vadd.f32 %v6252_v14, %v10813_v11  ;;  %v8301_v25 = vpop.f32.mrb[2].mxu1 }
 0x3e5   : > { %v6396_v6 = vadd.f32 %v8370_v20, %v10885_v4  ;;  %v8372_v22 = vadd.f32 %v8301_v25, %v10815_v48  ;;  %v6255_v34 = vpop.f32.mrb[3].mxu1 }
 0x3e6   : > { %v6394_v35 = vadd.f32 %v8371_v56, %v10885_v4  ;;  %v8373_v44 = vadd.f32 %v6255_v34, %v10817_v40  ;;  %8330 = vmatprep.mubr.msk.bf16.mxu0 %vm2218_vm9, %v6452_v58 }
 0x3e7   : > { %v6397_v37 = vadd.f32 %v8372_v22, %v10885_v4  ;;  %8331 = vmatmul.mubr.msk.bf16.gmra.mrb[68].mxu0 %vm2218_vm9, %v6453_v59  ;;  %v6428_v12 = vmax.f32 %v6396_v6, 0.0 }
 0x3e8   : > { %v6395_v62 = vadd.f32 %v8373_v44, %v10885_v4  ;;  %v6426_v13 = vmax.f32 %v6394_v35, 0.0 }
 0x3e9   : > { %v6429_v11 = vmax.f32 %v6397_v37, 0.0 }
 0x3ea   : > { %v6427_v9 = vmax.f32 %v6395_v62, 0.0  ;;  %v8304_v0 = vpop.f32.mrb[4].mxu1 }
 0x3eb   : > { %v6455_v1 = vpack.c.bf16 %v6429_v11, %v6428_v12  ;;  %v8374_v48 = vadd.f32 %v8304_v0, %v10827_v27  ;;  %v6268_v10 = vpop.f32.mrb[5].mxu1 }
 0x3ec   : > { %v6454_v3 = vpack.c.bf16 %v6427_v9, %v6426_v13  ;;  %v8375_v40 = vadd.f32 %v6268_v10, %v10829_v50  ;;  %v8305_v41 = vpop.f32.mrb[6].mxu1 }
 0x3ed   : > { %v6400_v7 = vadd.f32 %v8374_v48, %v10885_v4  ;;  %v8376_v8 = vadd.f32 %v8305_v41, %v10831_v16  ;;  %v6271_v52 = vpop.f32.mrb[7].mxu1 }
 0x3ee   : > { %v6398_v54 = vadd.f32 %v8375_v40, %v10885_v4  ;;  %v8377_v21 = vadd.f32 %v6271_v52, %v10833_v46  ;;  %8334 = vmatprep.mubr.msk.bf16.mxu0 %vm2218_vm9, %v6454_v3 }
 0x3ef   : > { %v6401_v28 = vadd.f32 %v8376_v8, %v10885_v4  ;;  %8335 = vmatmul.mubr.msk.bf16.gmra.mrb[72].mxu0 %vm2218_vm9, %v6455_v1  ;;  %v6432_v51 = vmax.f32 %v6400_v7, 0.0 }
 0x3f0   : > { %v6399_v27 = vadd.f32 %v8377_v21, %v10885_v4  ;;  %v6430_v39 = vmax.f32 %v6398_v54, 0.0 }
 0x3f1   : > { %v6433_v50 = vmax.f32 %v6401_v28, 0.0 }
 0x3f2   : > { %v6431_v53 = vmax.f32 %v6399_v27, 0.0  ;;  %v8308_v26 = vpop.f32.mrb[8].mxu1 }
 0x3f3   : > { %v6457_v60 = vpack.c.bf16 %v6433_v50, %v6432_v51  ;;  %v8378_v16 = vadd.f32 %v8308_v26, %v10843_v19  ;;  %v6284_v23 = vpop.f32.mrb[9].mxu1 }
 0x3f4   : > { %v6456_v33 = vpack.c.bf16 %v6431_v53, %v6430_v39  ;;  %v8379_v46 = vadd.f32 %v6284_v23, %v10845_v57  ;;  %v8309_v38 = vpop.f32.mrb[10].mxu1 }
 0x3f5   : > { %v6404_v29 = vadd.f32 %v8378_v16, %v10885_v4  ;;  %v8380_v17 = vadd.f32 %v8309_v38, %v10847_v47  ;;  %v6287_v2 = vpop.f32.mrb[11].mxu1 }
 0x3f6   : > { %v6402_v63 = vadd.f32 %v8379_v46, %v10885_v4  ;;  %v8381_v61 = vadd.f32 %v6287_v2, %v10849_v36  ;;  %8338 = vmatprep.mubr.msk.bf16.mxu0 %vm2218_vm9, %v6456_v33 }
 0x3f7   : > { %v6405_v59 = vadd.f32 %v8380_v17, %v10885_v4  ;;  %8339 = vmatmul.mubr.msk.bf16.gmra.mrb[76].mxu0 %vm2218_vm9, %v6457_v60  ;;  %v6436_v20 = vmax.f32 %v6404_v29, 0.0 }
 0x3f8   : > { %v6403_v19 = vadd.f32 %v8381_v61, %v10885_v4  ;;  %v6434_v14 = vmax.f32 %v6402_v63, 0.0 }
 0x3f9   : > { %v6437_v57 = vmax.f32 %v6405_v59, 0.0  ;;  %v8839_v59 = vld [vmem:[%s9213_s23 + $0x8] sm:$0xff]  }
 0x3fa   : > { %v6435_v58 = vmax.f32 %v6403_v19, 0.0  ;;  %v8312_v56 = vpop.f32.mrb[12].mxu1  ;;  %v6472_v19 = vunpack.c.l.bf16 %v8839_v59 }
 0x3fb   : > { %v6459_v25 = vpack.c.bf16 %v6437_v57, %v6436_v20  ;;  %v8382_v47 = vadd.f32 %v8312_v56, %v10855_v43  ;;  %v6300_v6 = vpop.f32.mrb[13].mxu1  ;;  %v8840_v20 = vld [vmem:[%s9213_s23] sm:$0xff]   ;;  %v6473_v56 = vunpack.c.h.bf16 %v8839_v59 }
 0x3fc   : > { %v6458_v22 = vpack.c.bf16 %v6435_v58, %v6434_v14  ;;  %v8383_v36 = vadd.f32 %v6300_v6, %v10857_v5  ;;  %v8313_v34 = vpop.f32.mrb[14].mxu1  ;;  %v6470_v57 = vunpack.c.l.bf16 %v8840_v20 }
 0x3fd   : > { %v6408_v35 = vadd.f32 %v8382_v47, %v10885_v4  ;;  %v8384_v44 = vadd.f32 %v8313_v34, %v10859_v31  ;;  %v6303_v37 = vpop.f32.mrb[15].mxu1 }
 0x3fe   : > { %v6406_v62 = vadd.f32 %v8383_v36, %v10885_v4  ;;  %v8385_v12 = vadd.f32 %v6303_v37, %v10861_v24  ;;  %8342 = vmatprep.mubr.msk.bf16.mxu0 %vm2218_vm9, %v6458_v22 }
 0x3ff   : > { %v6409_v11 = vadd.f32 %v8384_v44, %v10885_v4  ;;  %8343 = vmatmul.mubr.msk.bf16.gmra.mrb[80].mxu0 %vm2218_vm9, %v6459_v25  ;;  %v6440_v13 = vmax.f32 %v6408_v35, 0.0  ;;  %v6471_v25 = vunpack.c.h.bf16 %v8840_v20 }
 0x400   : > { %v6407_v43 = vadd.f32 %v8385_v12, %v10885_v4  ;;  %v6438_v9 = vmax.f32 %v6406_v62, 0.0 }
 0x401   : > { %v6441_v5 = vmax.f32 %v6409_v11, 0.0 }
 0x402   : > { %v6439_v0 = vmax.f32 %v6407_v43, 0.0  ;;  %v8316_v1 = vpop.f32.mrb[16].mxu1  ;;  %v8841_v43 = vld [vmem:[%s9213_s23 + $0x18] sm:$0xff]  }
 0x403   : > { %v6461_v48 = vpack.c.bf16 %v6441_v5, %v6440_v13  ;;  %v8386_v31 = vadd.f32 %v8316_v1, %v10863_v55  ;;  %v6316_v10 = vpop.f32.mrb[17].mxu1  ;;  %v6476_v13 = vunpack.c.l.bf16 %v8841_v43  ;;  %v8842_v1 = vld [vmem:[%s9213_s23 + $0x10] sm:$0xff]  }
 0x404   : > { %v6460_v3 = vpack.c.bf16 %v6439_v0, %v6438_v9  ;;  %v8387_v24 = vadd.f32 %v6316_v10, %v10865_v30  ;;  %v8317_v40 = vpop.f32.mrb[18].mxu1 }
 0x405   : > { %v6412_v41 = vadd.f32 %v8386_v31, %v10885_v4  ;;  %v8388_v7 = vadd.f32 %v8317_v40, %v10867_v32  ;;  %v6319_v8 = vpop.f32.mrb[19].mxu1 }
 0x406   : > { %v6410_v52 = vadd.f32 %v8387_v24, %v10885_v4  ;;  %v8389_v54 = vadd.f32 %v6319_v8, %v10869_v49  ;;  %8346 = vmatprep.mubr.msk.bf16.mxu0 %vm2218_vm9, %v6460_v3  ;;  %v6477_v24 = vunpack.c.h.bf16 %v8841_v43  ;;  %v6475_v8 = vunpack.c.h.bf16 %v8842_v1 }
 0x407   : > { %v6413_v21 = vadd.f32 %v8388_v7, %v10885_v4  ;;  %8347 = vmatmul.mubr.msk.bf16.gmra.mrb[84].mxu0 %vm2218_vm9, %v6461_v48  ;;  %v6444_v28 = vmax.f32 %v6412_v41, 0.0  ;;  %v6474_v48 = vunpack.c.l.bf16 %v8842_v1 }
 0x408   : > { %v6411_v55 = vadd.f32 %v8389_v54, %v10885_v4  ;;  %v6442_v27 = vmax.f32 %v6410_v52, 0.0 }
 0x409   : > { %v6445_v30 = vmax.f32 %v6413_v21, 0.0 }
 0x40a   : > { %v6443_v51 = vmax.f32 %v6411_v55, 0.0  ;;  %v8320_v50 = vpop.f32.mrb[20].mxu1 }
 0x40b   : > { %v6463_v39 = vpack.c.bf16 %v6445_v30, %v6444_v28  ;;  %v8390_v32 = vadd.f32 %v8320_v50, %v10871_v42  ;;  %v6332_v53 = vpop.f32.mrb[21].mxu1 }
 0x40c   : > { %v6462_v26 = vpack.c.bf16 %v6443_v51, %v6442_v27  ;;  %v8391_v49 = vadd.f32 %v6332_v53, %v10873_v45  ;;  %v8321_v60 = vpop.f32.mrb[22].mxu1 }
 0x40d   : > { %v6416_v16 = vadd.f32 %v8390_v32, %v10885_v4  ;;  %v8392_v23 = vadd.f32 %v8321_v60, %v10875_v18  ;;  %v6335_v33 = vpop.f32.mrb[23].mxu1  ;;  %v8844_v60 = vld [vmem:[%s9213_s23 + $0x20] sm:$0xff]  }
 0x40e   : > { %v6414_v46 = vadd.f32 %v8391_v49, %v10885_v4  ;;  %v8393_v38 = vadd.f32 %v6335_v33, %v10877_v15  ;;  %8350 = vmatprep.mubr.msk.bf16.mxu0 %vm2218_vm9, %v6462_v26  ;;  %v10962_v15 = vld [vmem:[%s11094_s6] ss:$0 sm:$0xff] }
 0x40f   : > { %v6417_v42 = vadd.f32 %v8392_v23, %v10885_v4  ;;  %8351 = vmatmul.mubr.msk.bf16.gmra.mrb[88].mxu0 %vm2218_vm9, %v6463_v39  ;;  %v6448_v29 = vmax.f32 %v6416_v16, 0.0  ;;  %v8843_v39 = vld [vmem:[%s9213_s23 + $0x28] sm:$0xff]   ;;  %v6478_v16 = vunpack.c.l.bf16 %v8844_v60 }
 0x410   : > { %v6415_v45 = vadd.f32 %v8393_v38, %v10885_v4  ;;  %v6446_v2 = vmax.f32 %v6414_v46, 0.0  ;;  %v6480_v32 = vunpack.c.l.bf16 %v8843_v39  ;;  %v6481_v38 = vunpack.c.h.bf16 %v8843_v39 }
 0x411   : > { %v6449_v17 = vmax.f32 %v6417_v42, 0.0 }
 0x412   : > { %v6447_v63 = vmax.f32 %v6415_v45, 0.0 }
 0x413   : > { %v6465_v18 = vpack.c.bf16 %v6449_v17, %v6448_v29  ;;  %v6479_v17 = vunpack.c.h.bf16 %v8844_v60 }
 0x414   : > { %v6464_v61 = vpack.c.bf16 %v6447_v63, %v6446_v2 }
 0x416   : > { %8354 = vmatprep.mubr.msk.bf16.mxu0 %vm2218_vm9, %v6464_v61 }
 0x417   : > { %8355 = vmatmul.mubr.msk.bf16.gmra.mrb[92].mxu0 %vm2218_vm9, %v6465_v18 }
 0x4b2   : > { %v8328_v4 = vpop.f32.mrb[64].mxu0 }
 0x4b3   : > { %v6612_v14 = vadd.f32 %v8328_v4, %v10962_v15  ;;  %v6603_v58 = vpop.f32.mrb[65].mxu0 }
 0x4b4   : > { %v6604_v47 = vadd.f32 %v10962_v15, %v6603_v58  ;;  %v8329_v6 = vpop.f32.mrb[66].mxu0 }
 0x4b5   : > { %v6732_v22 = vadd.f32 %v6612_v14, %v6472_v19  ;;  %v6615_v36 = vadd.f32 %v8329_v6, %v10962_v15  ;;  %v6606_v34 = vpop.f32.mrb[67].mxu0  ;;  %v8845_v14 = vld [vmem:[%s9213_s23 + $0x38] sm:$0xff]   ;;  %v8846_v6 = vld [vmem:[%s9213_s23 + $0x30] sm:$0xff]  }
 0x4b6   : > { %v6730_v35 = vadd.f32 %v6604_v47, %v6470_v57  ;;  %v6607_v44 = vadd.f32 %v10962_v15, %v6606_v34  ;;  %v6484_v58 = vunpack.c.l.bf16 %v8845_v14 }
 0x4b7   : > { %v6733_v37 = vadd.f32 %v6615_v36, %v6473_v56  ;;  %v6764_v12 = vmax.f32 %v6732_v22, 0.0  ;;  %v6482_v22 = vunpack.c.l.bf16 %v8846_v6 }
 0x4b8   : > { %v6731_v62 = vadd.f32 %v6607_v44, %v6471_v25  ;;  %v6762_v5 = vmax.f32 %v6730_v35, 0.0  ;;  %v6485_v44 = vunpack.c.h.bf16 %v8845_v14 }
 0x4b9   : > { %v6765_v11 = vmax.f32 %v6733_v37, 0.0 }
 0x4ba   : > { %v6763_v9 = vmax.f32 %v6731_v62, 0.0  ;;  %v8332_v0 = vpop.f32.mrb[68].mxu0 }
 0x4bb   : > { %v7659_v31 = vpack.c.bf16 %v6765_v11, %v6764_v12  ;;  %v6628_v10 = vadd.f32 %v8332_v0, %v10962_v15  ;;  %v6619_v3 = vpop.f32.mrb[69].mxu0  ;;  %v6483_v11 = vunpack.c.h.bf16 %v8846_v6 }
 0x4bc   : > { %v7654_v40 = vpack.c.bf16 %v6763_v9, %v6762_v5  ;;  %v6620_v41 = vadd.f32 %v10962_v15, %v6619_v3  ;;  %v8333_v7 = vpop.f32.mrb[70].mxu0  ;;  %v8847_v3 = vld [vmem:[%s9213_s23 + $0x48] sm:$0xff]  }
 0x4bd   : > { %7731 = vst [vmem:[%s10976_s9 + $0x8] sm:$0xff] %v7659_v31   ;;  %v6736_v52 = vadd.f32 %v6628_v10, %v6476_v13  ;;  %v6631_v54 = vadd.f32 %v8333_v7, %v10962_v15  ;;  %v6622_v21 = vpop.f32.mrb[71].mxu0 }
 0x4be   : > { %7655 = vst [vmem:[%s10976_s9] sm:$0xff] %v7654_v40   ;;  %v6734_v55 = vadd.f32 %v6620_v41, %v6474_v48  ;;  %v6623_v28 = vadd.f32 %v10962_v15, %v6622_v21 }
 0x4bf   : > { %v6737_v30 = vadd.f32 %v6631_v54, %v6477_v24  ;;  %v6768_v51 = vmax.f32 %v6736_v52, 0.0  ;;  %v6488_v24 = vunpack.c.l.bf16 %v8847_v3 }
 0x4c0   : > { %v6735_v27 = vadd.f32 %v6623_v28, %v6475_v8  ;;  %v6766_v53 = vmax.f32 %v6734_v55, 0.0  ;;  %v8848_v8 = vld [vmem:[%s9213_s23 + $0x40] sm:$0xff]   ;;  %v6489_v28 = vunpack.c.h.bf16 %v8847_v3 }
 0x4c1   : > { %v6769_v50 = vmax.f32 %v6737_v30, 0.0  ;;  %v6486_v52 = vunpack.c.l.bf16 %v8848_v8 }
 0x4c2   : > { %v6767_v26 = vmax.f32 %v6735_v27, 0.0  ;;  %v8336_v49 = vpop.f32.mrb[72].mxu0 }
 0x4c3   : > { %v7669_v23 = vpack.c.bf16 %v6769_v50, %v6768_v51  ;;  %v6644_v33 = vadd.f32 %v8336_v49, %v10962_v15  ;;  %v6635_v46 = vpop.f32.mrb[73].mxu0  ;;  %v6487_v50 = vunpack.c.h.bf16 %v8848_v8 }
 0x4c4   : > { %v7664_v42 = vpack.c.bf16 %v6767_v26, %v6766_v53  ;;  %v6636_v45 = vadd.f32 %v10962_v15, %v6635_v46  ;;  %v8337_v29 = vpop.f32.mrb[74].mxu0  ;;  %v8849_v46 = vld [vmem:[%s9213_s23 + $0x58] sm:$0xff]  }
 0x4c5   : > { %7733 = vst [vmem:[%s10976_s9 + $0x18] sm:$0xff] %v7669_v23   ;;  %v6740_v2 = vadd.f32 %v6644_v33, %v6480_v32  ;;  %v6647_v63 = vadd.f32 %v8337_v29, %v10962_v15  ;;  %v6638_v18 = vpop.f32.mrb[75].mxu0 }
 0x4c6   : > { %7732 = vst [vmem:[%s10976_s9 + $0x10] sm:$0xff] %v7664_v42   ;;  %v6738_v61 = vadd.f32 %v6636_v45, %v6478_v16  ;;  %v6639_v59 = vadd.f32 %v10962_v15, %v6638_v18 }
 0x4c7   : > { %v6741_v19 = vadd.f32 %v6647_v63, %v6481_v38  ;;  %v6772_v57 = vmax.f32 %v6740_v2, 0.0  ;;  %v6492_v38 = vunpack.c.l.bf16 %v8849_v46 }
 0x4c8   : > { %v6739_v20 = vadd.f32 %v6639_v59, %v6479_v17  ;;  %v6770_v56 = vmax.f32 %v6738_v61, 0.0  ;;  %v8850_v17 = vld [vmem:[%s9213_s23 + $0x50] sm:$0xff]   ;;  %v6493_v59 = vunpack.c.h.bf16 %v8849_v46 }
 0x4c9   : > { %v6773_v4 = vmax.f32 %v6741_v19, 0.0  ;;  %v6490_v2 = vunpack.c.l.bf16 %v8850_v17 }
 0x4ca   : > { %v6771_v25 = vmax.f32 %v6739_v20, 0.0  ;;  %v8340_v47 = vpop.f32.mrb[76].mxu0 }
 0x4cb   : > { %v7679_v36 = vpack.c.bf16 %v6773_v4, %v6772_v57  ;;  %v6660_v34 = vadd.f32 %v8340_v47, %v10962_v15  ;;  %v6651_v35 = vpop.f32.mrb[77].mxu0  ;;  %v6491_v4 = vunpack.c.h.bf16 %v8850_v17 }
 0x4cc   : > { %v7674_v37 = vpack.c.bf16 %v6771_v25, %v6770_v56  ;;  %v6652_v62 = vadd.f32 %v10962_v15, %v6651_v35  ;;  %v8341_v12 = vpop.f32.mrb[78].mxu0  ;;  %v8851_v35 = vld [vmem:[%s9213_s23 + $0x68] sm:$0xff]  }
 0x4cd   : > { %7735 = vst [vmem:[%s10976_s9 + $0x28] sm:$0xff] %v7679_v36   ;;  %v6744_v43 = vadd.f32 %v6660_v34, %v6484_v58  ;;  %v6663_v13 = vadd.f32 %v8341_v12, %v10962_v15  ;;  %v6654_v5 = vpop.f32.mrb[79].mxu0 }
 0x4ce   : > { %7734 = vst [vmem:[%s10976_s9 + $0x20] sm:$0xff] %v7674_v37   ;;  %v6742_v9 = vadd.f32 %v6652_v62, %v6482_v22  ;;  %v6655_v0 = vadd.f32 %v10962_v15, %v6654_v5 }
 0x4cf   : > { %v6745_v1 = vadd.f32 %v6663_v13, %v6485_v44  ;;  %v6776_v31 = vmax.f32 %v6744_v43, 0.0  ;;  %v6496_v44 = vunpack.c.l.bf16 %v8851_v35 }
 0x4d0   : > { %v6743_v48 = vadd.f32 %v6655_v0, %v6483_v11  ;;  %v6774_v40 = vmax.f32 %v6742_v9, 0.0  ;;  %v8852_v11 = vld [vmem:[%s9213_s23 + $0x60] sm:$0xff]   ;;  %v6497_v0 = vunpack.c.h.bf16 %v8851_v35 }
 0x4d1   : > { %v6777_v10 = vmax.f32 %v6745_v1, 0.0  ;;  %v6494_v43 = vunpack.c.l.bf16 %v8852_v11 }
 0x4d2   : > { %v6775_v41 = vmax.f32 %v6743_v48, 0.0  ;;  %v8344_v7 = vpop.f32.mrb[80].mxu0 }
 0x4d3   : > { %v7689_v54 = vpack.c.bf16 %v6777_v10, %v6776_v31  ;;  %v6676_v21 = vadd.f32 %v8344_v7, %v10962_v15  ;;  %v6667_v55 = vpop.f32.mrb[81].mxu0  ;;  %v6495_v10 = vunpack.c.h.bf16 %v8852_v11 }
 0x4d4   : > { %v7684_v30 = vpack.c.bf16 %v6775_v41, %v6774_v40  ;;  %v6668_v27 = vadd.f32 %v10962_v15, %v6667_v55  ;;  %v8345_v51 = vpop.f32.mrb[82].mxu0  ;;  %v8853_v55 = vld [vmem:[%s9213_s23 + $0x78] sm:$0xff]  }
 0x4d5   : > { %7737 = vst [vmem:[%s10976_s9 + $0x38] sm:$0xff] %v7689_v54   ;;  %v6748_v39 = vadd.f32 %v6676_v21, %v6488_v24  ;;  %v6679_v32 = vadd.f32 %v8345_v51, %v10962_v15  ;;  %v6670_v53 = vpop.f32.mrb[83].mxu0 }
 0x4d6   : > { %7736 = vst [vmem:[%s10976_s9 + $0x30] sm:$0xff] %v7684_v30   ;;  %v6746_v26 = vadd.f32 %v6668_v27, %v6486_v52  ;;  %v6671_v49 = vadd.f32 %v10962_v15, %v6670_v53 }
 0x4d7   : > { %v6749_v60 = vadd.f32 %v6679_v32, %v6489_v28  ;;  %v6780_v23 = vmax.f32 %v6748_v39, 0.0  ;;  %v6500_v28 = vunpack.c.l.bf16 %v8853_v55 }
 0x4d8   : > { %v6747_v16 = vadd.f32 %v6671_v49, %v6487_v50  ;;  %v6778_v42 = vmax.f32 %v6746_v26, 0.0  ;;  %v8854_v50 = vld [vmem:[%s9213_s23 + $0x70] sm:$0xff]   ;;  %v6501_v49 = vunpack.c.h.bf16 %v8853_v55  ;;  %s6971_s23 = sshll.u32 %s10976_s9, 4  ;;  %s11037_s23 = int_to_ptr.vmem [resolvable:$true] %s6971_s23 }
 0x4d9   : > { %v6781_v33 = vmax.f32 %v6749_v60, 0.0  ;;  %v6498_v39 = vunpack.c.l.bf16 %v8854_v50  ;;  %s8913_s30 = scalar_lea.vmem %s11037_s23, 2048  ;;  %p8920_p12 = scmp.lt.s32.totalorder %s11037_s23, %s8918_s13 }
 0x4da   : > { %v6779_v45 = vmax.f32 %v6747_v16, 0.0  ;;  %v8348_v29 = vpop.f32.mrb[84].mxu0  ;;  %p8914_p4 = scmp.ne.s32.totalorder %s11037_s23, %s8913_s30  ;;  %p8921_p11 = scmp.lt.s32.totalorder %s8919_s18, %s8913_s30 }
 0x4db   : > { %v7699_v63 = vpack.c.bf16 %v6781_v33, %v6780_v23  ;;  %v6692_v18 = vadd.f32 %v8348_v29, %v10962_v15  ;;  %v6683_v61 = vpop.f32.mrb[85].mxu0  ;;  %v6499_v33 = vunpack.c.h.bf16 %v8854_v50 }
 0x4dc   : > { %v7694_v19 = vpack.c.bf16 %v6779_v45, %v6778_v42  ;;  %v6684_v20 = vadd.f32 %v10962_v15, %v6683_v61  ;;  %v8349_v57 = vpop.f32.mrb[86].mxu0  ;;  %p8915_p6 = pnand %p8914_p4, %p9148_p10  ;;  %p8922_p0 = por %p8921_p11, %p8920_p12 }
 0x4dd   : > { %7739 = vst [vmem:[%s10976_s9 + $0x48] sm:$0xff] %v7699_v63   ;;  %v6752_v14 = vadd.f32 %v6692_v18, %v6492_v38  ;;  %v6695_v58 = vadd.f32 %v8349_v57, %v10962_v15  ;;  %v6686_v56 = vpop.f32.mrb[87].mxu0 }
 0x4de   : > { %7738 = vst [vmem:[%s10976_s9 + $0x40] sm:$0xff] %v7694_v19   ;;  %v6750_v25 = vadd.f32 %v6684_v20, %v6490_v2  ;;  %v6687_v47 = vadd.f32 %v10962_v15, %v6686_v56  ;;  %p8916_p8 = pneg %p8915_p6 }
 0x4df   : > { %v6753_v6 = vadd.f32 %v6695_v58, %v6493_v59  ;;  %v6784_v36 = vmax.f32 %v6752_v14, 0.0 }
 0x4e0   : > { %v6751_v22 = vadd.f32 %v6687_v47, %v6491_v4  ;;  %v6782_v37 = vmax.f32 %v6750_v25, 0.0  ;;  %p8923_p5 = pnand %p8922_p0, %p8916_p8 }
 0x4e1   : > { %v6785_v34 = vmax.f32 %v6753_v6, 0.0 }
 0x4e2   : > { %v6783_v62 = vmax.f32 %v6751_v22, 0.0  ;;  %v8352_v12 = vpop.f32.mrb[88].mxu0 }
 0x4e3   : > { %v7709_v13 = vpack.c.bf16 %v6785_v34, %v6784_v36  ;;  %v6708_v5 = vadd.f32 %v8352_v12, %v10962_v15  ;;  %v6699_v9 = vpop.f32.mrb[89].mxu0 }
 0x4e4   : > { %v7704_v1 = vpack.c.bf16 %v6783_v62, %v6782_v37  ;;  %v6700_v48 = vadd.f32 %v10962_v15, %v6699_v9  ;;  %v8353_v31 = vpop.f32.mrb[90].mxu0 }
 0x4e5   : > { %7741 = vst [vmem:[%s10976_s9 + $0x58] sm:$0xff] %v7709_v13   ;;  %v6756_v3 = vadd.f32 %v6708_v5, %v6496_v44  ;;  %v6711_v24 = vadd.f32 %v8353_v31, %v10962_v15  ;;  %v6702_v40 = vpop.f32.mrb[91].mxu0 }
 0x4e6   : > { %7740 = vst [vmem:[%s10976_s9 + $0x50] sm:$0xff] %v7704_v1   ;;  %v6754_v41 = vadd.f32 %v6700_v48, %v6494_v43  ;;  %v6703_v7 = vadd.f32 %v10962_v15, %v6702_v40 }
 0x4e7   : > { %v6757_v8 = vadd.f32 %v6711_v24, %v6497_v0  ;;  %v6788_v54 = vmax.f32 %v6756_v3, 0.0 }
 0x4e8   : > { %v6755_v52 = vadd.f32 %v6703_v7, %v6495_v10  ;;  %v6786_v30 = vmax.f32 %v6754_v41, 0.0 }
 0x4e9   : > { %v6789_v21 = vmax.f32 %v6757_v8, 0.0 }
 0x4ea   : > { %v6787_v27 = vmax.f32 %v6755_v52, 0.0  ;;  %v8356_v51 = vpop.f32.mrb[92].mxu0 }
 0x4eb   : > { %v7719_v32 = vpack.c.bf16 %v6789_v21, %v6788_v54  ;;  %v6724_v53 = vadd.f32 %v8356_v51, %v10962_v15  ;;  %v6715_v26 = vpop.f32.mrb[93].mxu0 }
 0x4ec   : > { %v7714_v60 = vpack.c.bf16 %v6787_v27, %v6786_v30  ;;  %v6716_v16 = vadd.f32 %v10962_v15, %v6715_v26  ;;  %v8357_v23 = vpop.f32.mrb[94].mxu0 }
 0x4ed   : > { %7743 = vst [vmem:[%s10976_s9 + $0x68] sm:$0xff] %v7719_v32   ;;  %v6760_v46 = vadd.f32 %v6724_v53, %v6500_v28  ;;  %v6727_v38 = vadd.f32 %v8357_v23, %v10962_v15  ;;  %v6718_v42 = vpop.f32.mrb[95].mxu0 }
 0x4ee   : > { %7742 = vst [vmem:[%s10976_s9 + $0x60] sm:$0xff] %v7714_v60   ;;  %v6758_v45 = vadd.f32 %v6716_v16, %v6498_v39  ;;  %v6719_v29 = vadd.f32 %v10962_v15, %v6718_v42 }
 0x4ef   : > { %v6761_v17 = vadd.f32 %v6727_v38, %v6501_v49  ;;  %v6792_v63 = vmax.f32 %v6760_v46, 0.0 }
 0x4f0   : > { %v6759_v2 = vadd.f32 %v6719_v29, %v6499_v33  ;;  %v6790_v61 = vmax.f32 %v6758_v45, 0.0 }
 0x4f1   : > { %v6793_v18 = vmax.f32 %v6761_v17, 0.0 }
 0x4f2   : > { %v6791_v59 = vmax.f32 %v6759_v2, 0.0 }
 0x4f3   : > { %v7729_v19 = vpack.c.bf16 %v6793_v18, %v6792_v63 }
 0x4f4   : > { %v7724_v15 = vpack.c.bf16 %v6791_v59, %v6790_v61 }
 0x4f5   : > { %7745 = vst [vmem:[%s10976_s9 + $0x78] sm:$0xff] %v7729_v19  }
 0x4f6   : > { %7744 = vst [vmem:[%s10976_s9 + $0x70] sm:$0xff] %v7724_v15  }
 0x4f7   : > { %8926 = shalt.err (!%p8923_p5)
}
 0x4f8   : > { %s8927_s21 = scalar_lea.hbm %s11035_s22, 2048  ;;  %s8931_s9 = scalar_lea.hbm %s11095_s7, 4096 }
 0x4f9   : > { %p8928_p9 = scmp.ne.s32.totalorder %s11035_s22, %s8927_s21  ;;  %p8932_p3 = scmp.lt.u32.totalorder %s11035_s22, %s11095_s7 }
 0x4fa   : > { %p8933_p7 = scmp.lt.u32.totalorder %s8931_s9, %s8927_s21  ;;  %p8935_p4 = scmp.lt.u32.totalorder %s8927_s21, %s11035_s22 }
 0x4fb   : > { %p8929_p1 = pnand %p8928_p9, %p9148_p10 }
 0x4fc   : > { %p8934_p13 = por %p8933_p7, %p8932_p3 }
 0x4fd   : > { %p8930_p2 = pneg %p8929_p1 }
 0x4fe   : > { %p8936_p6 = por %p8935_p4, %p8934_p13 }
 0x500   : > { %p8937_p8 = pnand %p8936_p6, %p8930_p2 }
 0x502   : > { %8940 = shalt.err (!%p8937_p8)
}
 0x503   : > { %s9007_s14 = smov 64   ;;  %s9008_s30 = smov 4  }
 0x504   : > { %8624 = dma.vmem_to_hbm [thread:$0]  (%p9148_p10), %s11037_s23, 2048, %s11035_s22, %s6955_s27, %s9007_s14, %s9007_s14, %s9008_s30  }
 0x505 PF: > { %s6986_s3 = sand.u32 1, %s8979_s24   ;;  %p11225_p12 = scmp.ne.s32.totalorder %s11130_s12, 0 }
 0x506   : > { %p11226_p11 = scmp.ge.s32.totalorder %s8999_s29, 2  ;;  %s6987_s13 = scalar_lea.sflag [#allocation5], %s6986_s3 }
 0x508   : > { %p8635_p0 = pnand %p11226_p11, %p11225_p12 }
 0x50a   : > { %8974 = dma.done.wait (!%p8635_p0), %s6987_s13, 2048  }
 0x50b   : > { %8976 = vsyncadd (!%p8635_p0), %s6987_s13, 4294965248  ;;  %s24_s29 = sadd.s32 1, %s8999_s29   ;;  %s11227_s24 = smov %s8983_s25 }
 0x50c   : > { %p21_p5 = scmp.ge.s32.totalorder %s24_s29, 4   ;;  %s11228_s25 = smov %s8987_s26 }
 0x50d   : > { %s11229_s26 = smov %s9157_s8  ;;  %s11230_s27 = smov %s8995_s28 }
 0x50e   : > { %s11231_s28 = smov %s11233_s17  ;;  %23 = sbr.rel (!%p21_p5) target bundleno = 9 (0x9), region = 128 }
 0x515   :  { %6992 = vsyncpa [#allocation4], 1 }
 0x516   :  { %6994 = vsyncpa [#allocation4 + $0x1], 1 }
 0x517   :  { %6995 = vsyncpa [#allocation7], 1 }
 0x518   :  { %6996 = vsyncpa [#allocation5], 1 }
 0x519   :  { %6998 = vsyncpa [#allocation5 + $0x1], 1 }

</bundles_post_ra>
